<compile_context>
chip_gen: v6e
topology: v6e:2x2x1
jax: 0.10.0
libtpu: 0.0.40
codegen_flags: <defaults>
</compile_context>

<pallas_src>
import functools

import jax
import jax.numpy as jnp
from jax.experimental import pallas as pl
from jax.experimental.pallas import tpu as pltpu


LANE = 128
TAIL = 8          # extra scratch rows so shifted tap slices never read out of bounds


def _round_up(x, m):
    return (x + m - 1) // m * m


# ------------------------------- Pallas kernel -------------------------------


def _bottleneck_kernel(xpad_ref, mask_ref, w1_ref, s1_ref, b1_ref,
                       w2_ref, s2_ref, b2_ref, w3_ref, s3_ref, b3_ref,
                       out_ref, y1_scr, *, D, Wp, Mp, M):
    # xpad_ref: (1, D+2, Mp, Cin_p) bf16  -- whole padded sample (resident across the d axis)
    # mask_ref: (Mp, 1) f32               -- 1.0 on valid (h, w) positions of a padded plane
    # w1_ref:   (Cin_p, Cp) bf16          -- conv1 as a matmul
    # w2_ref:   (27, Cp, Cp) bf16         -- conv2 taps, t = (kd*3+kh)*3+kw
    # w3_ref:   (Cp, Cout_p) bf16         -- conv3 as a matmul
    # s*/b*:    (1, C) f32                -- folded BatchNorm scale / shift
    # out_ref:  (1, 1, M, Cout_p) bf16    -- one output depth-plane (flattened H x Wp)
    # y1_scr:   (3, Mp + TAIL, Cp) bf16   -- rolling circular buffer of stage-1 planes;
    #                                        padded depth dz lives in slot dz % 3.
    d = pl.program_id(1)
    Cp = y1_scr.shape[2]
    sp_mask = mask_ref[...]                                   # (Mp, 1) f32

    def compute_plane(dz, slot, valid):
        # conv1 (1x1x1) + BN1 + ReLU for padded depth plane dz, masked so conv2 sees true
        # zero padding (spatial halo rows/cols and out-of-range depth planes -> 0).
        x_plane = xpad_ref[0, dz]                             # (Mp, Cin_p) bf16
        y = jnp.dot(x_plane, w1_ref[...],
                    preferred_element_type=jnp.float32)       # MXU, f32 accumulate
        y = jnp.maximum(y * s1_ref[...] + b1_ref[...], 0.0)   # BN1 + ReLU (f32)
        y = y * (sp_mask * valid)
        y1_scr[slot, pl.ds(0, Mp), :] = y.astype(y1_scr.dtype)

    # ---- prologue (once per sample): prime the rolling buffer ----
    @pl.when(d == 0)
    def _():
        ztail = jnp.zeros((TAIL, Cp), y1_scr.dtype)
        for s in range(3):
            # zero the small tail so shifted tap slices never read stale scratch
            y1_scr[s, pl.ds(Mp, TAIL), :] = ztail
        # padded depth 0 is pure depth padding -> stage-1 output is identically zero
        y1_scr[0, pl.ds(0, Mp), :] = jnp.zeros((Mp, Cp), y1_scr.dtype)
        # padded depth 1 is the first real plane
        compute_plane(1, 1, 1.0)

    # ---- stage 1 (rolling): compute only the newly exposed plane d + 2 ----
    new_dz = d + 2
    new_slot = new_dz % 3
    valid_new = (new_dz <= D).astype(jnp.float32)             # last step exposes depth padding
    compute_plane(new_dz, new_slot, valid_new)

    # ---- stage 2: conv2 (3x3x3, padding=1) as 27 contiguous-row-shift MXU matmuls ----
    # Output rows q = h*Wp + w for h in [0,H), w in [0,Wp): the w >= W columns are
    # throwaway, but every tap is a single contiguous row slice at offset kh*Wp + kw of the
    # flattened padded plane.  The f32 accumulator is loop-carried (no scratch RMW traffic).
    acc = None
    for kd in range(3):
        slot = (d + kd) % 3
        for kh in range(3):
            for kw in range(3):
                off = kh * Wp + kw
                patch = y1_scr[slot, pl.ds(off, M), :]        # (M, Cp) bf16, contiguous
                t = (kd * 3 + kh) * 3 + kw
                part = jnp.dot(patch, w2_ref[t],
                               preferred_element_type=jnp.float32)
                acc = part if acc is None else acc + part

    # ---- BN2 + ReLU, conv3 (1x1x1) + BN3, residual add, ReLU ----
    y2 = jnp.maximum(acc * s2_ref[...] + b2_ref[...], 0.0)
    y3 = jnp.dot(y2.astype(jnp.bfloat16), w3_ref[...],
                 preferred_element_type=jnp.float32)
    y3 = y3 * s3_ref[...] + b3_ref[...]
    # Residual for output row q lives at padded row q + Wp + 1 of plane d+1 (contiguous).
    res = xpad_ref[0, d + 1, pl.ds(Wp + 1, M), :].astype(jnp.float32)
    out_ref[0, 0] = jnp.maximum(y3 + res, 0.0).astype(out_ref.dtype)


# -------------------------------- JAX wrapper ---------------------------------


def bottleneck_forward(x_ndhwc, params):
    """x_ndhwc: (N, D, H, W, Cin) float32; params: matmul weights + folded BN."""
    w1, s1, b1, w2, s2, b2, w3, s3, b3 = params
    N, D, H, W, Cin = x_ndhwc.shape
    P = w1.shape[1]
    Cout = w3.shape[1]
    assert Cin == Cout, "identity shortcut requires in_planes == planes * expansion"

    Cin_p = _round_up(Cin, LANE)
    Cp = _round_up(P, LANE)
    Cout_p = _round_up(Cout, LANE)
    assert Cin_p == Cout_p
    Dp, Hp = D + 2, H + 2
    # Pad Wp to a multiple of 8 when the extra throwaway columns cost <= 25% (sublane-
    # aligned tap offsets for realistic widths; skipped for tiny W like the test shape).
    Wp_aligned = _round_up(W + 2, 8)
    Wp = Wp_aligned if Wp_aligned * 4 <= (W + 2) * 5 else W + 2
    Mp = Hp * Wp           # rows of one flattened padded plane
    M = H * Wp             # output rows per plane (columns w >= W are discarded)

    # Lane-dense, spatially padded, channel-padded, flattened, bf16 input.
    # TODO(synk): this pad/cast pre-pass (and the final crop) disappear when stacked
    #             blocks keep the padded bf16 layout between kernels.
    xpad = jnp.pad(x_ndhwc,
                   ((0, 0), (1, 1), (1, 1), (1, Wp - W - 1), (0, Cin_p - Cin)))
    xpad = xpad.reshape(N, Dp, Mp, Cin_p).astype(jnp.bfloat16)

    # Channel-padded bf16 weights; f32 folded-BN scale/shift (zero on padded channels).
    w1p = jnp.zeros((Cin_p, Cp), jnp.bfloat16).at[:Cin, :P].set(w1.astype(jnp.bfloat16))
    w2p = jnp.zeros((27, Cp, Cp), jnp.bfloat16).at[:, :P, :P].set(
        w2.reshape(27, P, P).astype(jnp.bfloat16))
    w3p = jnp.zeros((Cp, Cout_p), jnp.bfloat16).at[:P, :Cout].set(w3.astype(jnp.bfloat16))

    def padc(v, c):
        return jnp.pad(v, ((0, 0), (0, c - v.shape[1])))

    s1p, b1p = padc(s1, Cp), padc(b1, Cp)
    s2p, b2p = padc(s2, Cp), padc(b2, Cp)
    s3p, b3p = padc(s3, Cout_p), padc(b3, Cout_p)

    # Validity mask of one flattened padded (Hp, Wp) plane.
    hh = jnp.arange(Hp)[:, None]
    ww = jnp.arange(Wp)[None, :]
    sp_mask = ((hh >= 1) & (hh <= H) & (ww >= 1) & (ww <= W)).astype(jnp.float32)
    sp_mask = sp_mask.reshape(Mp, 1)

    kernel = functools.partial(_bottleneck_kernel, D=D, Wp=Wp, Mp=Mp, M=M)

    # Size the VMEM limit from the actual footprint (inputs/outputs double-buffered by
    # default) instead of a flat cap, leaving 2x headroom for compiler scratch.
    in_bytes = (Dp * Mp * Cin_p * 2                                   # xpad block (bf16)
                + Mp * 4                                              # mask (f32)
                + (Cin_p * Cp + 27 * Cp * Cp + Cp * Cout_p) * 2       # weights (bf16)
                + (4 * Cp + 2 * Cout_p) * 4)                          # BN scale/shift (f32)
    out_bytes = M * Cout_p * 2
    scr_bytes = 3 * (Mp + TAIL) * Cp * 2
    footprint = 2 * (in_bytes + out_bytes) + scr_bytes
    vmem_limit = int(max(32 * 1024 * 1024, min(2 * footprint, 112 * 1024 * 1024)))

    out = pl.pallas_call(
        kernel,
        out_shape=jax.ShapeDtypeStruct((N, D, M, Cout_p), jnp.bfloat16),
        grid=(N, D),
        in_specs=[
            # Whole padded sample; block index depends only on n, so it stays resident in
            # VMEM across the sequential d axis and is DMA'd once per sample.
            pl.BlockSpec((1, Dp, Mp, Cin_p), lambda n, d: (n, 0, 0, 0)),
            pl.BlockSpec((Mp, 1), lambda n, d: (0, 0)),
            # Grid-invariant weights / BN params: fetched once (block index never changes).
            pl.BlockSpec((Cin_p, Cp), lambda n, d: (0, 0)),
            pl.BlockSpec((1, Cp), lambda n, d: (0, 0)),
            pl.BlockSpec((1, Cp), lambda n, d: (0, 0)),
            pl.BlockSpec((27, Cp, Cp), lambda n, d: (0, 0, 0)),
            pl.BlockSpec((1, Cp), lambda n, d: (0, 0)),
            pl.BlockSpec((1, Cp), lambda n, d: (0, 0)),
            pl.BlockSpec((Cp, Cout_p), lambda n, d: (0, 0)),
            pl.BlockSpec((1, Cout_p), lambda n, d: (0, 0)),
            pl.BlockSpec((1, Cout_p), lambda n, d: (0, 0)),
        ],
        out_specs=pl.BlockSpec((1, 1, M, Cout_p), lambda n, d: (n, d, 0, 0)),
        scratch_shapes=[
            pltpu.VMEM((3, Mp + TAIL, Cp), jnp.bfloat16),  # rolling stage-1 circular buffer
        ],
        compiler_params=pltpu.CompilerParams(
            # N parallel (feeds both TensorCores on v7x); d sequential for the rolling
            # stage-1 window.
            dimension_semantics=("parallel", "arbitrary"),
            vmem_limit_bytes=vmem_limit),
    )(xpad, sp_mask, w1p, s1p, b1p, w2p, s2p, b2p, w3p, s3p, b3p)

    # Drop the throwaway W-columns and the channel padding (bf16 output).
    out = out.reshape(N, D, H, Wp, Cout_p)[:, :, :, :W, :Cout]
    return out


# --------------------------- reference (pure JAX) -----------------------------


def _conv3d_ndhwc(x, w, padding):
    return jax.lax.conv_general_dilated(
        x, w, window_strides=(1, 1, 1), padding=padding,
        dimension_numbers=("NDHWC", "DHWIO", "NDHWC"))


def bottleneck_reference(x_ndhwc, params):
    w1, s1, b1, w2, s2, b2, w3, s3, b3 = params
    Cin, P = w1.shape
    Cout = w3.shape[1]
    y = _conv3d_ndhwc(x_ndhwc, w1.reshape(1, 1, 1, Cin, P), "VALID")
    y = jnp.maximum(y * s1 + b1, 0.0)
    y = _conv3d_ndhwc(y, w2, [(1, 1), (1, 1), (1, 1)])
    y = jnp.maximum(y * s2 + b2, 0.0)
    y = _conv3d_ndhwc(y, w3.reshape(1, 1, 1, P, Cout), "VALID")
    y = y * s3 + b3
    return jnp.maximum(y + x_ndhwc, 0.0)


# -------------------------------- param setup ---------------------------------


def _fold_bn(gamma, beta, mean, var, eps=1e-5):
    scale = gamma / jnp.sqrt(var + eps)
    shift = beta - mean * scale
    return scale.reshape(1, -1), shift.reshape(1, -1)


def make_params(key, in_planes, planes):
    expansion = 2
    out_planes = planes * expansion
    ks = jax.random.split(key, 16)

    # PyTorch conv weights: (Cout, Cin, kD, kH, kW) -> matmul / DHWIO layouts.
    w1_t = 0.1 * jax.random.normal(ks[0], (planes, in_planes, 1, 1, 1), jnp.float32)
    w2_t = 0.1 * jax.random.normal(ks[1], (planes, planes, 3, 3, 3), jnp.float32)
    w3_t = 0.1 * jax.random.normal(ks[2], (out_planes, planes, 1, 1, 1), jnp.float32)
    w1 = jnp.transpose(w1_t[:, :, 0, 0, 0], (1, 0))                 # (Cin, P)
    w2 = jnp.transpose(w2_t, (2, 3, 4, 1, 0))                       # (3,3,3, Cin=P, Cout=P)
    w3 = jnp.transpose(w3_t[:, :, 0, 0, 0], (1, 0))                 # (P, 2P)

    def bn(kg, kb, km, kv, c):
        gamma = 1.0 + 0.1 * jax.random.normal(kg, (c,), jnp.float32)
        beta = 0.05 * jax.random.normal(kb, (c,), jnp.float32)
        mean = 0.1 * jax.random.normal(km, (c,), jnp.float32)
        var = jax.random.uniform(kv, (c,), jnp.float32, 0.5, 1.5)
        return _fold_bn(gamma, beta, mean, var)

    s1, b1 = bn(ks[3], ks[4], ks[5], ks[6], planes)
    s2, b2 = bn(ks[7], ks[8], ks[9], ks[10], planes)
    s3, b3 = bn(ks[11], ks[12], ks[13], ks[14], out_planes)
    return (w1, s1, b1, w2, s2, b2, w3, s3, b3)


# ----------------------------------- main --------------------------------------


if __name__ == "__main__":
    # Small shapes: batch=2, in_planes=8, planes=4 (expansion=2 -> out channels 8),
    # spatial D,H,W = 4,6,8.  stride=1, downsample=None (so in_planes == planes*expansion).
    N, in_planes, planes = 2, 8, 4
    D, H, W = 4, 6, 8

    key = jax.random.PRNGKey(0)
    kx, kp = jax.random.split(key)
    x_ncdhw = jax.random.normal(kx, (N, in_planes, D, H, W), jnp.float32)  # PyTorch layout
    x_ndhwc = jnp.transpose(x_ncdhw, (0, 2, 3, 4, 1))                      # kernel layout

    params = make_params(kp, in_planes, planes)

    out = jax.jit(bottleneck_forward)(x_ndhwc, params)
    out = jax.block_until_ready(out)

    ref = bottleneck_reference(x_ndhwc, params)
    assert out.shape == (N, D, H, W, planes * 2)
    # Loose tolerance: bf16 MXU inputs with f32 accumulation and a bf16 output store.
    assert jnp.allclose(out.astype(jnp.float32), ref, atol=7e-2, rtol=7e-2), \
        "Pallas output mismatch vs reference"

    print("KERNEL_OK")
</pallas_src>

<mosaic_0001>
module attributes {stable_mosaic.version = 11 : i64} {
  func.func @_bottleneck_kernel(%arg0: i32, %arg1: i32, %arg2: memref<1x6x80x128xbf16, #tpu.memory_space<vmem>>, %arg3: memref<80x1xf32, #tpu.memory_space<vmem>>, %arg4: memref<128x128xbf16, #tpu.memory_space<vmem>>, %arg5: memref<1x128xf32, #tpu.memory_space<vmem>>, %arg6: memref<1x128xf32, #tpu.memory_space<vmem>>, %arg7: memref<27x128x128xbf16, #tpu.memory_space<vmem>>, %arg8: memref<1x128xf32, #tpu.memory_space<vmem>>, %arg9: memref<1x128xf32, #tpu.memory_space<vmem>>, %arg10: memref<128x128xbf16, #tpu.memory_space<vmem>>, %arg11: memref<1x128xf32, #tpu.memory_space<vmem>>, %arg12: memref<1x128xf32, #tpu.memory_space<vmem>>, %arg13: memref<1x1x60x128xbf16, #tpu.memory_space<vmem>>, %arg14: memref<3x88x128xbf16, #tpu.memory_space<vmem>>) attributes {dimension_semantics = [#tpu.dimension_semantics<parallel>, #tpu.dimension_semantics<arbitrary>], iteration_bounds = array<i64: 2, 4>, scalar_prefetch = 0 : i64, scratch_operands = 1 : i64, tpu.core_type = #tpu.core_type<tc>, window_params = [{transform_indices = @transform_0, window_bounds = array<i64: 1, 6, 80, 128>}, {pipeline_mode = #tpu.pipeline_mode<synchronous>, transform_indices = @transform_1, window_bounds = array<i64: 80, 1>}, {pipeline_mode = #tpu.pipeline_mode<synchronous>, transform_indices = @transform_2, window_bounds = array<i64: 128, 128>}, {pipeline_mode = #tpu.pipeline_mode<synchronous>, transform_indices = @transform_3, window_bounds = array<i64: 1, 128>}, {pipeline_mode = #tpu.pipeline_mode<synchronous>, transform_indices = @transform_4, window_bounds = array<i64: 1, 128>}, {pipeline_mode = #tpu.pipeline_mode<synchronous>, transform_indices = @transform_5, window_bounds = array<i64: 27, 128, 128>}, {pipeline_mode = #tpu.pipeline_mode<synchronous>, transform_indices = @transform_6, window_bounds = array<i64: 1, 128>}, {pipeline_mode = #tpu.pipeline_mode<synchronous>, transform_indices = @transform_7, window_bounds = array<i64: 1, 128>}, {pipeline_mode = #tpu.pipeline_mode<synchronous>, transform_indices = @transform_8, window_bounds = array<i64: 128, 128>}, {pipeline_mode = #tpu.pipeline_mode<synchronous>, transform_indices = @transform_9, window_bounds = array<i64: 1, 128>}, {pipeline_mode = #tpu.pipeline_mode<synchronous>, transform_indices = @transform_10, window_bounds = array<i64: 1, 128>}, {transform_indices = @transform_11, window_bounds = array<i64: 1, 1, 60, 128>}]} {
    %c0 = arith.constant 0 : index
    %c0_0 = arith.constant 0 : index
    %0 = vector.load %arg3[%c0, %c0_0] : memref<80x1xf32, #tpu.memory_space<vmem>>, vector<80x1xf32>
    %c0_i32 = arith.constant 0 : i32
    %1 = arith.cmpi eq, %arg1, %c0_i32 : i32
    %2 = arith.extui %1 : i1 to i32
    %c0_i32_1 = arith.constant 0 : i32
    %3 = arith.cmpi ne, %2, %c0_i32_1 : i32
    scf.if %3 {
      %cst_196 = arith.constant 0.000000e+00 : bf16
      %290 = vector.broadcast %cst_196 : bf16 to vector<8x128xbf16>
      %c0_197 = arith.constant 0 : index
      %c80 = arith.constant 80 : index
      %c0_198 = arith.constant 0 : index
      %291 = vector.load %arg14[%c0_197, %c80, %c0_198] : memref<3x88x128xbf16, #tpu.memory_space<vmem>>, vector<1x8x128xbf16>
      %292 = vector.shape_cast %291 : vector<1x8x128xbf16> to vector<8x128xbf16>
      %293 = vector.shape_cast %290 : vector<8x128xbf16> to vector<1x8x128xbf16>
      tpu.vector_store %arg14[%c0_197, %c80, %c0_198], %293 {strides = array<i32>} : memref<3x88x128xbf16, #tpu.memory_space<vmem>>, vector<1x8x128xbf16>,
      %c1_199 = arith.constant 1 : index
      %c80_200 = arith.constant 80 : index
      %c0_201 = arith.constant 0 : index
      %294 = vector.load %arg14[%c1_199, %c80_200, %c0_201] : memref<3x88x128xbf16, #tpu.memory_space<vmem>>, vector<1x8x128xbf16>
      %295 = vector.shape_cast %294 : vector<1x8x128xbf16> to vector<8x128xbf16>
      %296 = vector.shape_cast %290 : vector<8x128xbf16> to vector<1x8x128xbf16>
      tpu.vector_store %arg14[%c1_199, %c80_200, %c0_201], %296 {strides = array<i32>} : memref<3x88x128xbf16, #tpu.memory_space<vmem>>, vector<1x8x128xbf16>,
      %c2_202 = arith.constant 2 : index
      %c80_203 = arith.constant 80 : index
      %c0_204 = arith.constant 0 : index
      %297 = vector.load %arg14[%c2_202, %c80_203, %c0_204] : memref<3x88x128xbf16, #tpu.memory_space<vmem>>, vector<1x8x128xbf16>
      %298 = vector.shape_cast %297 : vector<1x8x128xbf16> to vector<8x128xbf16>
      %299 = vector.shape_cast %290 : vector<8x128xbf16> to vector<1x8x128xbf16>
      tpu.vector_store %arg14[%c2_202, %c80_203, %c0_204], %299 {strides = array<i32>} : memref<3x88x128xbf16, #tpu.memory_space<vmem>>, vector<1x8x128xbf16>,
      %cst_205 = arith.constant 0.000000e+00 : bf16
      %300 = vector.broadcast %cst_205 : bf16 to vector<80x128xbf16>
      %c0_206 = arith.constant 0 : index
      %c0_207 = arith.constant 0 : index
      %c0_208 = arith.constant 0 : index
      %301 = vector.load %arg14[%c0_206, %c0_207, %c0_208] : memref<3x88x128xbf16, #tpu.memory_space<vmem>>, vector<1x80x128xbf16>
      %302 = vector.shape_cast %301 : vector<1x80x128xbf16> to vector<80x128xbf16>
      %303 = vector.shape_cast %300 : vector<80x128xbf16> to vector<1x80x128xbf16>
      tpu.vector_store %arg14[%c0_206, %c0_207, %c0_208], %303 {strides = array<i32>} : memref<3x88x128xbf16, #tpu.memory_space<vmem>>, vector<1x80x128xbf16>,
      %c0_209 = arith.constant 0 : index
      %c1_210 = arith.constant 1 : index
      %c0_211 = arith.constant 0 : index
      %c0_212 = arith.constant 0 : index
      %304 = vector.load %arg2[%c0_209, %c1_210, %c0_211, %c0_212] : memref<1x6x80x128xbf16, #tpu.memory_space<vmem>>, vector<1x1x80x128xbf16>
      %305 = vector.shape_cast %304 : vector<1x1x80x128xbf16> to vector<80x128xbf16>
      %c0_213 = arith.constant 0 : index
      %c0_214 = arith.constant 0 : index
      %306 = vector.load %arg4[%c0_213, %c0_214] : memref<128x128xbf16, #tpu.memory_space<vmem>>, vector<128x128xbf16>
      %cst_215 = arith.constant dense<0.000000e+00> : vector<80x128xf32>
      %307 = tpu.matmul %305, %306, %cst_215 {dimension_numbers = #tpu.dot_dimension_numbers<[1], [0], [0], [1], [0, 0, 1, 1], [], []>} : vector<80x128xbf16>, vector<128x128xbf16>, vector<80x128xf32> -> vector<80x128xf32>
      %c0_216 = arith.constant 0 : index
      %c0_217 = arith.constant 0 : index
      %308 = vector.load %arg5[%c0_216, %c0_217] : memref<1x128xf32, #tpu.memory_space<vmem>>, vector<1x128xf32>
      %309 = vector.broadcast %308 : vector<1x128xf32> to vector<80x128xf32>
      %310 = arith.mulf %307, %309 : vector<80x128xf32>
      %c0_218 = arith.constant 0 : index
      %c0_219 = arith.constant 0 : index
      %311 = vector.load %arg6[%c0_218, %c0_219] : memref<1x128xf32, #tpu.memory_space<vmem>>, vector<1x128xf32>
      %312 = vector.broadcast %311 : vector<1x128xf32> to vector<80x128xf32>
      %313 = arith.addf %310, %312 : vector<80x128xf32>
      %cst_220 = arith.constant 0.000000e+00 : f32
      %314 = vector.broadcast %cst_220 : f32 to vector<80x128xf32>
      %315 = arith.maximumf %313, %314 : vector<80x128xf32>
      %cst_221 = arith.constant 1.000000e+00 : f32
      %316 = vector.broadcast %cst_221 : f32 to vector<80x1xf32>
      %317 = arith.mulf %0, %316 : vector<80x1xf32>
      %318 = vector.broadcast %317 : vector<80x1xf32> to vector<80x128xf32>
      %319 = arith.mulf %315, %318 : vector<80x128xf32>
      %320 = arith.truncf %319 : vector<80x128xf32> to vector<80x128xbf16>
      %c1_222 = arith.constant 1 : index
      %c0_223 = arith.constant 0 : index
      %c0_224 = arith.constant 0 : index
      %321 = vector.load %arg14[%c1_222, %c0_223, %c0_224] : memref<3x88x128xbf16, #tpu.memory_space<vmem>>, vector<1x80x128xbf16>
      %322 = vector.shape_cast %321 : vector<1x80x128xbf16> to vector<80x128xbf16>
      %323 = vector.shape_cast %320 : vector<80x128xbf16> to vector<1x80x128xbf16>
      tpu.vector_store %arg14[%c1_222, %c0_223, %c0_224], %323 {strides = array<i32>} : memref<3x88x128xbf16, #tpu.memory_space<vmem>>, vector<1x80x128xbf16>,
    } else {
    }
    %c2_i32 = arith.constant 2 : i32
    %4 = arith.addi %arg1, %c2_i32 : i32
    %c3_i32 = arith.constant 3 : i32
    %c0_i32_2 = arith.constant 0 : i32
    %5 = arith.cmpi eq, %c3_i32, %c0_i32_2 : i32
    %c1_i32 = arith.constant 1 : i32
    %6 = arith.select %5, %c1_i32, %c3_i32 : i32
    %7 = arith.remsi %4, %6 : i32
    %c0_i32_3 = arith.constant 0 : i32
    %8 = arith.cmpi ne, %7, %c0_i32_3 : i32
    %c0_i32_4 = arith.constant 0 : i32
    %9 = arith.cmpi slt, %7, %c0_i32_4 : i32
    %c0_i32_5 = arith.constant 0 : i32
    %10 = arith.cmpi slt, %6, %c0_i32_5 : i32
    %11 = arith.xori %9, %10 : i1
    %12 = arith.andi %11, %8 : i1
    %13 = arith.addi %7, %6 : i32
    %14 = arith.select %12, %13, %7 : i32
    %c4_i32 = arith.constant 4 : i32
    %15 = arith.cmpi sle, %4, %c4_i32 : i32
    %16 = arith.extui %15 : i1 to i32
    %17 = arith.sitofp %16 : i32 to f32
    %c0_6 = arith.constant 0 : index
    %18 = arith.index_cast %4 : i32 to index
    %c0_7 = arith.constant 0 : index
    %c0_8 = arith.constant 0 : index
    %19 = vector.load %arg2[%c0_6, %18, %c0_7, %c0_8] : memref<1x6x80x128xbf16, #tpu.memory_space<vmem>>, vector<1x1x80x128xbf16>
    %20 = vector.shape_cast %19 : vector<1x1x80x128xbf16> to vector<80x128xbf16>
    %c0_9 = arith.constant 0 : index
    %c0_10 = arith.constant 0 : index
    %21 = vector.load %arg4[%c0_9, %c0_10] : memref<128x128xbf16, #tpu.memory_space<vmem>>, vector<128x128xbf16>
    %cst = arith.constant dense<0.000000e+00> : vector<80x128xf32>
    %22 = tpu.matmul %20, %21, %cst {dimension_numbers = #tpu.dot_dimension_numbers<[1], [0], [0], [1], [0, 0, 1, 1], [], []>} : vector<80x128xbf16>, vector<128x128xbf16>, vector<80x128xf32> -> vector<80x128xf32>
    %c0_11 = arith.constant 0 : index
    %c0_12 = arith.constant 0 : index
    %23 = vector.load %arg5[%c0_11, %c0_12] : memref<1x128xf32, #tpu.memory_space<vmem>>, vector<1x128xf32>
    %24 = vector.broadcast %23 : vector<1x128xf32> to vector<80x128xf32>
    %25 = arith.mulf %22, %24 : vector<80x128xf32>
    %c0_13 = arith.constant 0 : index
    %c0_14 = arith.constant 0 : index
    %26 = vector.load %arg6[%c0_13, %c0_14] : memref<1x128xf32, #tpu.memory_space<vmem>>, vector<1x128xf32>
    %27 = vector.broadcast %26 : vector<1x128xf32> to vector<80x128xf32>
    %28 = arith.addf %25, %27 : vector<80x128xf32>
    %cst_15 = arith.constant 0.000000e+00 : f32
    %29 = vector.broadcast %cst_15 : f32 to vector<80x128xf32>
    %30 = arith.maximumf %28, %29 : vector<80x128xf32>
    %31 = vector.broadcast %17 : f32 to vector<80x1xf32>
    %32 = arith.mulf %0, %31 : vector<80x1xf32>
    %33 = vector.broadcast %32 : vector<80x1xf32> to vector<80x128xf32>
    %34 = arith.mulf %30, %33 : vector<80x128xf32>
    %35 = arith.truncf %34 : vector<80x128xf32> to vector<80x128xbf16>
    %36 = arith.index_cast %14 : i32 to index
    %c0_16 = arith.constant 0 : index
    %c0_17 = arith.constant 0 : index
    %37 = vector.load %arg14[%36, %c0_16, %c0_17] : memref<3x88x128xbf16, #tpu.memory_space<vmem>>, vector<1x80x128xbf16>
    %38 = vector.shape_cast %37 : vector<1x80x128xbf16> to vector<80x128xbf16>
    %39 = vector.shape_cast %35 : vector<80x128xbf16> to vector<1x80x128xbf16>
    tpu.vector_store %arg14[%36, %c0_16, %c0_17], %39 {strides = array<i32>} : memref<3x88x128xbf16, #tpu.memory_space<vmem>>, vector<1x80x128xbf16>,
    %c0_i32_18 = arith.constant 0 : i32
    %40 = arith.addi %arg1, %c0_i32_18 : i32
    %c3_i32_19 = arith.constant 3 : i32
    %c0_i32_20 = arith.constant 0 : i32
    %41 = arith.cmpi eq, %c3_i32_19, %c0_i32_20 : i32
    %c1_i32_21 = arith.constant 1 : i32
    %42 = arith.select %41, %c1_i32_21, %c3_i32_19 : i32
    %43 = arith.remsi %40, %42 : i32
    %c0_i32_22 = arith.constant 0 : i32
    %44 = arith.cmpi ne, %43, %c0_i32_22 : i32
    %c0_i32_23 = arith.constant 0 : i32
    %45 = arith.cmpi slt, %43, %c0_i32_23 : i32
    %c0_i32_24 = arith.constant 0 : i32
    %46 = arith.cmpi slt, %42, %c0_i32_24 : i32
    %47 = arith.xori %45, %46 : i1
    %48 = arith.andi %47, %44 : i1
    %49 = arith.addi %43, %42 : i32
    %50 = arith.select %48, %49, %43 : i32
    %51 = arith.index_cast %50 : i32 to index
    %c0_25 = arith.constant 0 : index
    %c0_26 = arith.constant 0 : index
    %52 = vector.load %arg14[%51, %c0_25, %c0_26] : memref<3x88x128xbf16, #tpu.memory_space<vmem>>, vector<1x60x128xbf16>
    %53 = vector.shape_cast %52 : vector<1x60x128xbf16> to vector<60x128xbf16>
    %c0_27 = arith.constant 0 : index
    %c0_28 = arith.constant 0 : index
    %c0_29 = arith.constant 0 : index
    %54 = vector.load %arg7[%c0_27, %c0_28, %c0_29] : memref<27x128x128xbf16, #tpu.memory_space<vmem>>, vector<1x128x128xbf16>
    %55 = vector.shape_cast %54 : vector<1x128x128xbf16> to vector<128x128xbf16>
    %cst_30 = arith.constant dense<0.000000e+00> : vector<60x128xf32>
    %56 = tpu.matmul %53, %55, %cst_30 {dimension_numbers = #tpu.dot_dimension_numbers<[1], [0], [0], [1], [0, 0, 1, 1], [], []>} : vector<60x128xbf16>, vector<128x128xbf16>, vector<60x128xf32> -> vector<60x128xf32>
    %57 = arith.index_cast %50 : i32 to index
    %c1 = arith.constant 1 : index
    %c0_31 = arith.constant 0 : index
    %58 = vector.load %arg14[%57, %c1, %c0_31] : memref<3x88x128xbf16, #tpu.memory_space<vmem>>, vector<1x60x128xbf16>
    %59 = vector.shape_cast %58 : vector<1x60x128xbf16> to vector<60x128xbf16>
    %c1_32 = arith.constant 1 : index
    %c0_33 = arith.constant 0 : index
    %c0_34 = arith.constant 0 : index
    %60 = vector.load %arg7[%c1_32, %c0_33, %c0_34] : memref<27x128x128xbf16, #tpu.memory_space<vmem>>, vector<1x128x128xbf16>
    %61 = vector.shape_cast %60 : vector<1x128x128xbf16> to vector<128x128xbf16>
    %cst_35 = arith.constant dense<0.000000e+00> : vector<60x128xf32>
    %62 = tpu.matmul %59, %61, %cst_35 {dimension_numbers = #tpu.dot_dimension_numbers<[1], [0], [0], [1], [0, 0, 1, 1], [], []>} : vector<60x128xbf16>, vector<128x128xbf16>, vector<60x128xf32> -> vector<60x128xf32>
    %63 = arith.addf %56, %62 : vector<60x128xf32>
    %64 = arith.index_cast %50 : i32 to index
    %c2 = arith.constant 2 : index
    %c0_36 = arith.constant 0 : index
    %65 = vector.load %arg14[%64, %c2, %c0_36] : memref<3x88x128xbf16, #tpu.memory_space<vmem>>, vector<1x60x128xbf16>
    %66 = vector.shape_cast %65 : vector<1x60x128xbf16> to vector<60x128xbf16>
    %c2_37 = arith.constant 2 : index
    %c0_38 = arith.constant 0 : index
    %c0_39 = arith.constant 0 : index
    %67 = vector.load %arg7[%c2_37, %c0_38, %c0_39] : memref<27x128x128xbf16, #tpu.memory_space<vmem>>, vector<1x128x128xbf16>
    %68 = vector.shape_cast %67 : vector<1x128x128xbf16> to vector<128x128xbf16>
    %cst_40 = arith.constant dense<0.000000e+00> : vector<60x128xf32>
    %69 = tpu.matmul %66, %68, %cst_40 {dimension_numbers = #tpu.dot_dimension_numbers<[1], [0], [0], [1], [0, 0, 1, 1], [], []>} : vector<60x128xbf16>, vector<128x128xbf16>, vector<60x128xf32> -> vector<60x128xf32>
    %70 = arith.addf %63, %69 : vector<60x128xf32>
    %71 = arith.index_cast %50 : i32 to index
    %c10 = arith.constant 10 : index
    %c0_41 = arith.constant 0 : index
    %72 = vector.load %arg14[%71, %c10, %c0_41] : memref<3x88x128xbf16, #tpu.memory_space<vmem>>, vector<1x60x128xbf16>
    %73 = vector.shape_cast %72 : vector<1x60x128xbf16> to vector<60x128xbf16>
    %c3 = arith.constant 3 : index
    %c0_42 = arith.constant 0 : index
    %c0_43 = arith.constant 0 : index
    %74 = vector.load %arg7[%c3, %c0_42, %c0_43] : memref<27x128x128xbf16, #tpu.memory_space<vmem>>, vector<1x128x128xbf16>
    %75 = vector.shape_cast %74 : vector<1x128x128xbf16> to vector<128x128xbf16>
    %cst_44 = arith.constant dense<0.000000e+00> : vector<60x128xf32>
    %76 = tpu.matmul %73, %75, %cst_44 {dimension_numbers = #tpu.dot_dimension_numbers<[1], [0], [0], [1], [0, 0, 1, 1], [], []>} : vector<60x128xbf16>, vector<128x128xbf16>, vector<60x128xf32> -> vector<60x128xf32>
    %77 = arith.addf %70, %76 : vector<60x128xf32>
    %78 = arith.index_cast %50 : i32 to index
    %c11 = arith.constant 11 : index
    %c0_45 = arith.constant 0 : index
    %79 = vector.load %arg14[%78, %c11, %c0_45] : memref<3x88x128xbf16, #tpu.memory_space<vmem>>, vector<1x60x128xbf16>
    %80 = vector.shape_cast %79 : vector<1x60x128xbf16> to vector<60x128xbf16>
    %c4 = arith.constant 4 : index
    %c0_46 = arith.constant 0 : index
    %c0_47 = arith.constant 0 : index
    %81 = vector.load %arg7[%c4, %c0_46, %c0_47] : memref<27x128x128xbf16, #tpu.memory_space<vmem>>, vector<1x128x128xbf16>
    %82 = vector.shape_cast %81 : vector<1x128x128xbf16> to vector<128x128xbf16>
    %cst_48 = arith.constant dense<0.000000e+00> : vector<60x128xf32>
    %83 = tpu.matmul %80, %82, %cst_48 {dimension_numbers = #tpu.dot_dimension_numbers<[1], [0], [0], [1], [0, 0, 1, 1], [], []>} : vector<60x128xbf16>, vector<128x128xbf16>, vector<60x128xf32> -> vector<60x128xf32>
    %84 = arith.addf %77, %83 : vector<60x128xf32>
    %85 = arith.index_cast %50 : i32 to index
    %c12 = arith.constant 12 : index
    %c0_49 = arith.constant 0 : index
    %86 = vector.load %arg14[%85, %c12, %c0_49] : memref<3x88x128xbf16, #tpu.memory_space<vmem>>, vector<1x60x128xbf16>
    %87 = vector.shape_cast %86 : vector<1x60x128xbf16> to vector<60x128xbf16>
    %c5 = arith.constant 5 : index
    %c0_50 = arith.constant 0 : index
    %c0_51 = arith.constant 0 : index
    %88 = vector.load %arg7[%c5, %c0_50, %c0_51] : memref<27x128x128xbf16, #tpu.memory_space<vmem>>, vector<1x128x128xbf16>
    %89 = vector.shape_cast %88 : vector<1x128x128xbf16> to vector<128x128xbf16>
    %cst_52 = arith.constant dense<0.000000e+00> : vector<60x128xf32>
    %90 = tpu.matmul %87, %89, %cst_52 {dimension_numbers = #tpu.dot_dimension_numbers<[1], [0], [0], [1], [0, 0, 1, 1], [], []>} : vector<60x128xbf16>, vector<128x128xbf16>, vector<60x128xf32> -> vector<60x128xf32>
    %91 = arith.addf %84, %90 : vector<60x128xf32>
    %92 = arith.index_cast %50 : i32 to index
    %c20 = arith.constant 20 : index
    %c0_53 = arith.constant 0 : index
    %93 = vector.load %arg14[%92, %c20, %c0_53] : memref<3x88x128xbf16, #tpu.memory_space<vmem>>, vector<1x60x128xbf16>
    %94 = vector.shape_cast %93 : vector<1x60x128xbf16> to vector<60x128xbf16>
    %c6 = arith.constant 6 : index
    %c0_54 = arith.constant 0 : index
    %c0_55 = arith.constant 0 : index
    %95 = vector.load %arg7[%c6, %c0_54, %c0_55] : memref<27x128x128xbf16, #tpu.memory_space<vmem>>, vector<1x128x128xbf16>
    %96 = vector.shape_cast %95 : vector<1x128x128xbf16> to vector<128x128xbf16>
    %cst_56 = arith.constant dense<0.000000e+00> : vector<60x128xf32>
    %97 = tpu.matmul %94, %96, %cst_56 {dimension_numbers = #tpu.dot_dimension_numbers<[1], [0], [0], [1], [0, 0, 1, 1], [], []>} : vector<60x128xbf16>, vector<128x128xbf16>, vector<60x128xf32> -> vector<60x128xf32>
    %98 = arith.addf %91, %97 : vector<60x128xf32>
    %99 = arith.index_cast %50 : i32 to index
    %c21 = arith.constant 21 : index
    %c0_57 = arith.constant 0 : index
    %100 = vector.load %arg14[%99, %c21, %c0_57] : memref<3x88x128xbf16, #tpu.memory_space<vmem>>, vector<1x60x128xbf16>
    %101 = vector.shape_cast %100 : vector<1x60x128xbf16> to vector<60x128xbf16>
    %c7 = arith.constant 7 : index
    %c0_58 = arith.constant 0 : index
    %c0_59 = arith.constant 0 : index
    %102 = vector.load %arg7[%c7, %c0_58, %c0_59] : memref<27x128x128xbf16, #tpu.memory_space<vmem>>, vector<1x128x128xbf16>
    %103 = vector.shape_cast %102 : vector<1x128x128xbf16> to vector<128x128xbf16>
    %cst_60 = arith.constant dense<0.000000e+00> : vector<60x128xf32>
    %104 = tpu.matmul %101, %103, %cst_60 {dimension_numbers = #tpu.dot_dimension_numbers<[1], [0], [0], [1], [0, 0, 1, 1], [], []>} : vector<60x128xbf16>, vector<128x128xbf16>, vector<60x128xf32> -> vector<60x128xf32>
    %105 = arith.addf %98, %104 : vector<60x128xf32>
    %106 = arith.index_cast %50 : i32 to index
    %c22 = arith.constant 22 : index
    %c0_61 = arith.constant 0 : index
    %107 = vector.load %arg14[%106, %c22, %c0_61] : memref<3x88x128xbf16, #tpu.memory_space<vmem>>, vector<1x60x128xbf16>
    %108 = vector.shape_cast %107 : vector<1x60x128xbf16> to vector<60x128xbf16>
    %c8 = arith.constant 8 : index
    %c0_62 = arith.constant 0 : index
    %c0_63 = arith.constant 0 : index
    %109 = vector.load %arg7[%c8, %c0_62, %c0_63] : memref<27x128x128xbf16, #tpu.memory_space<vmem>>, vector<1x128x128xbf16>
    %110 = vector.shape_cast %109 : vector<1x128x128xbf16> to vector<128x128xbf16>
    %cst_64 = arith.constant dense<0.000000e+00> : vector<60x128xf32>
    %111 = tpu.matmul %108, %110, %cst_64 {dimension_numbers = #tpu.dot_dimension_numbers<[1], [0], [0], [1], [0, 0, 1, 1], [], []>} : vector<60x128xbf16>, vector<128x128xbf16>, vector<60x128xf32> -> vector<60x128xf32>
    %112 = arith.addf %105, %111 : vector<60x128xf32>
    %c1_i32_65 = arith.constant 1 : i32
    %113 = arith.addi %arg1, %c1_i32_65 : i32
    %c3_i32_66 = arith.constant 3 : i32
    %c0_i32_67 = arith.constant 0 : i32
    %114 = arith.cmpi eq, %c3_i32_66, %c0_i32_67 : i32
    %c1_i32_68 = arith.constant 1 : i32
    %115 = arith.select %114, %c1_i32_68, %c3_i32_66 : i32
    %116 = arith.remsi %113, %115 : i32
    %c0_i32_69 = arith.constant 0 : i32
    %117 = arith.cmpi ne, %116, %c0_i32_69 : i32
    %c0_i32_70 = arith.constant 0 : i32
    %118 = arith.cmpi slt, %116, %c0_i32_70 : i32
    %c0_i32_71 = arith.constant 0 : i32
    %119 = arith.cmpi slt, %115, %c0_i32_71 : i32
    %120 = arith.xori %118, %119 : i1
    %121 = arith.andi %120, %117 : i1
    %122 = arith.addi %116, %115 : i32
    %123 = arith.select %121, %122, %116 : i32
    %124 = arith.index_cast %123 : i32 to index
    %c0_72 = arith.constant 0 : index
    %c0_73 = arith.constant 0 : index
    %125 = vector.load %arg14[%124, %c0_72, %c0_73] : memref<3x88x128xbf16, #tpu.memory_space<vmem>>, vector<1x60x128xbf16>
    %126 = vector.shape_cast %125 : vector<1x60x128xbf16> to vector<60x128xbf16>
    %c9 = arith.constant 9 : index
    %c0_74 = arith.constant 0 : index
    %c0_75 = arith.constant 0 : index
    %127 = vector.load %arg7[%c9, %c0_74, %c0_75] : memref<27x128x128xbf16, #tpu.memory_space<vmem>>, vector<1x128x128xbf16>
    %128 = vector.shape_cast %127 : vector<1x128x128xbf16> to vector<128x128xbf16>
    %cst_76 = arith.constant dense<0.000000e+00> : vector<60x128xf32>
    %129 = tpu.matmul %126, %128, %cst_76 {dimension_numbers = #tpu.dot_dimension_numbers<[1], [0], [0], [1], [0, 0, 1, 1], [], []>} : vector<60x128xbf16>, vector<128x128xbf16>, vector<60x128xf32> -> vector<60x128xf32>
    %130 = arith.addf %112, %129 : vector<60x128xf32>
    %131 = arith.index_cast %123 : i32 to index
    %c1_77 = arith.constant 1 : index
    %c0_78 = arith.constant 0 : index
    %132 = vector.load %arg14[%131, %c1_77, %c0_78] : memref<3x88x128xbf16, #tpu.memory_space<vmem>>, vector<1x60x128xbf16>
    %133 = vector.shape_cast %132 : vector<1x60x128xbf16> to vector<60x128xbf16>
    %c10_79 = arith.constant 10 : index
    %c0_80 = arith.constant 0 : index
    %c0_81 = arith.constant 0 : index
    %134 = vector.load %arg7[%c10_79, %c0_80, %c0_81] : memref<27x128x128xbf16, #tpu.memory_space<vmem>>, vector<1x128x128xbf16>
    %135 = vector.shape_cast %134 : vector<1x128x128xbf16> to vector<128x128xbf16>
    %cst_82 = arith.constant dense<0.000000e+00> : vector<60x128xf32>
    %136 = tpu.matmul %133, %135, %cst_82 {dimension_numbers = #tpu.dot_dimension_numbers<[1], [0], [0], [1], [0, 0, 1, 1], [], []>} : vector<60x128xbf16>, vector<128x128xbf16>, vector<60x128xf32> -> vector<60x128xf32>
    %137 = arith.addf %130, %136 : vector<60x128xf32>
    %138 = arith.index_cast %123 : i32 to index
    %c2_83 = arith.constant 2 : index
    %c0_84 = arith.constant 0 : index
    %139 = vector.load %arg14[%138, %c2_83, %c0_84] : memref<3x88x128xbf16, #tpu.memory_space<vmem>>, vector<1x60x128xbf16>
    %140 = vector.shape_cast %139 : vector<1x60x128xbf16> to vector<60x128xbf16>
    %c11_85 = arith.constant 11 : index
    %c0_86 = arith.constant 0 : index
    %c0_87 = arith.constant 0 : index
    %141 = vector.load %arg7[%c11_85, %c0_86, %c0_87] : memref<27x128x128xbf16, #tpu.memory_space<vmem>>, vector<1x128x128xbf16>
    %142 = vector.shape_cast %141 : vector<1x128x128xbf16> to vector<128x128xbf16>
    %cst_88 = arith.constant dense<0.000000e+00> : vector<60x128xf32>
    %143 = tpu.matmul %140, %142, %cst_88 {dimension_numbers = #tpu.dot_dimension_numbers<[1], [0], [0], [1], [0, 0, 1, 1], [], []>} : vector<60x128xbf16>, vector<128x128xbf16>, vector<60x128xf32> -> vector<60x128xf32>
    %144 = arith.addf %137, %143 : vector<60x128xf32>
    %145 = arith.index_cast %123 : i32 to index
    %c10_89 = arith.constant 10 : index
    %c0_90 = arith.constant 0 : index
    %146 = vector.load %arg14[%145, %c10_89, %c0_90] : memref<3x88x128xbf16, #tpu.memory_space<vmem>>, vector<1x60x128xbf16>
    %147 = vector.shape_cast %146 : vector<1x60x128xbf16> to vector<60x128xbf16>
    %c12_91 = arith.constant 12 : index
    %c0_92 = arith.constant 0 : index
    %c0_93 = arith.constant 0 : index
    %148 = vector.load %arg7[%c12_91, %c0_92, %c0_93] : memref<27x128x128xbf16, #tpu.memory_space<vmem>>, vector<1x128x128xbf16>
    %149 = vector.shape_cast %148 : vector<1x128x128xbf16> to vector<128x128xbf16>
    %cst_94 = arith.constant dense<0.000000e+00> : vector<60x128xf32>
    %150 = tpu.matmul %147, %149, %cst_94 {dimension_numbers = #tpu.dot_dimension_numbers<[1], [0], [0], [1], [0, 0, 1, 1], [], []>} : vector<60x128xbf16>, vector<128x128xbf16>, vector<60x128xf32> -> vector<60x128xf32>
    %151 = arith.addf %144, %150 : vector<60x128xf32>
    %152 = arith.index_cast %123 : i32 to index
    %c11_95 = arith.constant 11 : index
    %c0_96 = arith.constant 0 : index
    %153 = vector.load %arg14[%152, %c11_95, %c0_96] : memref<3x88x128xbf16, #tpu.memory_space<vmem>>, vector<1x60x128xbf16>
    %154 = vector.shape_cast %153 : vector<1x60x128xbf16> to vector<60x128xbf16>
    %c13 = arith.constant 13 : index
    %c0_97 = arith.constant 0 : index
    %c0_98 = arith.constant 0 : index
    %155 = vector.load %arg7[%c13, %c0_97, %c0_98] : memref<27x128x128xbf16, #tpu.memory_space<vmem>>, vector<1x128x128xbf16>
    %156 = vector.shape_cast %155 : vector<1x128x128xbf16> to vector<128x128xbf16>
    %cst_99 = arith.constant dense<0.000000e+00> : vector<60x128xf32>
    %157 = tpu.matmul %154, %156, %cst_99 {dimension_numbers = #tpu.dot_dimension_numbers<[1], [0], [0], [1], [0, 0, 1, 1], [], []>} : vector<60x128xbf16>, vector<128x128xbf16>, vector<60x128xf32> -> vector<60x128xf32>
    %158 = arith.addf %151, %157 : vector<60x128xf32>
    %159 = arith.index_cast %123 : i32 to index
    %c12_100 = arith.constant 12 : index
    %c0_101 = arith.constant 0 : index
    %160 = vector.load %arg14[%159, %c12_100, %c0_101] : memref<3x88x128xbf16, #tpu.memory_space<vmem>>, vector<1x60x128xbf16>
    %161 = vector.shape_cast %160 : vector<1x60x128xbf16> to vector<60x128xbf16>
    %c14 = arith.constant 14 : index
    %c0_102 = arith.constant 0 : index
    %c0_103 = arith.constant 0 : index
    %162 = vector.load %arg7[%c14, %c0_102, %c0_103] : memref<27x128x128xbf16, #tpu.memory_space<vmem>>, vector<1x128x128xbf16>
    %163 = vector.shape_cast %162 : vector<1x128x128xbf16> to vector<128x128xbf16>
    %cst_104 = arith.constant dense<0.000000e+00> : vector<60x128xf32>
    %164 = tpu.matmul %161, %163, %cst_104 {dimension_numbers = #tpu.dot_dimension_numbers<[1], [0], [0], [1], [0, 0, 1, 1], [], []>} : vector<60x128xbf16>, vector<128x128xbf16>, vector<60x128xf32> -> vector<60x128xf32>
    %165 = arith.addf %158, %164 : vector<60x128xf32>
    %166 = arith.index_cast %123 : i32 to index
    %c20_105 = arith.constant 20 : index
    %c0_106 = arith.constant 0 : index
    %167 = vector.load %arg14[%166, %c20_105, %c0_106] : memref<3x88x128xbf16, #tpu.memory_space<vmem>>, vector<1x60x128xbf16>
    %168 = vector.shape_cast %167 : vector<1x60x128xbf16> to vector<60x128xbf16>
    %c15 = arith.constant 15 : index
    %c0_107 = arith.constant 0 : index
    %c0_108 = arith.constant 0 : index
    %169 = vector.load %arg7[%c15, %c0_107, %c0_108] : memref<27x128x128xbf16, #tpu.memory_space<vmem>>, vector<1x128x128xbf16>
    %170 = vector.shape_cast %169 : vector<1x128x128xbf16> to vector<128x128xbf16>
    %cst_109 = arith.constant dense<0.000000e+00> : vector<60x128xf32>
    %171 = tpu.matmul %168, %170, %cst_109 {dimension_numbers = #tpu.dot_dimension_numbers<[1], [0], [0], [1], [0, 0, 1, 1], [], []>} : vector<60x128xbf16>, vector<128x128xbf16>, vector<60x128xf32> -> vector<60x128xf32>
    %172 = arith.addf %165, %171 : vector<60x128xf32>
    %173 = arith.index_cast %123 : i32 to index
    %c21_110 = arith.constant 21 : index
    %c0_111 = arith.constant 0 : index
    %174 = vector.load %arg14[%173, %c21_110, %c0_111] : memref<3x88x128xbf16, #tpu.memory_space<vmem>>, vector<1x60x128xbf16>
    %175 = vector.shape_cast %174 : vector<1x60x128xbf16> to vector<60x128xbf16>
    %c16 = arith.constant 16 : index
    %c0_112 = arith.constant 0 : index
    %c0_113 = arith.constant 0 : index
    %176 = vector.load %arg7[%c16, %c0_112, %c0_113] : memref<27x128x128xbf16, #tpu.memory_space<vmem>>, vector<1x128x128xbf16>
    %177 = vector.shape_cast %176 : vector<1x128x128xbf16> to vector<128x128xbf16>
    %cst_114 = arith.constant dense<0.000000e+00> : vector<60x128xf32>
    %178 = tpu.matmul %175, %177, %cst_114 {dimension_numbers = #tpu.dot_dimension_numbers<[1], [0], [0], [1], [0, 0, 1, 1], [], []>} : vector<60x128xbf16>, vector<128x128xbf16>, vector<60x128xf32> -> vector<60x128xf32>
    %179 = arith.addf %172, %178 : vector<60x128xf32>
    %180 = arith.index_cast %123 : i32 to index
    %c22_115 = arith.constant 22 : index
    %c0_116 = arith.constant 0 : index
    %181 = vector.load %arg14[%180, %c22_115, %c0_116] : memref<3x88x128xbf16, #tpu.memory_space<vmem>>, vector<1x60x128xbf16>
    %182 = vector.shape_cast %181 : vector<1x60x128xbf16> to vector<60x128xbf16>
    %c17 = arith.constant 17 : index
    %c0_117 = arith.constant 0 : index
    %c0_118 = arith.constant 0 : index
    %183 = vector.load %arg7[%c17, %c0_117, %c0_118] : memref<27x128x128xbf16, #tpu.memory_space<vmem>>, vector<1x128x128xbf16>
    %184 = vector.shape_cast %183 : vector<1x128x128xbf16> to vector<128x128xbf16>
    %cst_119 = arith.constant dense<0.000000e+00> : vector<60x128xf32>
    %185 = tpu.matmul %182, %184, %cst_119 {dimension_numbers = #tpu.dot_dimension_numbers<[1], [0], [0], [1], [0, 0, 1, 1], [], []>} : vector<60x128xbf16>, vector<128x128xbf16>, vector<60x128xf32> -> vector<60x128xf32>
    %186 = arith.addf %179, %185 : vector<60x128xf32>
    %c2_i32_120 = arith.constant 2 : i32
    %187 = arith.addi %arg1, %c2_i32_120 : i32
    %c3_i32_121 = arith.constant 3 : i32
    %c0_i32_122 = arith.constant 0 : i32
    %188 = arith.cmpi eq, %c3_i32_121, %c0_i32_122 : i32
    %c1_i32_123 = arith.constant 1 : i32
    %189 = arith.select %188, %c1_i32_123, %c3_i32_121 : i32
    %190 = arith.remsi %187, %189 : i32
    %c0_i32_124 = arith.constant 0 : i32
    %191 = arith.cmpi ne, %190, %c0_i32_124 : i32
    %c0_i32_125 = arith.constant 0 : i32
    %192 = arith.cmpi slt, %190, %c0_i32_125 : i32
    %c0_i32_126 = arith.constant 0 : i32
    %193 = arith.cmpi slt, %189, %c0_i32_126 : i32
    %194 = arith.xori %192, %193 : i1
    %195 = arith.andi %194, %191 : i1
    %196 = arith.addi %190, %189 : i32
    %197 = arith.select %195, %196, %190 : i32
    %198 = arith.index_cast %197 : i32 to index
    %c0_127 = arith.constant 0 : index
    %c0_128 = arith.constant 0 : index
    %199 = vector.load %arg14[%198, %c0_127, %c0_128] : memref<3x88x128xbf16, #tpu.memory_space<vmem>>, vector<1x60x128xbf16>
    %200 = vector.shape_cast %199 : vector<1x60x128xbf16> to vector<60x128xbf16>
    %c18 = arith.constant 18 : index
    %c0_129 = arith.constant 0 : index
    %c0_130 = arith.constant 0 : index
    %201 = vector.load %arg7[%c18, %c0_129, %c0_130] : memref<27x128x128xbf16, #tpu.memory_space<vmem>>, vector<1x128x128xbf16>
    %202 = vector.shape_cast %201 : vector<1x128x128xbf16> to vector<128x128xbf16>
    %cst_131 = arith.constant dense<0.000000e+00> : vector<60x128xf32>
    %203 = tpu.matmul %200, %202, %cst_131 {dimension_numbers = #tpu.dot_dimension_numbers<[1], [0], [0], [1], [0, 0, 1, 1], [], []>} : vector<60x128xbf16>, vector<128x128xbf16>, vector<60x128xf32> -> vector<60x128xf32>
    %204 = arith.addf %186, %203 : vector<60x128xf32>
    %205 = arith.index_cast %197 : i32 to index
    %c1_132 = arith.constant 1 : index
    %c0_133 = arith.constant 0 : index
    %206 = vector.load %arg14[%205, %c1_132, %c0_133] : memref<3x88x128xbf16, #tpu.memory_space<vmem>>, vector<1x60x128xbf16>
    %207 = vector.shape_cast %206 : vector<1x60x128xbf16> to vector<60x128xbf16>
    %c19 = arith.constant 19 : index
    %c0_134 = arith.constant 0 : index
    %c0_135 = arith.constant 0 : index
    %208 = vector.load %arg7[%c19, %c0_134, %c0_135] : memref<27x128x128xbf16, #tpu.memory_space<vmem>>, vector<1x128x128xbf16>
    %209 = vector.shape_cast %208 : vector<1x128x128xbf16> to vector<128x128xbf16>
    %cst_136 = arith.constant dense<0.000000e+00> : vector<60x128xf32>
    %210 = tpu.matmul %207, %209, %cst_136 {dimension_numbers = #tpu.dot_dimension_numbers<[1], [0], [0], [1], [0, 0, 1, 1], [], []>} : vector<60x128xbf16>, vector<128x128xbf16>, vector<60x128xf32> -> vector<60x128xf32>
    %211 = arith.addf %204, %210 : vector<60x128xf32>
    %212 = arith.index_cast %197 : i32 to index
    %c2_137 = arith.constant 2 : index
    %c0_138 = arith.constant 0 : index
    %213 = vector.load %arg14[%212, %c2_137, %c0_138] : memref<3x88x128xbf16, #tpu.memory_space<vmem>>, vector<1x60x128xbf16>
    %214 = vector.shape_cast %213 : vector<1x60x128xbf16> to vector<60x128xbf16>
    %c20_139 = arith.constant 20 : index
    %c0_140 = arith.constant 0 : index
    %c0_141 = arith.constant 0 : index
    %215 = vector.load %arg7[%c20_139, %c0_140, %c0_141] : memref<27x128x128xbf16, #tpu.memory_space<vmem>>, vector<1x128x128xbf16>
    %216 = vector.shape_cast %215 : vector<1x128x128xbf16> to vector<128x128xbf16>
    %cst_142 = arith.constant dense<0.000000e+00> : vector<60x128xf32>
    %217 = tpu.matmul %214, %216, %cst_142 {dimension_numbers = #tpu.dot_dimension_numbers<[1], [0], [0], [1], [0, 0, 1, 1], [], []>} : vector<60x128xbf16>, vector<128x128xbf16>, vector<60x128xf32> -> vector<60x128xf32>
    %218 = arith.addf %211, %217 : vector<60x128xf32>
    %219 = arith.index_cast %197 : i32 to index
    %c10_143 = arith.constant 10 : index
    %c0_144 = arith.constant 0 : index
    %220 = vector.load %arg14[%219, %c10_143, %c0_144] : memref<3x88x128xbf16, #tpu.memory_space<vmem>>, vector<1x60x128xbf16>
    %221 = vector.shape_cast %220 : vector<1x60x128xbf16> to vector<60x128xbf16>
    %c21_145 = arith.constant 21 : index
    %c0_146 = arith.constant 0 : index
    %c0_147 = arith.constant 0 : index
    %222 = vector.load %arg7[%c21_145, %c0_146, %c0_147] : memref<27x128x128xbf16, #tpu.memory_space<vmem>>, vector<1x128x128xbf16>
    %223 = vector.shape_cast %222 : vector<1x128x128xbf16> to vector<128x128xbf16>
    %cst_148 = arith.constant dense<0.000000e+00> : vector<60x128xf32>
    %224 = tpu.matmul %221, %223, %cst_148 {dimension_numbers = #tpu.dot_dimension_numbers<[1], [0], [0], [1], [0, 0, 1, 1], [], []>} : vector<60x128xbf16>, vector<128x128xbf16>, vector<60x128xf32> -> vector<60x128xf32>
    %225 = arith.addf %218, %224 : vector<60x128xf32>
    %226 = arith.index_cast %197 : i32 to index
    %c11_149 = arith.constant 11 : index
    %c0_150 = arith.constant 0 : index
    %227 = vector.load %arg14[%226, %c11_149, %c0_150] : memref<3x88x128xbf16, #tpu.memory_space<vmem>>, vector<1x60x128xbf16>
    %228 = vector.shape_cast %227 : vector<1x60x128xbf16> to vector<60x128xbf16>
    %c22_151 = arith.constant 22 : index
    %c0_152 = arith.constant 0 : index
    %c0_153 = arith.constant 0 : index
    %229 = vector.load %arg7[%c22_151, %c0_152, %c0_153] : memref<27x128x128xbf16, #tpu.memory_space<vmem>>, vector<1x128x128xbf16>
    %230 = vector.shape_cast %229 : vector<1x128x128xbf16> to vector<128x128xbf16>
    %cst_154 = arith.constant dense<0.000000e+00> : vector<60x128xf32>
    %231 = tpu.matmul %228, %230, %cst_154 {dimension_numbers = #tpu.dot_dimension_numbers<[1], [0], [0], [1], [0, 0, 1, 1], [], []>} : vector<60x128xbf16>, vector<128x128xbf16>, vector<60x128xf32> -> vector<60x128xf32>
    %232 = arith.addf %225, %231 : vector<60x128xf32>
    %233 = arith.index_cast %197 : i32 to index
    %c12_155 = arith.constant 12 : index
    %c0_156 = arith.constant 0 : index
    %234 = vector.load %arg14[%233, %c12_155, %c0_156] : memref<3x88x128xbf16, #tpu.memory_space<vmem>>, vector<1x60x128xbf16>
    %235 = vector.shape_cast %234 : vector<1x60x128xbf16> to vector<60x128xbf16>
    %c23 = arith.constant 23 : index
    %c0_157 = arith.constant 0 : index
    %c0_158 = arith.constant 0 : index
    %236 = vector.load %arg7[%c23, %c0_157, %c0_158] : memref<27x128x128xbf16, #tpu.memory_space<vmem>>, vector<1x128x128xbf16>
    %237 = vector.shape_cast %236 : vector<1x128x128xbf16> to vector<128x128xbf16>
    %cst_159 = arith.constant dense<0.000000e+00> : vector<60x128xf32>
    %238 = tpu.matmul %235, %237, %cst_159 {dimension_numbers = #tpu.dot_dimension_numbers<[1], [0], [0], [1], [0, 0, 1, 1], [], []>} : vector<60x128xbf16>, vector<128x128xbf16>, vector<60x128xf32> -> vector<60x128xf32>
    %239 = arith.addf %232, %238 : vector<60x128xf32>
    %240 = arith.index_cast %197 : i32 to index
    %c20_160 = arith.constant 20 : index
    %c0_161 = arith.constant 0 : index
    %241 = vector.load %arg14[%240, %c20_160, %c0_161] : memref<3x88x128xbf16, #tpu.memory_space<vmem>>, vector<1x60x128xbf16>
    %242 = vector.shape_cast %241 : vector<1x60x128xbf16> to vector<60x128xbf16>
    %c24 = arith.constant 24 : index
    %c0_162 = arith.constant 0 : index
    %c0_163 = arith.constant 0 : index
    %243 = vector.load %arg7[%c24, %c0_162, %c0_163] : memref<27x128x128xbf16, #tpu.memory_space<vmem>>, vector<1x128x128xbf16>
    %244 = vector.shape_cast %243 : vector<1x128x128xbf16> to vector<128x128xbf16>
    %cst_164 = arith.constant dense<0.000000e+00> : vector<60x128xf32>
    %245 = tpu.matmul %242, %244, %cst_164 {dimension_numbers = #tpu.dot_dimension_numbers<[1], [0], [0], [1], [0, 0, 1, 1], [], []>} : vector<60x128xbf16>, vector<128x128xbf16>, vector<60x128xf32> -> vector<60x128xf32>
    %246 = arith.addf %239, %245 : vector<60x128xf32>
    %247 = arith.index_cast %197 : i32 to index
    %c21_165 = arith.constant 21 : index
    %c0_166 = arith.constant 0 : index
    %248 = vector.load %arg14[%247, %c21_165, %c0_166] : memref<3x88x128xbf16, #tpu.memory_space<vmem>>, vector<1x60x128xbf16>
    %249 = vector.shape_cast %248 : vector<1x60x128xbf16> to vector<60x128xbf16>
    %c25 = arith.constant 25 : index
    %c0_167 = arith.constant 0 : index
    %c0_168 = arith.constant 0 : index
    %250 = vector.load %arg7[%c25, %c0_167, %c0_168] : memref<27x128x128xbf16, #tpu.memory_space<vmem>>, vector<1x128x128xbf16>
    %251 = vector.shape_cast %250 : vector<1x128x128xbf16> to vector<128x128xbf16>
    %cst_169 = arith.constant dense<0.000000e+00> : vector<60x128xf32>
    %252 = tpu.matmul %249, %251, %cst_169 {dimension_numbers = #tpu.dot_dimension_numbers<[1], [0], [0], [1], [0, 0, 1, 1], [], []>} : vector<60x128xbf16>, vector<128x128xbf16>, vector<60x128xf32> -> vector<60x128xf32>
    %253 = arith.addf %246, %252 : vector<60x128xf32>
    %254 = arith.index_cast %197 : i32 to index
    %c22_170 = arith.constant 22 : index
    %c0_171 = arith.constant 0 : index
    %255 = vector.load %arg14[%254, %c22_170, %c0_171] : memref<3x88x128xbf16, #tpu.memory_space<vmem>>, vector<1x60x128xbf16>
    %256 = vector.shape_cast %255 : vector<1x60x128xbf16> to vector<60x128xbf16>
    %c26 = arith.constant 26 : index
    %c0_172 = arith.constant 0 : index
    %c0_173 = arith.constant 0 : index
    %257 = vector.load %arg7[%c26, %c0_172, %c0_173] : memref<27x128x128xbf16, #tpu.memory_space<vmem>>, vector<1x128x128xbf16>
    %258 = vector.shape_cast %257 : vector<1x128x128xbf16> to vector<128x128xbf16>
    %cst_174 = arith.constant dense<0.000000e+00> : vector<60x128xf32>
    %259 = tpu.matmul %256, %258, %cst_174 {dimension_numbers = #tpu.dot_dimension_numbers<[1], [0], [0], [1], [0, 0, 1, 1], [], []>} : vector<60x128xbf16>, vector<128x128xbf16>, vector<60x128xf32> -> vector<60x128xf32>
    %260 = arith.addf %253, %259 : vector<60x128xf32>
    %c0_175 = arith.constant 0 : index
    %c0_176 = arith.constant 0 : index
    %261 = vector.load %arg8[%c0_175, %c0_176] : memref<1x128xf32, #tpu.memory_space<vmem>>, vector<1x128xf32>
    %262 = vector.broadcast %261 : vector<1x128xf32> to vector<60x128xf32>
    %263 = arith.mulf %260, %262 : vector<60x128xf32>
    %c0_177 = arith.constant 0 : index
    %c0_178 = arith.constant 0 : index
    %264 = vector.load %arg9[%c0_177, %c0_178] : memref<1x128xf32, #tpu.memory_space<vmem>>, vector<1x128xf32>
    %265 = vector.broadcast %264 : vector<1x128xf32> to vector<60x128xf32>
    %266 = arith.addf %263, %265 : vector<60x128xf32>
    %cst_179 = arith.constant 0.000000e+00 : f32
    %267 = vector.broadcast %cst_179 : f32 to vector<60x128xf32>
    %268 = arith.maximumf %266, %267 : vector<60x128xf32>
    %269 = arith.truncf %268 : vector<60x128xf32> to vector<60x128xbf16>
    %c0_180 = arith.constant 0 : index
    %c0_181 = arith.constant 0 : index
    %270 = vector.load %arg10[%c0_180, %c0_181] : memref<128x128xbf16, #tpu.memory_space<vmem>>, vector<128x128xbf16>
    %cst_182 = arith.constant dense<0.000000e+00> : vector<60x128xf32>
    %271 = tpu.matmul %269, %270, %cst_182 {dimension_numbers = #tpu.dot_dimension_numbers<[1], [0], [0], [1], [0, 0, 1, 1], [], []>} : vector<60x128xbf16>, vector<128x128xbf16>, vector<60x128xf32> -> vector<60x128xf32>
    %c0_183 = arith.constant 0 : index
    %c0_184 = arith.constant 0 : index
    %272 = vector.load %arg11[%c0_183, %c0_184] : memref<1x128xf32, #tpu.memory_space<vmem>>, vector<1x128xf32>
    %273 = vector.broadcast %272 : vector<1x128xf32> to vector<60x128xf32>
    %274 = arith.mulf %271, %273 : vector<60x128xf32>
    %c0_185 = arith.constant 0 : index
    %c0_186 = arith.constant 0 : index
    %275 = vector.load %arg12[%c0_185, %c0_186] : memref<1x128xf32, #tpu.memory_space<vmem>>, vector<1x128xf32>
    %276 = vector.broadcast %275 : vector<1x128xf32> to vector<60x128xf32>
    %277 = arith.addf %274, %276 : vector<60x128xf32>
    %c1_i32_187 = arith.constant 1 : i32
    %278 = arith.addi %arg1, %c1_i32_187 : i32
    %c0_188 = arith.constant 0 : index
    %279 = arith.index_cast %278 : i32 to index
    %c11_189 = arith.constant 11 : index
    %c0_190 = arith.constant 0 : index
    %280 = vector.load %arg2[%c0_188, %279, %c11_189, %c0_190] : memref<1x6x80x128xbf16, #tpu.memory_space<vmem>>, vector<1x1x60x128xbf16>
    %281 = vector.shape_cast %280 : vector<1x1x60x128xbf16> to vector<60x128xbf16>
    %282 = arith.extf %281 : vector<60x128xbf16> to vector<60x128xf32>
    %283 = arith.addf %277, %282 : vector<60x128xf32>
    %cst_191 = arith.constant 0.000000e+00 : f32
    %284 = vector.broadcast %cst_191 : f32 to vector<60x128xf32>
    %285 = arith.maximumf %283, %284 : vector<60x128xf32>
    %286 = arith.truncf %285 : vector<60x128xf32> to vector<60x128xbf16>
    %c0_192 = arith.constant 0 : index
    %c0_193 = arith.constant 0 : index
    %c0_194 = arith.constant 0 : index
    %c0_195 = arith.constant 0 : index
    %287 = vector.load %arg13[%c0_192, %c0_193, %c0_194, %c0_195] : memref<1x1x60x128xbf16, #tpu.memory_space<vmem>>, vector<1x1x60x128xbf16>
    %288 = vector.shape_cast %287 : vector<1x1x60x128xbf16> to vector<60x128xbf16>
    %289 = vector.shape_cast %286 : vector<60x128xbf16> to vector<1x1x60x128xbf16>
    tpu.vector_store %arg13[%c0_192, %c0_193, %c0_194, %c0_195], %289 {strides = array<i32>} : memref<1x1x60x128xbf16, #tpu.memory_space<vmem>>, vector<1x1x60x128xbf16>,
    return
  }
  func.func @transform_0(%arg0: i32, %arg1: i32) -> (i32, i32, i32, i32) {
    %c0_i32 = arith.constant 0 : i32
    %c0_i32_0 = arith.constant 0 : i32
    %c0_i32_1 = arith.constant 0 : i32
    %c0_i32_2 = arith.constant 0 : i32
    return %arg0, %c0_i32, %c0_i32_0, %c0_i32_1 : i32, i32, i32, i32
  }
  func.func @transform_1(%arg0: i32, %arg1: i32) -> (i32, i32) {
    %c0_i32 = arith.constant 0 : i32
    %c0_i32_0 = arith.constant 0 : i32
    %c0_i32_1 = arith.constant 0 : i32
    return %c0_i32, %c0_i32_0 : i32, i32
  }
  func.func @transform_2(%arg0: i32, %arg1: i32) -> (i32, i32) {
    %c0_i32 = arith.constant 0 : i32
    %c0_i32_0 = arith.constant 0 : i32
    %c0_i32_1 = arith.constant 0 : i32
    return %c0_i32, %c0_i32_0 : i32, i32
  }
  func.func @transform_3(%arg0: i32, %arg1: i32) -> (i32, i32) {
    %c0_i32 = arith.constant 0 : i32
    %c0_i32_0 = arith.constant 0 : i32
    %c0_i32_1 = arith.constant 0 : i32
    return %c0_i32, %c0_i32_0 : i32, i32
  }
  func.func @transform_4(%arg0: i32, %arg1: i32) -> (i32, i32) {
    %c0_i32 = arith.constant 0 : i32
    %c0_i32_0 = arith.constant 0 : i32
    %c0_i32_1 = arith.constant 0 : i32
    return %c0_i32, %c0_i32_0 : i32, i32
  }
  func.func @transform_5(%arg0: i32, %arg1: i32) -> (i32, i32, i32) {
    %c0_i32 = arith.constant 0 : i32
    %c0_i32_0 = arith.constant 0 : i32
    %c0_i32_1 = arith.constant 0 : i32
    %c0_i32_2 = arith.constant 0 : i32
    return %c0_i32, %c0_i32_0, %c0_i32_1 : i32, i32, i32
  }
  func.func @transform_6(%arg0: i32, %arg1: i32) -> (i32, i32) {
    %c0_i32 = arith.constant 0 : i32
    %c0_i32_0 = arith.constant 0 : i32
    %c0_i32_1 = arith.constant 0 : i32
    return %c0_i32, %c0_i32_0 : i32, i32
  }
  func.func @transform_7(%arg0: i32, %arg1: i32) -> (i32, i32) {
    %c0_i32 = arith.constant 0 : i32
    %c0_i32_0 = arith.constant 0 : i32
    %c0_i32_1 = arith.constant 0 : i32
    return %c0_i32, %c0_i32_0 : i32, i32
  }
  func.func @transform_8(%arg0: i32, %arg1: i32) -> (i32, i32) {
    %c0_i32 = arith.constant 0 : i32
    %c0_i32_0 = arith.constant 0 : i32
    %c0_i32_1 = arith.constant 0 : i32
    return %c0_i32, %c0_i32_0 : i32, i32
  }
  func.func @transform_9(%arg0: i32, %arg1: i32) -> (i32, i32) {
    %c0_i32 = arith.constant 0 : i32
    %c0_i32_0 = arith.constant 0 : i32
    %c0_i32_1 = arith.constant 0 : i32
    return %c0_i32, %c0_i32_0 : i32, i32
  }
  func.func @transform_10(%arg0: i32, %arg1: i32) -> (i32, i32) {
    %c0_i32 = arith.constant 0 : i32
    %c0_i32_0 = arith.constant 0 : i32
    %c0_i32_1 = arith.constant 0 : i32
    return %c0_i32, %c0_i32_0 : i32, i32
  }
  func.func @transform_11(%arg0: i32, %arg1: i32) -> (i32, i32, i32, i32) {
    %c0_i32 = arith.constant 0 : i32
    %c0_i32_0 = arith.constant 0 : i32
    %c0_i32_1 = arith.constant 0 : i32
    return %arg0, %arg1, %c0_i32, %c0_i32_0 : i32, i32, i32, i32
  }
}

</mosaic_0001>

<bundles_post_ra>
// kernel: bottleneck_forward.1
= control target key start
LH: loop header
LB: loop body
LE: loop exit
PB: predicated region body
PF: predicated region fallthrough
CT: control target
= control target key end

     0   :  { %s8778_s17 = smov 0   ;;  %s8780_s18 = smov 0   ;;  %s10729_s0 = inlined_call_operand.vmem [shape: bf16[2,6,80,128], index: 0, kind: input, shape index: {}]   ;;  %s10730_s1 = inlined_call_operand.vmem [shape: f32[80,1], index: 1, kind: input, shape index: {}]   ;;  %s10731_s2 = inlined_call_operand.vmem [shape: bf16[128,128], index: 2, kind: input, shape index: {}]   ;;  %s10732_s3 = inlined_call_operand.vmem [shape: f32[1,128], index: 3, kind: input, shape index: {}]   ;;  %s10733_s4 = inlined_call_operand.vmem [shape: f32[1,128], index: 4, kind: input, shape index: {}]   ;;  %s10734_s5 = inlined_call_operand.vmem [shape: bf16[27,128,128], index: 5, kind: input, shape index: {}]   ;;  %s10735_s6 = inlined_call_operand.vmem [shape: f32[1,128], index: 6, kind: input, shape index: {}]   ;;  %s10736_s7 = inlined_call_operand.vmem [shape: f32[1,128], index: 7, kind: input, shape index: {}]   ;;  %s10737_s8 = inlined_call_operand.vmem [shape: bf16[128,128], index: 8, kind: input, shape index: {}]   ;;  %s10738_s9 = inlined_call_operand.vmem [shape: f32[1,128], index: 9, kind: input, shape index: {}]   ;;  %s10739_s10 = inlined_call_operand.vmem [shape: f32[1,128], index: 10, kind: input, shape index: {}]   ;;  %s10740_s11 = inlined_call_operand.vmem [shape: bf16[2,4,60,128], index: 11, kind: output, shape index: {}]  }
   0x1   :  { %10744 = sst [smem:[#allocation21_spill]] %s10729_s0  ;;  %s8782_s19 = smov 0  }
   0x2   :  { %s8784_s20 = smov 0   ;;  %s8786_s21 = smov 0  }
   0x3 LB: > { %s30_s22 = sadd.s32 1, %s8702_s19  ;;  %s33_s23 = sadd.s32 1, %s8706_s20  ;;  %s8710_s21 = sphi %s8786_s21, %s21_s21   ;;  %s8706_s20 = sphi %s8784_s20, %s10789_s20   ;;  %s8702_s19 = sphi %s8782_s19, %s10788_s19   ;;  %s8698_s18 = sphi %s8780_s18, %s10787_s18   ;;  %s8694_s17 = sphi %s8778_s17, %s10786_s17  }
   0x4   : > { %p31_p0 = scmp.ge.s32.totalorder %s30_s22, 4  ;;  %p6239_p1 = scmp.ge.s32.totalorder %s8710_s21, 1 }
   0x5   : > { %p351_p2 = scmp.lt.s32.totalorder %s8710_s21, 9 }
   0x6   : > { %s10791_s22 = smov (%p31_p0, %s30_s22), 0  ;;  %s10793_s23 = smov (!%p31_p0, %s33_s23), %s8706_s20 }
   0x7   : > { %10745 = sst [smem:[#allocation3_spill]] %s10791_s22  ;;  %p352_p3 = pnand %p6239_p1, %p351_p2 }
   0x8   : > { %p35_p4 = scmp.ge.s32.totalorder %s10793_s23, 2 }
   0x9   : > { %355 = sbr.rel (%p352_p3) target bundleno = 1418 (0x58a), region = 64 }
   0xa   : > { %s10795_s23 = smov (%p35_p4, %s10793_s23), 0 }
   0xb   : > { %10746 = sst [smem:[#allocation4_spill]] %s10795_s23 }
   0xe   : > { %p395_p5 = scmp.lt.s32.totalorder %s8698_s18, 1  ;;  %p402_p6 = scmp.lt.s32.totalorder %s8694_s17, 3  ;;  %v8814_v0 = vld [vmem:[%s10730_s1] sm:$0xff]  ;;  %v8819_v1 = vld [vmem:[%s10730_s1 + $0x8] sm:$0xff]  ;;  %v8824_v2 = vld [vmem:[%s10730_s1 + $0x10] sm:$0xff] }
   0xf   : > { %v8829_v3 = vld [vmem:[%s10730_s1 + $0x18] sm:$0xff]  ;;  %v8834_v4 = vld [vmem:[%s10730_s1 + $0x20] sm:$0xff]  ;;  %v8839_v5 = vld [vmem:[%s10730_s1 + $0x28] sm:$0xff]  ;;  %s10747_s0 = sld [smem:[#allocation21_spill]]  ;;  %p6244_p7 = scmp.ne.s32.totalorder %s8694_s17, 0 }
  0x10   : > { %s10797_s18 = smov (!%p395_p5, %s8698_s18), 1  ;;  %v8844_v6 = vld [vmem:[%s10730_s1 + $0x30] sm:$0xff]  ;;  %v8849_v7 = vld [vmem:[%s10730_s1 + $0x38] sm:$0xff]  ;;  %v8854_v8 = vld [vmem:[%s10730_s1 + $0x40] sm:$0xff] }
  0x11   : > { %s403_s30 = scalar_select %p402_p6, %s8694_s17, 3  ;;  %v8860_v9 = vld [vmem:[%s10730_s1 + $0x48] sm:$0xff] }
  0x12   : > { %s8293_s14 = smul.u32 240, %s10797_s18  ;;  %s6242_s15 = sshll.u32 %s10797_s18, 5 }
  0x13   : > { %s6241_s16 = sshll.u32 %s403_s30, 3  ;;  %423 = sbr.rel (%p6244_p7) target bundleno = 281 (0x119), region = 68 }
  0x14   : > { %s406_s27 = sadd.s32 %s6242_s15, %s6241_s16 }
  0x15   : > { %s8865_s26 = scalar_lea.vmem %s10747_s0, %s8293_s14  ;;  %s6243_s23 = sshll.u32 %s406_s27, 2 }
  0x16   : > { %s8870_s29 = scalar_lea.vmem %s10740_s11, %s6243_s23 }
  0x18   : > { %v8343_v10 = vld [vmem:[%s10731_s2 + $0x38] sm:$0xff]   ;;  %v8712_v11 = vmov 0.0   ;;  %v8344_v12 = vld [vmem:[%s10731_s2 + $0x30] sm:$0xff]   ;;  %v8713_v13 = vmov 0   ;;  %vm8714_vm0 = vmmov 0   ;;  %v8345_v14 = vld [vmem:[%s10731_s2 + $0x28] sm:$0xff]  }
  0x19   : > { %7533 = vmatprep.subr.bf16.mxu0 %v8712_v11  ;;  %8277 = vmatprep.subr.bf16.mxu1 %v8712_v11  ;;  %424 = vst [vmem:[#allocation2 + $0x28] sm:$0xf] %v8713_v13  ;;  %426 = vst [vmem:[#allocation2 + $0x54] sm:$0xf] %v8713_v13  ;;  %v8346_v15 = vld [vmem:[%s10731_s2 + $0x20] sm:$0xff]   ;;  %v8347_v16 = vld [vmem:[%s10731_s2 + $0x18] sm:$0xff]  }
  0x1a   : > { %7534 = vmatpush3.bf16.msra.mxu0 %v8343_v10  ;;  %8285 = vmatpush3.bf16.msra.mxu1 %v8343_v10  ;;  %428 = vst [vmem:[#allocation2 + $0x80] sm:$0xf] %v8713_v13  ;;  %429 = vst [vmem:[#allocation2] sm:$0xf] %v8713_v13  ;;  %v8348_v17 = vld [vmem:[%s10731_s2 + $0x10] sm:$0xff]   ;;  %v8349_v18 = vld [vmem:[%s10731_s2 + $0x8] sm:$0xff]  }
  0x1b   : > { %7535 = vmatprep.subr.bf16.mxu0 %v8712_v11  ;;  %8278 = vmatprep.subr.bf16.mxu1 %v8712_v11  ;;  %430 = vst [vmem:[#allocation2 + $0x4] sm:$0xf] %v8713_v13  ;;  %431 = vst [vmem:[#allocation2 + $0x8] sm:$0xf] %v8713_v13  ;;  %v8350_v19 = vld [vmem:[%s10731_s2] sm:$0xff]   ;;  %v8351_v20 = vld [vmem:[%s8865_s26 + $0x28] sm:$0xff]  }
  0x1c   : > { %432 = vst [vmem:[#allocation2 + $0xc] sm:$0xf] %v8713_v13  ;;  %433 = vst [vmem:[#allocation2 + $0x10] sm:$0xf] %v8713_v13  ;;  %7549 = vmatprep.mubr.msk.bf16.mxu0 %vm8714_vm0, %v8712_v11  ;;  %7561 = vmatprep.mubr.msk.bf16.mxu1 %vm8714_vm0, %v8712_v11  ;;  %v8352_v21 = vld [vmem:[%s8865_s26 + $0x40] sm:$0xff]   ;;  %v8353_v22 = vld [vmem:[%s8865_s26 + $0x30] sm:$0xff]  }
  0x1d   : > { %434 = vst [vmem:[#allocation2 + $0x14] sm:$0xf] %v8713_v13  ;;  %435 = vst [vmem:[#allocation2 + $0x18] sm:$0xf] %v8713_v13  ;;  %8342 = vset.pattern.permute.xlu1 %v8713_v13  ;;  %8341 = vset.pattern.permute.xlu0 %v8713_v13  ;;  %v8354_v23 = vld [vmem:[%s8865_s26 + $0x48] sm:$0xff]   ;;  %v8355_v24 = vld [vmem:[%s8865_s26 + $0x38] sm:$0xff]  }
  0x1e   : > { %436 = vst [vmem:[#allocation2 + $0x1c] sm:$0xf] %v8713_v13  ;;  %437 = vst [vmem:[#allocation2 + $0x20] sm:$0xf] %v8713_v13  ;;  %7536 = vmatpush3.bf16.msra.mxu0 %v8344_v12  ;;  %8286 = vmatpush3.bf16.msra.mxu1 %v8344_v12  ;;  %v8941_v28 = vld [vmem:[%s10732_s3] ss:$0 sm:$0xff] }
  0x1f   : > { %438 = vst [vmem:[#allocation2 + $0x24] sm:$0xf] %v8713_v13  ;;  %7537 = vmatprep.subr.bf16.mxu0 %v8712_v11  ;;  %8279 = vmatprep.subr.bf16.mxu1 %v8712_v11  ;;  %v8948_v31 = vld [vmem:[%s10733_s4] ss:$0 sm:$0xff] }
  0x20   : > { %673 = vperm.xlu1 %8342, %v8824_v2   ;;  %663 = vperm.xlu0 %8341, %v8814_v0  }
  0x22   : > { %7538 = vmatpush3.bf16.msra.mxu0 %v8345_v14  ;;  %8287 = vmatpush3.bf16.msra.mxu1 %v8345_v14 }
  0x23   : > { %7539 = vmatprep.subr.bf16.mxu0 %v8712_v11  ;;  %8280 = vmatprep.subr.bf16.mxu1 %v8712_v11 }
  0x24   : > { %678 = vperm.xlu1 %8342, %v8829_v3   ;;  %668 = vperm.xlu0 %8341, %v8819_v1  }
  0x26   : > { %7540 = vmatpush3.bf16.msra.mxu0 %v8346_v15  ;;  %8288 = vmatpush3.bf16.msra.mxu1 %v8346_v15 }
  0x27   : > { %7541 = vmatprep.subr.bf16.mxu0 %v8712_v11  ;;  %8281 = vmatprep.subr.bf16.mxu1 %v8712_v11 }
  0x28   : > { %688 = vperm.xlu1 %8342, %v8839_v5   ;;  %683 = vperm.xlu0 %8341, %v8834_v4  }
  0x2a   : > { %7542 = vmatpush3.bf16.msra.mxu0 %v8347_v16  ;;  %8289 = vmatpush3.bf16.msra.mxu1 %v8347_v16 }
  0x2b   : > { %7543 = vmatprep.subr.bf16.mxu0 %v8712_v11  ;;  %8282 = vmatprep.subr.bf16.mxu1 %v8712_v11 }
  0x2c   : > { %698 = vperm.xlu1 %8342, %v8849_v7   ;;  %693 = vperm.xlu0 %8341, %v8844_v6  }
  0x2e   : > { %7544 = vmatpush3.bf16.msra.mxu0 %v8348_v17  ;;  %8290 = vmatpush3.bf16.msra.mxu1 %v8348_v17 }
  0x2f   : > { %7545 = vmatprep.subr.bf16.mxu0 %v8712_v11  ;;  %8283 = vmatprep.subr.bf16.mxu1 %v8712_v11 }
  0x30   : > { %708 = vperm.xlu1 %8342, %v8860_v9   ;;  %703 = vperm.xlu0 %8341, %v8854_v8  }
  0x32   : > { %7546 = vmatpush3.bf16.msra.mxu0 %v8349_v18  ;;  %8291 = vmatpush3.bf16.msra.mxu1 %v8349_v18 }
  0x33   : > { %7547 = vmatprep.subr.bf16.mxu0 %v8712_v11  ;;  %8284 = vmatprep.subr.bf16.mxu1 %v8712_v11 }
  0x36   : > { %7548 = vmatpush3.bf16.msra.mxu0 %v8350_v19  ;;  %8292 = vmatpush3.bf16.msra.mxu1 %v8350_v19 }
  0x39   : > { %7550 = vmatmul.mubr.bf16.vlgmr.msra.gmra.mxu0 %v8351_v20  ;;  %7562 = vmatmul.mubr.bf16.vlgmr.msra.gmra.mxu1 %v8352_v21 }
  0x3a   : > { %7553 = vmatprep.mubr.msk.bf16.mxu0 %vm8714_vm0, %v8712_v11  ;;  %7565 = vmatprep.mubr.msk.bf16.mxu1 %vm8714_vm0, %v8712_v11 }
  0x41   : > { %7554 = vmatmul.mubr.bf16.gmra.mxu0 %v8353_v22  ;;  %7566 = vmatmul.mubr.bf16.gmra.mxu1 %v8354_v23 }
  0x42   : > { %7557 = vmatprep.mubr.msk.bf16.mxu0 %vm8714_vm0, %v8712_v11 }
  0x49   : > { %7558 = vmatmul.mubr.bf16.gmra.mxu0 %v8355_v24 }
  0x9b   : > { %v664_v25 = vpop.permute.xlu0 %663  ;;  %v674_v26 = vpop.permute.xlu1 %673 }
  0x9f   : > { %v669_v27 = vpop.permute.xlu0 %668  ;;  %v8943_v29 = vpop.permute.xlu1 %678 }
  0xa3   : > { %v8952_v37 = vpop.permute.xlu0 %683  ;;  %v8954_v41 = vpop.permute.xlu1 %688 }
  0xa7   : > { %v694_v52 = vpop.permute.xlu0 %693  ;;  %v699_v58 = vpop.permute.xlu1 %698 }
  0xab   : > { %v704_v19 = vpop.permute.xlu0 %703 }
  0xf9   : > { %v578_v30 = vpop.f32.mrf.mxu0  ;;  %v602_v32 = vpop.f32.mrf.mxu1 }
  0xfa   : > { %v624_v33 = vmul.f32 %v8941_v28, %v578_v30  ;;  %v630_v13 = vmul.f32 %v8941_v28, %v602_v32 }
  0xfb   : > { %v7551_v34 = vpop.f32.mrf.mxu0  ;;  %v7563_v35 = vpop.f32.mrf.mxu1 }
  0xfc   : > { %v641_v36 = vadd.f32 %v8948_v31, %v624_v33  ;;  %v709_v34 = vpop.permute.xlu1 %708 }
  0xfd   : > { %v581_v38 = vpop.f32.mrf.mxu0  ;;  %v605_v39 = vpop.f32.mrf.mxu1 }
  0xfe   : > { %v651_v40 = vmax.f32 %v641_v36, 0.0  ;;  %v625_v42 = vmul.f32 %v8941_v28, %v581_v38  ;;  %v631_v43 = vmul.f32 %v8941_v28, %v605_v39  ;;  %v647_v36 = vadd.f32 %v8948_v31, %v630_v13 }
  0xff   : > { %v7552_v44 = vpop.f32.mrf.mxu0  ;;  %v7564_v45 = vpop.f32.mrf.mxu1 }
 0x100   : > { %v711_v46 = vmul.f32 %v664_v25, %v651_v40  ;;  %v642_v47 = vadd.f32 %v8948_v31, %v625_v42  ;;  %v648_v48 = vadd.f32 %v8948_v31, %v631_v43  ;;  %v657_v45 = vmax.f32 %v647_v36, 0.0 }
 0x101   : > { %v586_v49 = vpop.f32.mrf.mxu0  ;;  %v610_v50 = vpop.f32.mrf.mxu1 }
 0x102   : > { %v7055_v51 = vpack.c.bf16 %v711_v46, %v711_v46  ;;  %v626_v53 = vmul.f32 %v8941_v28, %v586_v49  ;;  %v632_v54 = vmul.f32 %v8941_v28, %v610_v50  ;;  %v652_v57 = vmax.f32 %v642_v47, 0.0 }
 0x103   : > { %v7555_v55 = vpop.f32.mrf.mxu0  ;;  %v7567_v56 = vpop.f32.mrf.mxu1  ;;  %v658_v60 = vmax.f32 %v648_v48, 0.0 }
 0x104   : > { %761 = vst [vmem:[#allocation2 + $0x2c] sm:$0xf] %v7055_v51  ;;  %v643_v59 = vadd.f32 %v8948_v31, %v626_v53  ;;  %v649_v61 = vadd.f32 %v8948_v31, %v632_v54  ;;  %v712_v17 = vmul.f32 %v669_v27, %v652_v57  ;;  %v717_v51 = vmul.f32 %v694_v52, %v657_v45 }
 0x105   : > { %v589_v62 = vpop.f32.mrf.mxu0  ;;  %v613_v63 = vpop.f32.mrf.mxu1  ;;  %v718_v22 = vmul.f32 %v699_v58, %v658_v60 }
 0x106   : > { %v653_v10 = vmax.f32 %v643_v59, 0.0  ;;  %v627_v11 = vmul.f32 %v8941_v28, %v589_v62  ;;  %v633_v12 = vmul.f32 %v8941_v28, %v613_v63  ;;  %v659_v14 = vmax.f32 %v649_v61, 0.0 }
 0x107   : > { %v7556_v15 = vpop.f32.mrf.mxu0  ;;  %v7568_v16 = vpop.f32.mrf.mxu1 }
 0x108   : > { %v713_v18 = vmul.f32 %v674_v26, %v653_v10  ;;  %v644_v20 = vadd.f32 %v8948_v31, %v627_v11  ;;  %v650_v21 = vadd.f32 %v8948_v31, %v633_v12  ;;  %v719_v23 = vmul.f32 %v704_v19, %v659_v14 }
 0x109   : > { %v594_v24 = vpop.f32.mrf.mxu0 }
 0x10a   : > { %v7089_v25 = vpack.c.bf16 %v713_v18, %v712_v17  ;;  %v660_v30 = vmax.f32 %v650_v21, 0.0  ;;  %v628_v33 = vmul.f32 %v8941_v28, %v594_v24  ;;  %v7104_v35 = vpack.c.bf16 %v719_v23, %v718_v22 }
 0x10b   : > { %v7559_v32 = vpop.f32.mrf.mxu0  ;;  %v654_v27 = vmax.f32 %v644_v20, 0.0 }
 0x10c   : > { %7158 = vst [vmem:[#allocation2 + $0x30] sm:$0xff] %v7089_v25   ;;  %v720_v26 = vmul.f32 %v709_v34, %v660_v30  ;;  %v645_v38 = vadd.f32 %v8948_v31, %v628_v33  ;;  %7161 = vst [vmem:[#allocation2 + $0x48] sm:$0xff] %v7104_v35  }
 0x10d   : > { %v597_v39 = vpop.f32.mrf.mxu0  ;;  %v714_v46 = vmul.f32 %v8943_v29, %v654_v27 }
 0x10e   : > { %v7064_v40 = vpack.c.bf16 %v720_v26, %v720_v26  ;;  %v655_v42 = vmax.f32 %v645_v38, 0.0  ;;  %v629_v43 = vmul.f32 %v8941_v28, %v597_v39 }
 0x10f   : > { %v7560_v44 = vpop.f32.mrf.mxu0 }
 0x110   : > { %770 = vst [vmem:[#allocation2 + $0x50] sm:$0xf] %v7064_v40  ;;  %v715_v47 = vmul.f32 %v8952_v37, %v655_v42  ;;  %v646_v48 = vadd.f32 %v8948_v31, %v629_v43 }
 0x112   : > { %v7094_v49 = vpack.c.bf16 %v715_v47, %v714_v46  ;;  %v656_v50 = vmax.f32 %v646_v48, 0.0 }
 0x114   : > { %7159 = vst [vmem:[#allocation2 + $0x38] sm:$0xff] %v7094_v49   ;;  %v716_v53 = vmul.f32 %v8954_v41, %v656_v50 }
 0x116   : > { %v7099_v54 = vpack.c.bf16 %v717_v51, %v716_v53 }
 0x118   : > { %7160 = vst [vmem:[#allocation2 + $0x40] sm:$0xff] %v7099_v54  }
 0x119 PF: > { %v8358_v28 = vld [vmem:[%s10731_s2 + $0x38] sm:$0xff]   ;;  %v8715_v29 = vmov 0.0   ;;  %v8359_v31 = vld [vmem:[%s10731_s2 + $0x30] sm:$0xff]   ;;  %vm8716_vm1 = vmmov 0   ;;  %s6182_s27 = smul.u32 40, %s8694_s17  ;;  %v8717_v37 = vmov 0  }
 0x11a   : > { %7569 = vmatprep.subr.bf16.mxu0 %v8715_v29  ;;  %7585 = vmatprep.mubr.msk.bf16.mxu0 %vm8716_vm1, %v8715_v29  ;;  %s8989_s28 = sadd.s32 2, %s8694_s17  ;;  %v8360_v41 = vld [vmem:[%s10731_s2 + $0x28] sm:$0xff]   ;;  %s1137_s30 = ssub.s32 0, %s8694_s17  ;;  %v8361_v52 = vld [vmem:[%s10731_s2 + $0x20] sm:$0xff]   ;;  %v8362_v55 = vld [vmem:[%s10731_s2 + $0x18] sm:$0xff]   ;;  %vm2017_vm2 = vcmask 1045504  }
 0x11b   : > { %7570 = vmatpush3.bf16.msra.mxu0 %v8358_v28  ;;  %8356 = vset.pattern.permute.xlu0 %v8717_v37  ;;  %s8996_s18 = scalar_lea.vmem %s8865_s26, %s6182_s27  ;;  %p785_p8 = scmp.le.s32.totalorder %s8989_s28, 4  ;;  %v8363_v56 = vld [vmem:[%s10731_s2 + $0x10] sm:$0xff]   ;;  %v8364_v60 = vld [vmem:[%s10731_s2 + $0x8] sm:$0xff]   ;;  %v8372_v12 = vld [vmem:[%s10734_s5 + $0x78] sm:$0xff]   ;;  %vm1214_vm3 = vsmask.f32 7424 }
 0x11c   : > { %7571 = vmatprep.subr.bf16.mxu0 %v8715_v29  ;;  %8357 = vset.pattern.permute.xlu1 %v8717_v37  ;;  %s6319_s22 = smin.u32 %s8694_s17, %s1137_s30  ;;  %s9002_s23 = sadd.s32 1, %s8694_s17  ;;  %v8367_v11 = vld [vmem:[%s8996_s18 + $0x58] sm:$0xff]   ;;  %v8373_v13 = vld [vmem:[%s10734_s5 + $0xb0] sm:$0xff]   ;;  %v8375_v15 = vld [vmem:[%s10734_s5 + $0xa8] sm:$0xff]   ;;  %vm1504_vm4 = vcmask 1046528   ;;  %vm2563_vm7 = vcmask 1044480  }
 0x11d   : > { %8661 = sdivrem.u32 %s6319_s22, 3  ;;  %s2700_s16 = ssub.s32 0, %s9002_s23  ;;  %7605 = vmatprep.subr.bf16.mxu1 %v8372_v12  ;;  %v8374_v14 = vld [vmem:[%s10734_s5 + $0x70] sm:$0xff]   ;;  %v8376_v16 = vld [vmem:[%s10734_s5 + $0x68] sm:$0xff]   ;;  %v8377_v17 = vld [vmem:[%s10734_s5 + $0xa0] sm:$0xff]  }
 0x11e   : > { %s6545_s24 = smin.u32 %s2700_s16, %s9002_s23  ;;  %s773_s12 = ssub.s32 0, %s8989_s28  ;;  %7606 = vmatpush3.bf16.msra.mxu1 %v8372_v12  ;;  %v8378_v18 = vld [vmem:[%s10734_s5 + $0x60] sm:$0xff]   ;;  %v8379_v19 = vld [vmem:[%s10734_s5 + $0x98] sm:$0xff]   ;;  %v8381_v21 = vld [vmem:[%s10734_s5 + $0x90] sm:$0xff]   ;;  %vm1835_vm5 = vsmask.f32 6400 }
 0x11f   : > { %7572 = vmatpush3.bf16.msra.mxu0 %v8359_v31  ;;  %s786_s26 = scalar_select %p785_p8, 1, 0  ;;  %7607 = vmatprep.subr.bf16.mxu1 %v8374_v14  ;;  %v8380_v20 = vld [vmem:[%s10734_s5 + $0x58] sm:$0xff]   ;;  %v8382_v22 = vld [vmem:[%s10734_s5 + $0x50] sm:$0xff]   ;;  %v8383_v23 = vld [vmem:[%s10734_s5 + $0x88] sm:$0xff]  }
 0x120   : > { %7573 = vmatprep.subr.bf16.mxu0 %v8715_v29  ;;  %8663 = sdivrem.u32 %s6545_s24, 3  ;;  %s6280_s30 = smin.u32 %s773_s12, %s8989_s28  ;;  %v8384_v24 = vld [vmem:[%s10734_s5 + $0x48] sm:$0xff]   ;;  %v8385_v25 = vld [vmem:[%s10734_s5 + $0x80] sm:$0xff]   ;;  %v9108_v33 = vld [vmem:[%s10734_s5 + $0x138] sm:$0xff]   ;;  %vm2376_vm6 = vsmask.f32 5376 }
 0x121   : > { %s787_s13 = scvt.s32.f32 %s786_s26  ;;  %8665 = sdivrem.u32 %s6280_s30, 3  ;;  %v8386_v30 = vld [vmem:[%s10734_s5 + $0x40] sm:$0xff]   ;;  %v9114_v34 = vld [vmem:[%s10734_s5 + $0x38] sm:$0xff]  }
 0x122   : > { %p2699_p9 = scmp.lt.s32.totalorder %s9002_s23, 0  ;;  %7608 = vmatpush3.bf16.msra.mxu1 %v8374_v14  ;;  %p772_p10 = scmp.lt.s32.totalorder %s8989_s28, 0  ;;  %v9122_v35 = vld [vmem:[%s10732_s3] ss:$0 sm:$0xff] }
 0x123   : > { %7574 = vmatpush3.bf16.msra.mxu0 %v8360_v41  ;;  %v1012_v57 = vstv %s787_s13  ;;  %7609 = vmatprep.subr.bf16.mxu1 %v8376_v16  ;;  %v9127_v36 = vld [vmem:[%s10733_s4] ss:$0 sm:$0xff]  ;;  %p1136_p12 = scmp.lt.s32.totalorder %s8694_s17, 0 }
 0x124   : > { %7575 = vmatprep.subr.bf16.mxu0 %v8715_v29  ;;  %v1013_v58 = vmul.f32 %v1012_v57, %v8814_v0  ;;  %v1015_v59 = vmul.f32 %v1012_v57, %v8824_v2  ;;  %v1014_v61 = vmul.f32 %v1012_v57, %v8819_v1  ;;  %v1016_v62 = vmul.f32 %v1012_v57, %v8829_v3  ;;  %v8365_v1 = vld [vmem:[%s10731_s2] sm:$0xff]  }
 0x125   : > { %v1018_v0 = vmul.f32 %v1012_v57, %v8839_v5  ;;  %v1017_v2 = vmul.f32 %v1012_v57, %v8834_v4  ;;  %v1020_v3 = vmul.f32 %v1012_v57, %v8849_v7  ;;  %v1019_v5 = vmul.f32 %v1012_v57, %v8844_v6  ;;  %v8366_v4 = vld [vmem:[%s8996_s18 + $0x50] sm:$0xff]   ;;  %v8368_v6 = vld [vmem:[%s8996_s18 + $0x60] sm:$0xff]   ;;  %v8369_v7 = vld [vmem:[%s8996_s18 + $0x68] sm:$0xff]  }
 0x126   : > { %1025 = vperm.xlu0 %8356, %v1013_v58   ;;  %1035 = vperm.xlu1 %8357, %v1015_v59   ;;  %s9028_s0 = spop.drf %8661  ;;  %v1022_v63 = vmul.f32 %v1012_v57, %v8860_v9  ;;  %v1021_v10 = vmul.f32 %v1012_v57, %v8854_v8  ;;  %v8370_v8 = vld [vmem:[%s8996_s18 + $0x70] sm:$0xff]   ;;  %v8371_v9 = vld [vmem:[%s10734_s5 + $0xb8] sm:$0xff]  }
 0x127   : > { %7576 = vmatpush3.bf16.msra.mxu0 %v8361_v52  ;;  %7610 = vmatpush3.bf16.msra.mxu1 %v8376_v16  ;;  %s1141_s23 = ssub.s32 0, %s9028_s0 }
 0x128   : > { %7577 = vmatprep.subr.bf16.mxu0 %v8715_v29  ;;  %7611 = vmatprep.subr.bf16.mxu1 %v8378_v18  ;;  %s10805_s23 = smov (!%p1136_p12, %s1141_s23), %s9028_s0 }
 0x129   : > { %s8664_s16 = spop.drf %8663  ;;  %p6321_p13 = scmp.lt.s32.totalorder %s10805_s23, 0 }
 0x12a   : > { %1030 = vperm.xlu0 %8356, %v1014_v61   ;;  %1040 = vperm.xlu1 %8357, %v1016_v62   ;;  %s2704_s25 = ssub.s32 0, %s8664_s16  ;;  %s8666_s13 = spop.drf %8665 }
 0x12b   : > { %7578 = vmatpush3.bf16.msra.mxu0 %v8362_v55  ;;  %s10799_s25 = smov (!%p2699_p9, %s2704_s25), %s8664_s16  ;;  %s777_s30 = ssub.s32 0, %s8666_s13  ;;  %7612 = vmatpush3.bf16.msra.mxu1 %v8378_v18 }
 0x12c   : > { %7579 = vmatprep.subr.bf16.mxu0 %v8715_v29  ;;  %s10801_s30 = smov (!%p772_p10, %s777_s30), %s8666_s13  ;;  %7613 = vmatprep.subr.bf16.mxu1 %v8380_v20  ;;  %s1147_s17 = sadd.s32 3, %s10805_s23 }
 0x12d   : > { %p6282_p11 = scmp.lt.s32.totalorder %s10801_s30, 0  ;;  %s783_s13 = sadd.s32 3, %s10801_s30 }
 0x12e   : > { %1050 = vperm.xlu1 %8357, %v1018_v0   ;;  %1045 = vperm.xlu0 %8356, %v1017_v2   ;;  %s10807_s17 = smov (!%p6321_p13, %s1147_s17), %s10805_s23  ;;  %p6547_p0 = scmp.lt.s32.totalorder %s10799_s25, 0 }
 0x12f   : > { %7580 = vmatpush3.bf16.msra.mxu0 %v8363_v56  ;;  %7614 = vmatpush3.bf16.msra.mxu1 %v8380_v20  ;;  %s10803_s13 = smov (!%p6282_p11, %s783_s13), %s10801_s30  ;;  %s7076_s0 = smul.u32 44, %s10807_s17 }
 0x130   : > { %7581 = vmatprep.subr.bf16.mxu0 %v8715_v29  ;;  %7615 = vmatprep.subr.bf16.mxu1 %v8382_v22  ;;  %s7075_s14 = smul.u32 44, %s10803_s13 }
 0x131   : > { %s9167_s27 = scalar_lea.vmem [#allocation2], %s7076_s0 }
 0x132   : > { %1060 = vperm.xlu1 %8357, %v1020_v3   ;;  %1055 = vperm.xlu0 %8356, %v1019_v5   ;;  %s9117_s30 = scalar_lea.vmem [#allocation2], %s7075_s14  ;;  %s2710_s14 = sadd.s32 3, %s10799_s25 }
 0x133   : > { %7582 = vmatpush3.bf16.msra.mxu0 %v8364_v60  ;;  %7616 = vmatpush3.bf16.msra.mxu1 %v8382_v22  ;;  %s10809_s14 = smov (!%p6547_p0, %s2710_s14), %s10799_s25 }
 0x134   : > { %7583 = vmatprep.subr.bf16.mxu0 %v8715_v29  ;;  %7617 = vmatprep.subr.bf16.mxu1 %v8384_v24  ;;  %s7077_s17 = smul.u32 44, %s10809_s14 }
 0x136   : > { %1070 = vperm.xlu1 %8357, %v1022_v63   ;;  %1065 = vperm.xlu0 %8356, %v1021_v10   ;;  %s9302_s26 = scalar_lea.vmem [#allocation2], %s7077_s17 }
 0x137   : > { %7584 = vmatpush3.bf16.msra.mxu0 %v8365_v1  ;;  %7618 = vmatpush3.bf16.msra.mxu1 %v8384_v24 }
 0x138   : > { %7653 = vmatprep.subr.bf16.mxu0 %v8371_v9  ;;  %7619 = vmatprep.subr.bf16.mxu1 %v8386_v30 }
 0x13a   : > { %7586 = vmatmul.mubr.bf16.vlgmr.msra.gmra.mxu0 %v8366_v4 }
 0x13b   : > { %7589 = vmatprep.mubr.msk.bf16.mxu0 %vm8716_vm1, %v8715_v29  ;;  %7654 = vmatpush3.bf16.msra.mxu0 %v8371_v9 }
 0x13c   : > { %7655 = vmatprep.subr.bf16.mxu0 %v8373_v13  ;;  %7620 = vmatpush3.bf16.msra.mxu1 %v8386_v30 }
 0x13d   : > { %7629 = vmatprep.subr.bf16.mxu1 %v9114_v34 }
 0x13f   : > { %7656 = vmatpush3.bf16.msra.mxu0 %v8373_v13 }
 0x140   : > { %7657 = vmatprep.subr.bf16.mxu0 %v8375_v15 }
 0x142   : > { %7590 = vmatmul.mubr.bf16.gmra.mxu0 %v8367_v11 }
 0x143   : > { %7593 = vmatprep.mubr.msk.bf16.mxu0 %vm8716_vm1, %v8715_v29  ;;  %7658 = vmatpush3.bf16.msra.mxu0 %v8375_v15 }
 0x144   : > { %7659 = vmatprep.subr.bf16.mxu0 %v8377_v17 }
 0x147   : > { %7660 = vmatpush3.bf16.msra.mxu0 %v8377_v17 }
 0x148   : > { %7661 = vmatprep.subr.bf16.mxu0 %v8379_v19 }
 0x14a   : > { %7594 = vmatmul.mubr.bf16.gmra.mxu0 %v8368_v6 }
 0x14b   : > { %7597 = vmatprep.mubr.msk.bf16.mxu0 %vm8716_vm1, %v8715_v29  ;;  %7662 = vmatpush3.bf16.msra.mxu0 %v8379_v19 }
 0x14c   : > { %7663 = vmatprep.subr.bf16.mxu0 %v8381_v21 }
 0x14f   : > { %7664 = vmatpush3.bf16.msra.mxu0 %v8381_v21 }
 0x150   : > { %7665 = vmatprep.subr.bf16.mxu0 %v8383_v23 }
 0x152   : > { %7598 = vmatmul.mubr.bf16.gmra.mxu0 %v8369_v7 }
 0x153   : > { %7601 = vmatprep.mubr.msk.bf16.mxu0 %vm8716_vm1, %v8715_v29  ;;  %7666 = vmatpush3.bf16.msra.mxu0 %v8383_v23 }
 0x154   : > { %7667 = vmatprep.subr.bf16.mxu0 %v8385_v25 }
 0x157   : > { %7668 = vmatpush3.bf16.msra.mxu0 %v8385_v25 }
 0x158   : > { %7701 = vmatprep.subr.bf16.mxu0 %v9108_v33 }
 0x15a   : > { %7602 = vmatmul.mubr.bf16.gmra.mxu0 %v8370_v8 }
 0x1a1   : > { %v1026_v38 = vpop.permute.xlu0 %1025  ;;  %v1036_v28 = vpop.permute.xlu1 %1035 }
 0x1a5   : > { %v1031_v47 = vpop.permute.xlu0 %1030  ;;  %v1041_v59 = vpop.permute.xlu1 %1040 }
 0x1a9   : > { %v1051_v11 = vpop.permute.xlu1 %1050  ;;  %v1046_v8 = vpop.permute.xlu0 %1045 }
 0x1ad   : > { %v1061_v22 = vpop.permute.xlu1 %1060  ;;  %v1056_v25 = vpop.permute.xlu0 %1055 }
 0x1fa   : > { %v929_v32 = vpop.f32.mrf.mxu0 }
 0x1fb   : > { %v975_v27 = vmul.f32 %v9122_v35, %v929_v32 }
 0x1fc   : > { %v7587_v26 = vpop.f32.mrf.mxu0 }
 0x1fd   : > { %v992_v39 = vadd.f32 %v9127_v36, %v975_v27 }
 0x1fe   : > { %v932_v40 = vpop.f32.mrf.mxu0 }
 0x1ff   : > { %v976_v42 = vmul.f32 %v9122_v35, %v932_v40  ;;  %v1002_v45 = vmax.f32 %v992_v39, 0.0 }
 0x200   : > { %v7588_v43 = vpop.f32.mrf.mxu0 }
 0x201   : > { %v993_v44 = vadd.f32 %v9127_v36, %v976_v42  ;;  %v1073_v51 = vmul.f32 %v1026_v38, %v1002_v45 }
 0x202   : > { %v937_v46 = vpop.f32.mrf.mxu0 }
 0x203   : > { %v977_v48 = vmul.f32 %v9122_v35, %v937_v46  ;;  %v1003_v49 = vmax.f32 %v993_v44, 0.0 }
 0x204   : > { %v7591_v50 = vpop.f32.mrf.mxu0 }
 0x205   : > { %v994_v53 = vadd.f32 %v9127_v36, %v977_v48  ;;  %v1074_v54 = vmul.f32 %v1031_v47, %v1003_v49  ;;  %v1071_v49 = vpop.permute.xlu1 %1070  ;;  %v1066_v50 = vpop.permute.xlu0 %1065 }
 0x206   : > { %v940_v29 = vpop.f32.mrf.mxu0 }
 0x207   : > { %v7109_v31 = vpack.c.bf16 %v1074_v54, %v1073_v51  ;;  %v978_v37 = vmul.f32 %v9122_v35, %v940_v29  ;;  %v1004_v52 = vmax.f32 %v994_v53, 0.0 }
 0x208   : > { %v7592_v41 = vpop.f32.mrf.mxu0 }
 0x209   : > { %7110 = vst [vmem:[%s9117_s30] sm:$0xff] %v7109_v31   ;;  %v995_v55 = vadd.f32 %v9127_v36, %v978_v37  ;;  %v1075_v61 = vmul.f32 %v1036_v28, %v1004_v52 }
 0x20a   : > { %v945_v56 = vpop.f32.mrf.mxu0 }
 0x20b   : > { %v1005_v57 = vmax.f32 %v995_v55, 0.0  ;;  %v979_v58 = vmul.f32 %v9122_v35, %v945_v56 }
 0x20c   : > { %v7595_v60 = vpop.f32.mrf.mxu0 }
 0x20d   : > { %v1076_v62 = vmul.f32 %v1041_v59, %v1005_v57  ;;  %v996_v0 = vadd.f32 %v9127_v36, %v979_v58 }
 0x20e   : > { %v948_v2 = vpop.f32.mrf.mxu0 }
 0x20f   : > { %v7114_v1 = vpack.c.bf16 %v1076_v62, %v1075_v61  ;;  %v980_v3 = vmul.f32 %v9122_v35, %v948_v2  ;;  %v1006_v4 = vmax.f32 %v996_v0, 0.0 }
 0x210   : > { %v7596_v5 = vpop.f32.mrf.mxu0  ;;  %v5130_v48 = vld [vmem:[%s9117_s30 + $0x4] sm:$0xc] }
 0x211   : > { %7162 = vst [vmem:[%s9117_s30 + $0x8] sm:$0xff] %v7114_v1   ;;  %v997_v63 = vadd.f32 %v9127_v36, %v980_v3  ;;  %v1077_v12 = vmul.f32 %v1046_v8, %v1006_v4 }
 0x212   : > { %v953_v10 = vpop.f32.mrf.mxu0 }
 0x213   : > { %v1007_v6 = vmax.f32 %v997_v63, 0.0  ;;  %v981_v7 = vmul.f32 %v9122_v35, %v953_v10  ;;  %v8394_v63 = vld [vmem:[%s10734_s5 + $0x130] sm:$0xff]  }
 0x214   : > { %v7599_v9 = vpop.f32.mrf.mxu0 }
 0x215   : > { %v1078_v13 = vmul.f32 %v1051_v11, %v1007_v6  ;;  %v998_v14 = vadd.f32 %v9127_v36, %v981_v7 }
 0x216   : > { %v956_v15 = vpop.f32.mrf.mxu0 }
 0x217   : > { %v7119_v16 = vpack.c.bf16 %v1078_v13, %v1077_v12  ;;  %v982_v17 = vmul.f32 %v9122_v35, %v956_v15  ;;  %v1008_v19 = vmax.f32 %v998_v14, 0.0 }
 0x218   : > { %v7600_v18 = vpop.f32.mrf.mxu0  ;;  %v4773_v45 = vld [vmem:[%s9117_s30 + $0x8] sm:$0xf] }
 0x219   : > { %7163 = vst [vmem:[%s9117_s30 + $0x10] sm:$0xff] %v7119_v16   ;;  %v999_v20 = vadd.f32 %v9127_v36, %v982_v17  ;;  %v1079_v32 = vmul.f32 %v1056_v25, %v1008_v19  ;;  %v6934_v51 = vcombine.low %v5130_v48, %v4773_v45 }
 0x21a   : > { %v961_v21 = vpop.f32.mrf.mxu0 }
 0x21b   : > { %v1009_v23 = vmax.f32 %v999_v20, 0.0  ;;  %v983_v24 = vmul.f32 %v9122_v35, %v961_v21  ;;  %v5151_v29 = vrot.slane %v6934_v51, 2 }
 0x21c   : > { %v7603_v30 = vpop.f32.mrf.mxu0 }
 0x21d   : > { %v1080_v27 = vmul.f32 %v1061_v22, %v1009_v23  ;;  %v1000_v26 = vadd.f32 %v9127_v36, %v983_v24 }
 0x21e   : > { %v964_v38 = vpop.f32.mrf.mxu0 }
 0x21f   : > { %v7124_v39 = vpack.c.bf16 %v1080_v27, %v1079_v32  ;;  %v984_v40 = vmul.f32 %v9122_v35, %v964_v38  ;;  %v1010_v43 = vmax.f32 %v1000_v26, 0.0  ;;  %v8395_v27 = vld [vmem:[%s10734_s5 + $0x30] sm:$0xff]  }
 0x220   : > { %v7604_v42 = vpop.f32.mrf.mxu0  ;;  %v8587_v47 = vld [vmem:[%s9117_s30 + $0xc] sm:$0xff]  }
 0x221   : > { %7164 = vst [vmem:[%s9117_s30 + $0x18] sm:$0xff] %v7124_v39   ;;  %v1001_v44 = vadd.f32 %v9127_v36, %v984_v40  ;;  %v1081_v53 = vmul.f32 %v1066_v50, %v1010_v43  ;;  %v5152_v28 = vrot.slane %v8587_v47, 2  ;;  %v8399_v50 = vld [vmem:[%s10734_s5 + $0x28] sm:$0xff]  }
 0x223   : > { %v1011_v46 = vmax.f32 %v1001_v44, 0.0  ;;  %v9164_v31 = vsel %vm2017_vm2, %v5151_v29, %v5152_v28  ;;  %v8396_v44 = vld [vmem:[%s10734_s5 + $0x128] sm:$0xff]  }
 0x225   : > { %v1082_v54 = vmul.f32 %v1071_v49, %v1011_v46 }
 0x227   : > { %v7129_v35 = vpack.c.bf16 %v1082_v54, %v1081_v53 }
 0x228   : > { %v9161_v36 = vld [vmem:[%s9117_s30 + $0x14] sm:$0xff]  }
 0x229   : > { %7165 = vst [vmem:[%s9117_s30 + $0x20] sm:$0xff] %v7129_v35   ;;  %v5154_v37 = vrot.slane %v9161_v36, 2  ;;  %v8400_v35 = vld [vmem:[%s10734_s5 + $0x120] sm:$0xff]   ;;  %v8434_v36 = vld [vmem:[%s10734_s5 + $0x178] sm:$0xff]  }
 0x22b   : > { %v9174_v55 = vsel %vm2017_vm2, %v5152_v28, %v5154_v37 }
 0x230   : > { %v1152_v41 = vld [vmem:[%s9167_s27] sm:$0xf]  ;;  %v1153_v52 = vld [vmem:[%s9167_s27 + $0x4] sm:$0xf]  ;;  %v9179_v57 = vld [vmem:[%s9167_s27 + $0x8] sm:$0xff]  }
 0x231   : > { %v9176_v56 = vcombine.low %v1152_v41, %v1153_v52  ;;  %v1483_v58 = vld [vmem:[%s9167_s27] sm:$0xe]  ;;  %v9183_v60 = vld [vmem:[%s9167_s27 + $0x10] sm:$0xff]   ;;  %v1506_v61 = vrot.slane %v9179_v57, 1  ;;  %v9187_v62 = vld [vmem:[%s9167_s27 + $0x18] sm:$0xf] }
 0x232   : > { %v6376_v59 = vcombine.low %v1483_v58, %v1153_v52  ;;  %v1176_v0 = vld [vmem:[%s9167_s27 + $0x1c] sm:$0x7]  ;;  %v1508_v3 = vrot.slane %v9183_v60, 1  ;;  %v1637_v10 = vld [vmem:[%s9167_s27 + $0x4] sm:$0xe]  ;;  %v9201_v11 = vld [vmem:[%s9167_s27 + $0xc] sm:$0xff]  }
 0x233   : > { %v1216_v2 = vshrl.u32 %v9176_v56, 16  ;;  %v9193_v5 = vcombine.low %v9187_v62, %v1176_v0  ;;  %v1218_v4 = vshll.u32 %v9176_v56, 16  ;;  %v1223_v6 = vshll.u32 %v9179_v57, 16  ;;  %v9208_v12 = vld [vmem:[%s9167_s27 + $0x8] sm:$0xf]  ;;  %v9230_v42 = vld [vmem:[%s9167_s27 + $0x10] sm:$0xff]  }
 0x234   : > { %v1505_v1 = vrot.slane %v6376_v59, 1  ;;  %v1227_v7 = vshrl.u32 %v9179_v57, 16  ;;  %v1231_v8 = vshll.u32 %v9183_v60, 16  ;;  %v1235_v9 = vshrl.u32 %v9183_v60, 16  ;;  %v9237_v47 = vld [vmem:[%s9167_s27 + $0x18] sm:$0xff]  }
 0x235   : > { %v1509_v14 = vsel %vm1504_vm4, %v1506_v61, %v1508_v3  ;;  %v1510_v15 = vrot.slane %v9193_v5, 1  ;;  %v1220_v16 = vrot.slane %v1218_v4, 1  ;;  %v1225_v17 = vrot.slane %v1223_v6, 1  ;;  %v9252_v53 = vld [vmem:[%s9167_s27 + $0x14] sm:$0xff]   ;;  %v1643_v54 = vld [vmem:[%s9167_s27 + $0x1c] sm:$0xf] }
 0x236   : > { %v1507_v13 = vsel %vm1504_vm4, %v1505_v1, %v1506_v61  ;;  %v1233_v18 = vrot.slane %v1231_v8, 1  ;;  %v1239_v19 = vshll.u32 %v9193_v5, 16  ;;  %v9215_v20 = vcombine.low %v1637_v10, %v9208_v12  ;;  %v1814_v29 = vld [vmem:[%s9167_s27 + $0x20] sm:$0xf]  ;;  %v8404_v8 = vld [vmem:[%s10734_s5 + $0x110] sm:$0xff]  }
 0x237   : > { %7669 = vmatprep.mubr.bf16.mxu0 %v1507_v13  ;;  %v1511_v21 = vsel %vm1504_vm4, %v1508_v3, %v1510_v15  ;;  %v1221_v22 = vor.u32 %v1220_v16, %v1216_v2  ;;  %v1845_v23 = vshrl.u32 %v9201_v11, 16  ;;  %v1848_v24 = vshll.u32 %v9201_v11, 16  ;;  %v1644_v52 = vld [vmem:[%s9167_s27 + $0x20] sm:$0x7] }
 0x238   : > { %7670 = vmatmul.mubr.bf16.vlgmr.msra.gmra.mxu0 %v1509_v14  ;;  %v1229_v25 = vor.u32 %v1227_v7, %v1225_v17  ;;  %v1237_v30 = vor.u32 %v1235_v9, %v1233_v18  ;;  %v1241_v32 = vrot.slane %v1239_v19, 1  ;;  %v1837_v26 = vshrl.u32 %v9215_v20, 16  ;;  %v8401_v61 = vld [vmem:[%s10734_s5 + $0x20] sm:$0xff]   ;;  %v8403_v7 = vld [vmem:[%s10734_s5 + $0x18] sm:$0xff]   ;;  %v9305_v14 = vld [vmem:[%s9302_s26 + $0x8] sm:$0xff]  }
 0x239   : > { %7702 = vmatpush3.bf16.msra.mxu0 %v9108_v33  ;;  %7673 = vmatprep.mubr.bf16.mxu0 %v1511_v21  ;;  %v1226_v38 = vsel %vm1214_vm3, %v1221_v22, %v1225_v17  ;;  %v1840_v39 = vshll.u32 %v9215_v20, 16  ;;  %v1847_v40 = vrot.slane %v1845_v23, 1  ;;  %v1850_v33 = vrot.slane %v1848_v24, 2  ;;  %v2715_v17 = vld [vmem:[%s9302_s26] sm:$0xf]  ;;  %v9326_v22 = vld [vmem:[%s9302_s26 + $0x10] sm:$0xff]  }
 0x23a   : > { %7703 = vmatprep.subr.bf16.mxu0 %v8394_v63  ;;  %7621 = vmatprep.mubr.bf16.mxu1 %v1226_v38  ;;  %v1234_v43 = vsel %vm1214_vm3, %v1229_v25, %v1233_v18  ;;  %v1839_v45 = vrot.slane %v1837_v26, 1  ;;  %v1242_v48 = vsel %vm1214_vm3, %v1237_v30, %v1241_v32  ;;  %v1243_v28 = vshrl.u32 %v9193_v5, 16  ;;  %v8402_v5 = vld [vmem:[%s10734_s5 + $0x118] sm:$0xff]   ;;  %v9317_v18 = vld [vmem:[%s9302_s26 + $0x4] sm:$0xf]  ;;  %v8405_v23 = vld [vmem:[%s10734_s5 + $0x10] sm:$0xff]  }
 0x23b   : > { %7622 = vmatmul.mubr.bf16.vlgmr.msra.gmra.mxu1 %v1234_v43  ;;  %v1842_v46 = vrot.slane %v1840_v39, 2  ;;  %v9246_v49 = vor.u32 %v1850_v33, %v1847_v40  ;;  %v2198_v41 = vrot.slane %v9237_v47, 2  ;;  %v9269_v0 = vcombine.low %v1643_v54, %v1814_v29  ;;  %v8406_v24 = vld [vmem:[%s10734_s5 + $0x108] sm:$0xff]   ;;  %v9341_v39 = vld [vmem:[%s9302_s26 + $0x18] sm:$0xf] }
 0x23c   : > { %7630 = vmatpush3.bf16.msra.mxu1 %v9114_v34  ;;  %7625 = vmatprep.mubr.bf16.mxu1 %v1242_v48  ;;  %v2196_v34 = vrot.slane %v9230_v42, 2  ;;  %v1245_v59 = vor.u32 %v1243_v28, %v1241_v32  ;;  %v10743_v1 = vrot.slane %v9252_v53, 1  ;;  %v6404_v3 = vcombine.low %v1643_v54, %v1644_v52  ;;  %v8438_v47 = vld [vmem:[%s10734_s5 + $0x228] sm:$0xff]  }
 0x23d   : > { %7704 = vmatpush3.bf16.msra.mxu0 %v8394_v63  ;;  %7631 = vmatprep.subr.bf16.mxu1 %v8395_v27  ;;  %v1843_v51 = vor.u32 %v1842_v46, %v1839_v45  ;;  %v1996_v63 = vld [vmem:[%s9167_s27 + $0x4] sm:$0xc]  ;;  %v2019_v10 = vrot.slane %v9201_v11, 2  ;;  %v2021_v13 = vrot.slane %v9252_v53, 2  ;;  %v9323_v21 = vcombine.low %v2715_v17, %v9317_v18  ;;  %v8407_v45 = vld [vmem:[%s10734_s5 + $0x8] sm:$0xff]  }
 0x23e   : > { %7705 = vmatprep.subr.bf16.mxu0 %v8396_v44  ;;  %v9276_v2 = vsel %vm2017_vm2, %v2196_v34, %v2198_v41  ;;  %v9282_v4 = vrot.slane %v6404_v3, 1  ;;  %v6454_v6 = vcombine.low %v1996_v63, %v9208_v12  ;;  %v10741_v12 = vrot.slane %v9269_v0, 2  ;;  %v8408_v46 = vld [vmem:[%s10734_s5 + $0x100] sm:$0xff]   ;;  %v8411_v63 = vld [vmem:[%s10734_s5 + $0x1b8] sm:$0xff]  }
 0x23f   : > { %v1852_v58 = vsel %vm1835_vm5, %v1843_v51, %v9246_v49  ;;  %v1854_v25 = vshrl.u32 %v9252_v53, 16  ;;  %v1857_v30 = vshll.u32 %v9252_v53, 16  ;;  %v2909_v32 = vshll.u32 %v9323_v21, 16 }
 0x240   : > { %7674 = vmatmul.mubr.bf16.gmra.mxu0 %v1510_v15  ;;  %7632 = vmatpush3.bf16.msra.mxu1 %v8395_v27  ;;  %v9298_v9 = vsel %vm1504_vm4, %v10743_v1, %v9282_v4  ;;  %v9308_v15 = vsel %vm2017_vm2, %v2019_v10, %v2021_v13  ;;  %v9313_v16 = vsel %vm2017_vm2, %v2021_v13, %v10741_v12  ;;  %v2914_v27 = vshll.u32 %v9305_v14, 16 }
 0x241   : > { %7706 = vmatpush3.bf16.msra.mxu0 %v8396_v44  ;;  %7717 = vmatprep.mubr.bf16.mxu0 %v1852_v58  ;;  %v1863_v26 = vshrl.u32 %v9269_v0, 16  ;;  %v1866_v38 = vshll.u32 %v9269_v0, 16  ;;  %v2907_v40 = vshrl.u32 %v9323_v21, 16  ;;  %v2911_v33 = vrot.slane %v2909_v32, 1  ;;  %v2885_v44 = vld [vmem:[%s9302_s26 + $0x1c] sm:$0x7] }
 0x242   : > { %7633 = vmatprep.subr.bf16.mxu1 %v8399_v50  ;;  %7707 = vmatprep.subr.bf16.mxu0 %v8400_v35  ;;  %v2922_v43 = vshll.u32 %v9326_v22, 16  ;;  %v1856_v48 = vrot.slane %v1854_v25, 1  ;;  %v9353_v51 = vcombine.low %v9341_v39, %v2885_v44  ;;  %v2926_v29 = vshrl.u32 %v9326_v22, 16  ;;  %v9393_v32 = vld [vmem:[%s9302_s26 + $0x8] sm:$0xf] }
 0x243   : > { %7626 = vmatmul.mubr.bf16.gmra.mxu1 %v1245_v59  ;;  %v2912_v54 = vor.u32 %v2911_v33, %v2907_v40  ;;  %v1865_v52 = vrot.slane %v1863_v26, 1  ;;  %v1868_v58 = vrot.slane %v1866_v38, 2  ;;  %v1682_v25 = vrot.slane %v9215_v20, 1  ;;  %v9401_v40 = vld [vmem:[%s9302_s26] sm:$0xe]  ;;  %v9405_v20 = vld [vmem:[%s9302_s26 + $0xc] sm:$0xff]  }
 0x244   : > { %7634 = vmatpush3.bf16.msra.mxu1 %v8399_v50  ;;  %7645 = vmatprep.mubr.bf16.mxu1 %v9176_v56  ;;  %v2018_v56 = vrot.slane %v6454_v6, 2  ;;  %v1859_v50 = vrot.slane %v1857_v30, 2  ;;  %v9357_v28 = vrot.slane %v2922_v43, 1  ;;  %v2930_v59 = vshll.u32 %v9353_v51, 16  ;;  %v3215_v30 = vld [vmem:[%s9302_s26 + $0x4] sm:$0xe] }
 0x245   : > { %7708 = vmatpush3.bf16.msra.mxu0 %v8400_v35  ;;  %7635 = vmatprep.subr.bf16.mxu1 %v8401_v61  ;;  %v9355_v35 = vrot.slane %v2914_v27, 1  ;;  %v10742_v38 = vrot.slane %v9201_v11, 1  ;;  %v3903_v33 = vld [vmem:[%s9302_s26 + $0x8] sm:$0xc]  ;;  %v9410_v44 = vld [vmem:[%s9302_s26 + $0xc] sm:$0xf] }
 0x246   : > { %7709 = vmatprep.subr.bf16.mxu0 %v8402_v5  ;;  %v9320_v19 = vsel %vm2017_vm2, %v2018_v56, %v2019_v10  ;;  %v2928_v3 = vor.u32 %v2926_v29, %v9357_v28  ;;  %v9372_v10 = vrot.slane %v2930_v59, 1  ;;  %v1860_v6 = vor.u32 %v1859_v50, %v1856_v48  ;;  %v8413_v56 = vld [vmem:[%s10734_s5 + $0xf8] sm:$0xff]   ;;  %v3392_v50 = vld [vmem:[%s9302_s26 + $0x20] sm:$0xf]  ;;  %v8420_v59 = vld [vmem:[%s10734_s5 + $0xe8] sm:$0xff]  }
 0x247   : > { %v9419_v48 = vld [vmem:[%s9302_s26 + $0x1c] sm:$0xf]  ;;  %v6749_v29 = vcombine.low %v3903_v33, %v9410_v44 }
 0x248   : > { %7636 = vmatpush3.bf16.msra.mxu1 %v8401_v61  ;;  %v9363_v61 = vsel %vm1214_vm3, %v2912_v54, %v9355_v35  ;;  %v9377_v13 = vsel %vm1214_vm3, %v2928_v3, %v9372_v10  ;;  %v1861_v17 = vsel %vm1835_vm5, %v9246_v49, %v1860_v6  ;;  %v8415_v49 = vld [vmem:[%s10734_s5 + $0xf0] sm:$0xff]   ;;  %v8416_v54 = vld [vmem:[%s10734_s5 + $0x1a8] sm:$0xff]   ;;  %v1684_v3 = vsel %vm1504_vm4, %v1682_v25, %v10742_v38 }
 0x249   : > { %7710 = vmatpush3.bf16.msra.mxu0 %v8402_v5  ;;  %7637 = vmatprep.subr.bf16.mxu1 %v8403_v7  ;;  %v8409_v5 = vld [vmem:[%s10734_s5] sm:$0xff]   ;;  %v9443_v42 = vcombine.low %v9419_v48, %v3392_v50 }
 0x24a   : > { %7711 = vmatprep.subr.bf16.mxu0 %v8404_v8 }
 0x24c   : > { %7638 = vmatpush3.bf16.msra.mxu1 %v8403_v7  ;;  %v1869_v7 = vor.u32 %v1868_v58, %v1865_v52 }
 0x24d   : > { %7712 = vmatpush3.bf16.msra.mxu0 %v8404_v8  ;;  %7639 = vmatprep.subr.bf16.mxu1 %v8405_v23  ;;  %v8417_v8 = vld [vmem:[%s9167_s27 + $0x8] sm:$0xfc]  }
 0x24e   : > { %7713 = vmatprep.subr.bf16.mxu0 %v8406_v24  ;;  %v1870_v27 = vsel %vm1835_vm5, %v1860_v6, %v1869_v7  ;;  %v2195_v26 = vrot.slane %v8417_v8, 2  ;;  %v9450_v6 = vld [vmem:[%s9302_s26 + $0x14] sm:$0xff]  }
 0x250   : > { %7640 = vmatpush3.bf16.msra.mxu1 %v8405_v23  ;;  %v8414_v23 = vld [vmem:[%s10734_s5 + $0x1b0] sm:$0xff]   ;;  %v2197_v52 = vsel %vm2017_vm2, %v2195_v26, %v2196_v34  ;;  %v3956_v34 = vshll.u32 %v6749_v29, 16  ;;  %v3425_v26 = vshll.u32 %v9405_v20, 16 }
 0x251   : > { %7714 = vmatpush3.bf16.msra.mxu0 %v8406_v24  ;;  %7641 = vmatprep.subr.bf16.mxu1 %v8407_v45  ;;  %v9388_v24 = vld [vmem:[%s9167_s27 + $0x1c] sm:$0x3] }
 0x252   : > { %7715 = vmatprep.subr.bf16.mxu0 %v8408_v46  ;;  %v6351_v58 = vcombine.low %v9187_v62, %v9388_v24  ;;  %v3953_v62 = vshrl.u32 %v6749_v29, 16  ;;  %v9457_v24 = vld [vmem:[%s9302_s26 + $0x20] sm:$0xff]   ;;  %v3427_v12 = vrot.slane %v3425_v26, 2  ;;  %v3434_v26 = vshll.u32 %v9450_v6, 16 }
 0x254   : > { %7642 = vmatpush3.bf16.msra.mxu1 %v8407_v45  ;;  %v9413_v45 = vld [vmem:[%s9302_s26 + $0x10] sm:$0xff]   ;;  %v3955_v25 = vrot.slane %v3953_v62, 2  ;;  %v8422_v62 = vld [vmem:[%s10734_s5 + $0xe0] sm:$0xff]  }
 0x255   : > { %7716 = vmatpush3.bf16.msra.mxu0 %v8408_v46  ;;  %7643 = vmatprep.subr.bf16.mxu1 %v8409_v5  ;;  %v9416_v46 = vcombine.low %v3215_v30, %v9393_v32  ;;  %v3958_v30 = vrot.slane %v3956_v34, 3 }
 0x256   : > { %7749 = vmatprep.subr.bf16.mxu0 %v8411_v63 }
 0x257   : > { %v3414_v8 = vshrl.u32 %v9416_v46, 16  ;;  %v3959_v43 = vor.u32 %v3958_v30, %v3955_v25 }
 0x258   : > { %7718 = vmatmul.mubr.bf16.vlgmr.msra.gmra.mxu0 %v1861_v17  ;;  %7644 = vmatpush3.bf16.msra.mxu1 %v8409_v5  ;;  %v3961_v5 = vshrl.u32 %v9413_v45, 16  ;;  %v3422_v17 = vshrl.u32 %v9405_v20, 16 }
 0x259   : > { %7721 = vmatprep.mubr.bf16.mxu0 %v1870_v27  ;;  %7750 = vmatpush3.bf16.msra.mxu0 %v8411_v63  ;;  %v9447_v63 = vld [vmem:[%s9302_s26 + $0x18] sm:$0xff]   ;;  %v3416_v33 = vrot.slane %v3414_v8, 1 }
 0x25a   : > { %7677 = vmatprep.subr.bf16.mxu1 %v8413_v56  ;;  %7751 = vmatprep.subr.bf16.mxu0 %v8414_v23  ;;  %v3963_v27 = vrot.slane %v3961_v5, 2  ;;  %v3424_v29 = vrot.slane %v3422_v17, 1  ;;  %v3970_v38 = vshrl.u32 %v9447_v63, 16  ;;  %v3973_v1 = vshll.u32 %v9447_v63, 16 }
 0x25b   : > { %7646 = vmatmul.mubr.bf16.vlgmr.msra.gmra.mxu1 %v9179_v57  ;;  %v8421_v57 = vld [vmem:[%s10734_s5 + $0x1a0] sm:$0xff]   ;;  %v3979_v5 = vshrl.u32 %v9457_v24, 16  ;;  %v3431_v17 = vshrl.u32 %v9450_v6, 16 }
 0x25c   : > { %7649 = vmatprep.mubr.bf16.mxu1 %v9183_v60  ;;  %7678 = vmatpush3.bf16.msra.mxu1 %v8413_v56  ;;  %v3964_v60 = vshll.u32 %v9413_v45, 16  ;;  %v3417_v56 = vshll.u32 %v9416_v46, 16  ;;  %v3428_v8 = vor.u32 %v3427_v12, %v3424_v29  ;;  %v3440_v12 = vshrl.u32 %v9443_v42, 16 }
 0x25d   : > { %7752 = vmatpush3.bf16.msra.mxu0 %v8414_v23  ;;  %7679 = vmatprep.subr.bf16.mxu1 %v8415_v49  ;;  %v3981_v30 = vrot.slane %v3979_v5, 2 }
 0x25e   : > { %7753 = vmatprep.subr.bf16.mxu0 %v8416_v54  ;;  %v3966_v23 = vrot.slane %v3964_v60, 3  ;;  %v3419_v50 = vrot.slane %v3417_v56, 2  ;;  %v3982_v60 = vshll.u32 %v9457_v24, 16  ;;  %v3972_v56 = vrot.slane %v3970_v38, 2 }
 0x260   : > { %7722 = vmatmul.mubr.bf16.gmra.mxu0 %v1869_v7  ;;  %7680 = vmatpush3.bf16.msra.mxu1 %v8415_v49  ;;  %v3967_v7 = vor.u32 %v3966_v23, %v3963_v27  ;;  %v3420_v34 = vor.u32 %v3419_v50, %v3416_v33  ;;  %v8541_v49 = vld [vmem:[%s9302_s26 + $0x28] ss:$0 sps:$4 sm:$0x11]   ;;  %v3984_v27 = vrot.slane %v3982_v60, 3  ;;  %v3433_v50 = vrot.slane %v3431_v17, 1 }
 0x261   : > { %7765 = vmatprep.mubr.bf16.mxu0 %v2197_v52  ;;  %7754 = vmatpush3.bf16.msra.mxu0 %v8416_v54  ;;  %v8423_v52 = vld [vmem:[%s10734_s5 + $0x198] sm:$0xff]   ;;  %v3975_v54 = vrot.slane %v3973_v1, 3  ;;  %v3988_v29 = vshll.u32 %v8541_v49, 16  ;;  %v8427_v17 = vld [vmem:[%s10734_s5 + $0x188] sm:$0xff]  }
 0x262   : > { %7681 = vmatprep.subr.bf16.mxu1 %v8420_v59  ;;  %7755 = vmatprep.subr.bf16.mxu0 %v8421_v57  ;;  %v9473_v25 = vsel %vm2376_vm6, %v3959_v43, %v3967_v7  ;;  %v9477_v23 = vsel %vm1835_vm5, %v3420_v34, %v3428_v8  ;;  %v8424_v1 = vld [vmem:[%s10734_s5 + $0xd8] sm:$0xff]   ;;  %v3985_v38 = vor.u32 %v3984_v27, %v3981_v30  ;;  %v3436_v43 = vrot.slane %v3434_v26, 2 }
 0x263   : > { %7650 = vmatmul.mubr.bf16.gmra.mxu1 %v6351_v58  ;;  %v3976_v33 = vor.u32 %v3975_v54, %v3972_v56  ;;  %v3443_v58 = vshll.u32 %v9443_v42, 16  ;;  %v3990_v56 = vrot.slane %v3988_v29, 3  ;;  %v4139_v54 = vrot.slane %v9413_v45, 3  ;;  %v4117_v45 = vld [vmem:[%s9302_s26 + $0x8] sm:$0x8] }
 0x264   : > { %7682 = vmatpush3.bf16.msra.mxu1 %v8420_v59  ;;  %7693 = vmatprep.mubr.bf16.mxu1 %v1684_v3  ;;  %v8425_v59 = vld [vmem:[%s10734_s5 + $0x190] sm:$0xff]   ;;  %v3437_v5 = vor.u32 %v3436_v43, %v3433_v50  ;;  %v6778_v26 = vcombine.low %v4117_v45, %v9410_v44  ;;  %v4145_v43 = vrot.slane %v8541_v49, 3  ;;  %v8428_v44 = vld [vmem:[%s10734_s5 + $0xc8] sm:$0xff]  }
 0x265   : > { %7756 = vmatpush3.bf16.msra.mxu0 %v8421_v57  ;;  %7683 = vmatprep.subr.bf16.mxu1 %v8422_v62  ;;  %v9488_v3 = vsel %vm2376_vm6, %v3967_v7, %v3976_v33  ;;  %v3442_v57 = vrot.slane %v3440_v12, 1  ;;  %v9491_v34 = vsel %vm2376_vm6, %v3976_v33, %v3985_v38  ;;  %v3445_v60 = vrot.slane %v3443_v58, 2  ;;  %v8426_v7 = vld [vmem:[%s10734_s5 + $0xd0] sm:$0xff]   ;;  %v4949_v33 = vld [vmem:[%s9117_s30 + $0x20] sm:$0xf] }
 0x266   : > { %7757 = vmatprep.subr.bf16.mxu0 %v8423_v52  ;;  %v9501_v30 = vsel %vm1835_vm5, %v3428_v8, %v3437_v5  ;;  %v4143_v8 = vrot.slane %v9457_v24, 3  ;;  %v4138_v58 = vrot.slane %v6778_v26, 3  ;;  %v8429_v24 = vld [vmem:[%s10734_s5 + $0x180] sm:$0xff]  }
 0x267   : > { %v9503_v27 = vor.u32 %v3445_v60, %v3442_v57 }
 0x268   : > { %7684 = vmatpush3.bf16.msra.mxu1 %v8422_v62  ;;  %v9506_v62 = vsel %vm2376_vm6, %v3985_v38, %v3990_v56  ;;  %v4778_v38 = vld [vmem:[%s9117_s30 + $0x1c] sm:$0xf]  ;;  %v9530_v57 = vsel %vm2563_vm7, %v4143_v8, %v4145_v43  ;;  %v9536_v49 = vsel %vm2563_vm7, %v4138_v58, %v4139_v54  ;;  %v10749_v43 = vrot.slane %v9201_v11, 1  ;;  %v8442_v11 = vld [vmem:[%s10734_s5 + $0x168] sm:$0xff]  }
 0x269   : > { %7758 = vmatpush3.bf16.msra.mxu0 %v8423_v52  ;;  %7685 = vmatprep.subr.bf16.mxu1 %v8424_v1  ;;  %v4141_v52 = vrot.slane %v9447_v63, 3  ;;  %v9514_v50 = vsel %vm1835_vm5, %v3437_v5, %v9503_v27  ;;  %v9521_v29 = vcombine.low %v4778_v38, %v4949_v33  ;;  %v8430_v5 = vld [vmem:[%s10734_s5 + $0xc0] sm:$0xff]   ;;  %v8432_v56 = vld [vmem:[%s10734_s5 + $0x238] sm:$0xff]   ;;  %v8437_v33 = vld [vmem:[%s10734_s5 + $0x170] sm:$0xff]  }
 0x26a   : > { %7759 = vmatprep.subr.bf16.mxu0 %v8425_v59 }
 0x26b   : > { %v9517_v12 = vsel %vm2563_vm7, %v4139_v54, %v4141_v52  ;;  %v9527_v63 = vsel %vm2563_vm7, %v4141_v52, %v4143_v8  ;;  %v9568_v52 = vld [vmem:[%s9167_s27 + $0x10] sm:$0xff]   ;;  %v10748_v8 = vrot.slane %v9252_v53, 1  ;;  %v8443_v53 = vld [vmem:[%s10734_s5 + $0x220] sm:$0xff]  }
 0x26c   : > { %7686 = vmatpush3.bf16.msra.mxu1 %v8424_v1  ;;  %v5156_v1 = vrot.slane %v9521_v29, 2  ;;  %v2565_v38 = vrot.slane %v9568_v52, 3 }
 0x26d   : > { %7760 = vmatpush3.bf16.msra.mxu0 %v8425_v59  ;;  %7687 = vmatprep.subr.bf16.mxu1 %v8426_v7  ;;  %v8433_v59 = vld [vmem:[%s9167_s27 + $0x20] sm:$0xff]  }
 0x26e   : > { %7761 = vmatprep.subr.bf16.mxu0 %v8427_v17  ;;  %v9548_v60 = vsel %vm2017_vm2, %v5154_v37, %v5156_v1  ;;  %v2200_v54 = vrot.slane %v8433_v59, 2  ;;  %v8435_v37 = vld [vmem:[%s10734_s5 + $0x230] sm:$0xff]  }
 0x26f   : > { %v8448_v59 = vld [vmem:[%s10734_s5 + $0x210] sm:$0xff]  }
 0x270   : > { %7688 = vmatpush3.bf16.msra.mxu1 %v8426_v7  ;;  %v9554_v7 = vld [vmem:[%s9167_s27 + $0xc] sm:$0xf]  ;;  %v2201_v45 = vsel %vm2017_vm2, %v2198_v41, %v2200_v54 }
 0x271   : > { %7762 = vmatpush3.bf16.msra.mxu0 %v8427_v17  ;;  %7689 = vmatprep.subr.bf16.mxu1 %v8428_v44  ;;  %v2542_v17 = vld [vmem:[%s9167_s27 + $0x8] sm:$0x8] }
 0x272   : > { %7763 = vmatprep.subr.bf16.mxu0 %v8429_v24  ;;  %v6536_v26 = vcombine.low %v2542_v17, %v9554_v7  ;;  %v2327_v17 = vld [vmem:[%s9167_s27 + $0x8] sm:$0xc] }
 0x274   : > { %7690 = vmatpush3.bf16.msra.mxu1 %v8428_v44  ;;  %v2564_v41 = vrot.slane %v6536_v26, 3  ;;  %v8446_v44 = vld [vmem:[%s10734_s5 + $0x218] sm:$0xff]  }
 0x275   : > { %7764 = vmatpush3.bf16.msra.mxu0 %v8429_v24  ;;  %7691 = vmatprep.subr.bf16.mxu1 %v8430_v5  ;;  %v8447_v24 = vld [vmem:[%s10734_s5 + $0x158] sm:$0xff]  }
 0x276   : > { %7797 = vmatprep.subr.bf16.mxu0 %v8432_v56  ;;  %v2566_v58 = vsel %vm2563_vm7, %v2564_v41, %v2565_v38  ;;  %v8455_v26 = vld [vmem:[%s10734_s5 + $0x2b8] sm:$0xff]   ;;  %v9641_v41 = vld [vmem:[%s9167_s27 + $0x28] ss:$0 sps:$4 sm:$0x11]  }
 0x278   : > { %7766 = vmatmul.mubr.bf16.vlgmr.msra.gmra.mxu0 %v9276_v2  ;;  %7692 = vmatpush3.bf16.msra.mxu1 %v8430_v5  ;;  %v1686_v2 = vsel %vm1504_vm4, %v10749_v43, %v10748_v8  ;;  %v8451_v5 = vld [vmem:[%s10734_s5 + $0x148] sm:$0xff]  }
 0x279   : > { %7769 = vmatprep.mubr.bf16.mxu0 %v2201_v45  ;;  %7798 = vmatpush3.bf16.msra.mxu0 %v8432_v56  ;;  %v8452_v56 = vld [vmem:[%s10734_s5 + $0x200] sm:$0xff]  }
 0x27a   : > { %7725 = vmatprep.subr.bf16.mxu1 %v8434_v36  ;;  %7799 = vmatprep.subr.bf16.mxu0 %v8435_v37 }
 0x27b   : > { %7694 = vmatmul.mubr.bf16.vlgmr.msra.gmra.mxu1 %v1686_v2  ;;  %v8457_v2 = vld [vmem:[%s10734_s5 + $0x1f8] sm:$0xff]  }
 0x27c   : > { %7697 = vmatprep.mubr.bf16.mxu1 %v9298_v9  ;;  %7726 = vmatpush3.bf16.msra.mxu1 %v8434_v36  ;;  %v8445_v9 = vld [vmem:[%s10734_s5 + $0x160] sm:$0xff]  }
 0x27d   : > { %7800 = vmatpush3.bf16.msra.mxu0 %v8435_v37  ;;  %7727 = vmatprep.subr.bf16.mxu1 %v8437_v33  ;;  %v9622_v36 = vld [vmem:[%s9167_s27 + $0x20] sm:$0xff]  }
 0x27e   : > { %7801 = vmatprep.subr.bf16.mxu0 %v8438_v47  ;;  %v8453_v37 = vld [vmem:[%s10734_s5 + $0x140] sm:$0xff]   ;;  %v2569_v8 = vrot.slane %v9622_v36, 3 }
 0x280   : > { %7770 = vmatmul.mubr.bf16.gmra.mxu0 %v2200_v54  ;;  %7728 = vmatpush3.bf16.msra.mxu1 %v8437_v33  ;;  %v9618_v54 = vld [vmem:[%s9167_s27 + $0x18] sm:$0xff]   ;;  %v6507_v33 = vcombine.low %v2327_v17, %v9554_v7 }
 0x281   : > { %7802 = vmatpush3.bf16.msra.mxu0 %v8438_v47  ;;  %7813 = vmatprep.mubr.bf16.mxu0 %v2566_v58  ;;  %v2567_v45 = vrot.slane %v9618_v54, 3  ;;  %v8458_v47 = vld [vmem:[%s10734_s5 + $0x2b0] sm:$0xff]   ;;  %v2389_v58 = vshll.u32 %v9568_v52, 16 }
 0x282   : > { %7729 = vmatprep.subr.bf16.mxu1 %v8442_v11  ;;  %7803 = vmatprep.subr.bf16.mxu0 %v8443_v53  ;;  %v2381_v7 = vshll.u32 %v6507_v33, 16 }
 0x283   : > { %7698 = vmatmul.mubr.bf16.gmra.mxu1 %v9282_v4  ;;  %v8449_v4 = vld [vmem:[%s10734_s5 + $0x150] sm:$0xff]   ;;  %v2568_v43 = vsel %vm2563_vm7, %v2565_v38, %v2567_v45  ;;  %v2570_v38 = vsel %vm2563_vm7, %v2567_v45, %v2569_v8  ;;  %v8467_v45 = vld [vmem:[%s10734_s5 + $0x298] sm:$0xff]  }
 0x284   : > { %7730 = vmatpush3.bf16.msra.mxu1 %v8442_v11  ;;  %7741 = vmatprep.mubr.bf16.mxu1 %v9320_v19  ;;  %v8450_v19 = vld [vmem:[%s10734_s5 + $0x208] sm:$0xff]   ;;  %v2378_v11 = vshrl.u32 %v6507_v33, 16 }
 0x285   : > { %7804 = vmatpush3.bf16.msra.mxu0 %v8443_v53  ;;  %7731 = vmatprep.subr.bf16.mxu1 %v8445_v9  ;;  %v2386_v53 = vshrl.u32 %v9568_v52, 16 }
 0x286   : > { %7805 = vmatprep.subr.bf16.mxu0 %v8446_v44  ;;  %v2380_v52 = vrot.slane %v2378_v11, 2  ;;  %v2395_v11 = vshrl.u32 %v9618_v54, 16 }
 0x288   : > { %7732 = vmatpush3.bf16.msra.mxu1 %v8445_v9  ;;  %v8459_v9 = vld [vmem:[%s10734_s5 + $0x1f0] sm:$0xff]  }
 0x289   : > { %7806 = vmatpush3.bf16.msra.mxu0 %v8446_v44  ;;  %7733 = vmatprep.subr.bf16.mxu1 %v8447_v24  ;;  %v2571_v44 = vrot.slane %v9641_v41, 3 }
 0x28a   : > { %7807 = vmatprep.subr.bf16.mxu0 %v8448_v59 }
 0x28c   : > { %7734 = vmatpush3.bf16.msra.mxu1 %v8447_v24  ;;  %v8461_v24 = vld [vmem:[%s10734_s5 + $0x2a8] sm:$0xff]  }
 0x28d   : > { %7808 = vmatpush3.bf16.msra.mxu0 %v8448_v59  ;;  %7735 = vmatprep.subr.bf16.mxu1 %v8449_v4  ;;  %v2383_v59 = vrot.slane %v2381_v7, 3  ;;  %v2398_v7 = vshll.u32 %v9618_v54, 16 }
 0x28e   : > { %7809 = vmatprep.subr.bf16.mxu0 %v8450_v19 }
 0x28f   : > { %v2384_v17 = vor.u32 %v2383_v59, %v2380_v52  ;;  %v2400_v54 = vrot.slane %v2398_v7, 3  ;;  %v8492_v7 = vld [vmem:[%s10734_s5 + $0x248] sm:$0xff]  }
 0x290   : > { %7736 = vmatpush3.bf16.msra.mxu1 %v8449_v4  ;;  %v2388_v4 = vrot.slane %v2386_v53, 2  ;;  %v2404_v53 = vshrl.u32 %v9622_v36, 16 }
 0x291   : > { %7810 = vmatpush3.bf16.msra.mxu0 %v8450_v19  ;;  %7737 = vmatprep.subr.bf16.mxu1 %v8451_v5  ;;  %v2391_v19 = vrot.slane %v2389_v58, 3  ;;  %v2407_v58 = vshll.u32 %v9622_v36, 16 }
 0x292   : > { %7811 = vmatprep.subr.bf16.mxu0 %v8452_v56  ;;  %v2406_v59 = vrot.slane %v2404_v53, 2  ;;  %v3222_v53 = vld [vmem:[%s9302_s26 + $0x20] sm:$0x7] }
 0x293   : > { %v2409_v36 = vrot.slane %v2407_v58, 3  ;;  %v8493_v58 = vld [vmem:[%s10734_s5 + $0x300] sm:$0xff]  }
 0x294   : > { %7738 = vmatpush3.bf16.msra.mxu1 %v8451_v5  ;;  %v8464_v5 = vld [vmem:[%s10734_s5 + $0x1e8] sm:$0xff]  }
 0x295   : > { %7812 = vmatpush3.bf16.msra.mxu0 %v8452_v56  ;;  %7739 = vmatprep.subr.bf16.mxu1 %v8453_v37  ;;  %v8465_v56 = vld [vmem:[%s10734_s5 + $0x2a0] sm:$0xff]  }
 0x296   : > { %7845 = vmatprep.subr.bf16.mxu0 %v8455_v26 }
 0x298   : > { %7814 = vmatmul.mubr.bf16.vlgmr.msra.gmra.mxu0 %v2568_v43  ;;  %7740 = vmatpush3.bf16.msra.mxu1 %v8453_v37  ;;  %v2392_v37 = vor.u32 %v2391_v19, %v2388_v4  ;;  %v8471_v43 = vld [vmem:[%s10734_s5 + $0x288] sm:$0xff]   ;;  %v8478_v19 = vld [vmem:[%s10734_s5 + $0x278] sm:$0xff]  }
 0x299   : > { %7817 = vmatprep.mubr.bf16.mxu0 %v2570_v38  ;;  %7846 = vmatpush3.bf16.msra.mxu0 %v8455_v26  ;;  %v10750_v26 = vrot.slane %v9269_v0, 2  ;;  %v8470_v0 = vld [vmem:[%s10734_s5 + $0x1d0] sm:$0xff]   ;;  %v2918_v38 = vshrl.u32 %v9305_v14, 16 }
 0x29a   : > { %7773 = vmatprep.subr.bf16.mxu1 %v8457_v2  ;;  %7847 = vmatprep.subr.bf16.mxu0 %v8458_v47  ;;  %v2393_v33 = vsel %vm2376_vm6, %v2384_v17, %v2392_v37 }
 0x29b   : > { %7742 = vmatmul.mubr.bf16.vlgmr.msra.gmra.mxu1 %v9308_v15  ;;  %v2572_v15 = vsel %vm2563_vm7, %v2569_v8, %v2571_v44  ;;  %v8469_v8 = vld [vmem:[%s10734_s5 + $0x290] sm:$0xff]   ;;  %v8476_v44 = vld [vmem:[%s10734_s5 + $0x338] sm:$0xff]   ;;  %v2920_v52 = vor.u32 %v2918_v38, %v9355_v35  ;;  %v6646_v38 = vcombine.low %v9419_v48, %v3222_v53 }
 0x29c   : > { %7745 = vmatprep.mubr.bf16.mxu1 %v9313_v16  ;;  %7774 = vmatpush3.bf16.msra.mxu1 %v8457_v2  ;;  %v8466_v16 = vld [vmem:[%s10734_s5 + $0x1e0] sm:$0xff]   ;;  %v8472_v2 = vld [vmem:[%s10734_s5 + $0x1c8] sm:$0xff]   ;;  %v8480_v35 = vld [vmem:[%s10734_s5 + $0x270] sm:$0xff]  }
 0x29d   : > { %7848 = vmatpush3.bf16.msra.mxu0 %v8458_v47  ;;  %7775 = vmatprep.subr.bf16.mxu1 %v8459_v9  ;;  %v8473_v47 = vld [vmem:[%s10734_s5 + $0x280] sm:$0xff]   ;;  %v8499_v48 = vld [vmem:[%s10734_s5 + $0x2f8] sm:$0xff]  }
 0x29e   : > { %7849 = vmatprep.subr.bf16.mxu0 %v8461_v24 }
 0x2a0   : > { %7818 = vmatmul.mubr.bf16.gmra.mxu0 %v2572_v15  ;;  %7776 = vmatpush3.bf16.msra.mxu1 %v8459_v9  ;;  %v8474_v9 = vld [vmem:[%s10734_s5 + $0x1c0] sm:$0xff]   ;;  %v2410_v15 = vor.u32 %v2409_v36, %v2406_v59  ;;  %v8500_v59 = vld [vmem:[%s10734_s5 + $0x3b0] sm:$0xff]  }
 0x2a1   : > { %7850 = vmatpush3.bf16.msra.mxu0 %v8461_v24  ;;  %7861 = vmatprep.mubr.bf16.mxu0 %v9363_v61  ;;  %v8468_v61 = vld [vmem:[%s10734_s5 + $0x1d8] sm:$0xff]   ;;  %v2397_v24 = vrot.slane %v2395_v11, 2  ;;  %v8490_v11 = vld [vmem:[%s10734_s5 + $0x250] sm:$0xff]  }
 0x2a2   : > { %7777 = vmatprep.subr.bf16.mxu1 %v8464_v5  ;;  %7851 = vmatprep.subr.bf16.mxu0 %v8465_v56 }
 0x2a3   : > { %7746 = vmatmul.mubr.bf16.gmra.mxu1 %v10750_v26  ;;  %v2401_v4 = vor.u32 %v2400_v54, %v2397_v24  ;;  %v3261_v26 = vrot.slane %v9405_v20, 1  ;;  %v3263_v24 = vrot.slane %v9450_v6, 1  ;;  %v3265_v54 = vrot.slane %v6646_v38, 1 }
 0x2a4   : > { %7778 = vmatpush3.bf16.msra.mxu1 %v8464_v5  ;;  %7789 = vmatprep.mubr.bf16.mxu1 %v2393_v33  ;;  %v8479_v5 = vld [vmem:[%s10734_s5 + $0x330] sm:$0xff]   ;;  %v2413_v33 = vshll.u32 %v9641_v41, 16 }
 0x2a5   : > { %7852 = vmatpush3.bf16.msra.mxu0 %v8465_v56  ;;  %7779 = vmatprep.subr.bf16.mxu1 %v8466_v16  ;;  %v2925_v56 = vsel %vm1214_vm3, %v2920_v52, %v9357_v28  ;;  %v2402_v17 = vsel %vm2376_vm6, %v2392_v37, %v2401_v4  ;;  %v2411_v28 = vsel %vm2376_vm6, %v2401_v4, %v2410_v15  ;;  %v3573_v52 = vld [vmem:[%s9302_s26 + $0x4] sm:$0xc] }
 0x2a6   : > { %7853 = vmatprep.subr.bf16.mxu0 %v8467_v45  ;;  %v3264_v36 = vsel %vm1504_vm4, %v3261_v26, %v3263_v24  ;;  %v3266_v4 = vsel %vm1504_vm4, %v3263_v24, %v3265_v54 }
 0x2a8   : > { %7780 = vmatpush3.bf16.msra.mxu1 %v8466_v16  ;;  %v8481_v16 = vld [vmem:[%s10734_s5 + $0x328] sm:$0xff]  }
 0x2a9   : > { %7854 = vmatpush3.bf16.msra.mxu0 %v8467_v45  ;;  %7781 = vmatprep.subr.bf16.mxu1 %v8468_v61  ;;  %v3260_v45 = vrot.slane %v9416_v46, 1 }
 0x2aa   : > { %7855 = vmatprep.subr.bf16.mxu0 %v8469_v8 }
 0x2ab   : > { %v3262_v46 = vsel %vm1504_vm4, %v3260_v45, %v3261_v26  ;;  %v8508_v26 = vld [vmem:[%s10734_s5 + $0x2e0] sm:$0xff]  }
 0x2ac   : > { %7782 = vmatpush3.bf16.msra.mxu1 %v8468_v61  ;;  %v8484_v61 = vld [vmem:[%s10734_s5 + $0x268] sm:$0xff]  }
 0x2ad   : > { %7856 = vmatpush3.bf16.msra.mxu0 %v8469_v8  ;;  %7783 = vmatprep.subr.bf16.mxu1 %v8470_v0  ;;  %v8485_v8 = vld [vmem:[%s10734_s5 + $0x320] sm:$0xff]  }
 0x2ae   : > { %7857 = vmatprep.subr.bf16.mxu0 %v8471_v43 }
 0x2b0   : > { %7784 = vmatpush3.bf16.msra.mxu1 %v8470_v0  ;;  %v2415_v0 = vrot.slane %v2413_v33, 3  ;;  %v8512_v33 = vld [vmem:[%s10734_s5 + $0x2d0] sm:$0xff]  }
 0x2b1   : > { %7858 = vmatpush3.bf16.msra.mxu0 %v8471_v43  ;;  %7785 = vmatprep.subr.bf16.mxu1 %v8472_v2  ;;  %v8487_v43 = vld [vmem:[%s10734_s5 + $0x318] sm:$0xff]  }
 0x2b2   : > { %7859 = vmatprep.subr.bf16.mxu0 %v8473_v47  ;;  %v2416_v41 = vsel %vm2376_vm6, %v2410_v15, %v2415_v0  ;;  %v8517_v0 = vld [vmem:[%s10734_s5 + $0x438] sm:$0xff]  }
 0x2b4   : > { %7786 = vmatpush3.bf16.msra.mxu1 %v8472_v2  ;;  %v8488_v2 = vld [vmem:[%s10734_s5 + $0x258] sm:$0xff]  }
 0x2b5   : > { %7860 = vmatpush3.bf16.msra.mxu0 %v8473_v47  ;;  %7787 = vmatprep.subr.bf16.mxu1 %v8474_v9  ;;  %v8489_v47 = vld [vmem:[%s10734_s5 + $0x310] sm:$0xff]  }
 0x2b6   : > { %7893 = vmatprep.subr.bf16.mxu0 %v8476_v44 }
 0x2b8   : > { %7862 = vmatmul.mubr.bf16.vlgmr.msra.gmra.mxu0 %v2925_v56  ;;  %7788 = vmatpush3.bf16.msra.mxu1 %v8474_v9  ;;  %v8494_v9 = vld [vmem:[%s10734_s5 + $0x240] sm:$0xff]   ;;  %v8502_v56 = vld [vmem:[%s10734_s5 + $0x3a8] sm:$0xff]  }
 0x2b9   : > { %7865 = vmatprep.mubr.bf16.mxu0 %v9377_v13  ;;  %7894 = vmatpush3.bf16.msra.mxu0 %v8476_v44  ;;  %v2934_v13 = vshrl.u32 %v9353_v51, 16  ;;  %v8496_v44 = vld [vmem:[%s10734_s5 + $0x3b8] sm:$0xff]  }
 0x2ba   : > { %7821 = vmatprep.subr.bf16.mxu1 %v8478_v19  ;;  %7895 = vmatprep.subr.bf16.mxu0 %v8479_v5 }
 0x2bb   : > { %7790 = vmatmul.mubr.bf16.vlgmr.msra.gmra.mxu1 %v2402_v17  ;;  %v2936_v37 = vor.u32 %v2934_v13, %v9372_v10  ;;  %v8486_v10 = vld [vmem:[%s10734_s5 + $0x260] sm:$0xff]   ;;  %v8505_v17 = vld [vmem:[%s10734_s5 + $0x2e8] sm:$0xff]   ;;  %v3084_v13 = vrot.slane %v9305_v14, 1 }
 0x2bc   : > { %7793 = vmatprep.mubr.bf16.mxu1 %v2411_v28  ;;  %7822 = vmatpush3.bf16.msra.mxu1 %v8478_v19  ;;  %v6696_v19 = vcombine.low %v3573_v52, %v9393_v32  ;;  %v3595_v32 = vrot.slane %v9405_v20, 2  ;;  %v10751_v28 = vcombine.low %v9401_v40, %v9317_v18  ;;  %v8509_v18 = vld [vmem:[%s10734_s5 + $0x398] sm:$0xff]   ;;  %v8511_v40 = vld [vmem:[%s10734_s5 + $0x390] sm:$0xff]  }
 0x2bd   : > { %7896 = vmatpush3.bf16.msra.mxu0 %v8479_v5  ;;  %7823 = vmatprep.subr.bf16.mxu1 %v8480_v35  ;;  %v8501_v5 = vld [vmem:[%s10734_s5 + $0x2f0] sm:$0xff]   ;;  %v8527_v52 = vld [vmem:[%s10734_s5 + $0x418] sm:$0xff]  }
 0x2be   : > { %7897 = vmatprep.subr.bf16.mxu0 %v8481_v16  ;;  %v3594_v15 = vrot.slane %v6696_v19, 2 }
 0x2c0   : > { %7866 = vmatmul.mubr.bf16.gmra.mxu0 %v2936_v37  ;;  %7824 = vmatpush3.bf16.msra.mxu1 %v8480_v35  ;;  %v2722_v35 = vld [vmem:[%s9302_s26 + $0x1c] sm:$0x3]  ;;  %v3596_v20 = vsel %vm2017_vm2, %v3594_v15, %v3595_v32  ;;  %v8513_v37 = vld [vmem:[%s10734_s5 + $0x388] sm:$0xff]  }
 0x2c1   : > { %7898 = vmatpush3.bf16.msra.mxu0 %v8481_v16  ;;  %7909 = vmatprep.mubr.bf16.mxu0 %v3262_v46  ;;  %v8506_v16 = vld [vmem:[%s10734_s5 + $0x3a0] sm:$0xff]   ;;  %v6568_v45 = vcombine.low %v9341_v39, %v2722_v35  ;;  %v8510_v39 = vld [vmem:[%s10734_s5 + $0x2d8] sm:$0xff]  }
 0x2c2   : > { %7825 = vmatprep.subr.bf16.mxu1 %v8484_v61  ;;  %7899 = vmatprep.subr.bf16.mxu0 %v8485_v8  ;;  %v8516_v46 = vld [vmem:[%s10734_s5 + $0x2c0] sm:$0xff]  }
 0x2c3   : > { %7794 = vmatmul.mubr.bf16.gmra.mxu1 %v2416_v41  ;;  %v3599_v41 = vrot.slane %v9443_v42, 2  ;;  %v8534_v35 = vld [vmem:[%s10734_s5 + $0x340] sm:$0xff]  }
 0x2c4   : > { %7826 = vmatpush3.bf16.msra.mxu1 %v8484_v61  ;;  %7837 = vmatprep.mubr.bf16.mxu1 %v9323_v21  ;;  %v8491_v21 = vld [vmem:[%s10734_s5 + $0x308] sm:$0xff]  }
 0x2c5   : > { %7900 = vmatpush3.bf16.msra.mxu0 %v8485_v8  ;;  %7827 = vmatprep.subr.bf16.mxu1 %v8486_v10  ;;  %v8514_v61 = vld [vmem:[%s10734_s5 + $0x2c8] sm:$0xff]   ;;  %v8515_v8 = vld [vmem:[%s10734_s5 + $0x380] sm:$0xff]  }
 0x2c6   : > { %7901 = vmatprep.subr.bf16.mxu0 %v8487_v43 }
 0x2c8   : > { %7828 = vmatpush3.bf16.msra.mxu1 %v8486_v10  ;;  %v3597_v10 = vrot.slane %v9450_v6, 2  ;;  %v3088_v6 = vrot.slane %v9353_v51, 1 }
 0x2c9   : > { %7902 = vmatpush3.bf16.msra.mxu0 %v8487_v43  ;;  %7829 = vmatprep.subr.bf16.mxu1 %v8488_v2  ;;  %v8667_v43 = vld [vmem:[%s9302_s26 + $0x10] sm:$0xff]  }
 0x2ca   : > { %7903 = vmatprep.subr.bf16.mxu0 %v8489_v47  ;;  %v3600_v42 = vsel %vm2017_vm2, %v3597_v10, %v3599_v41 }
 0x2cc   : > { %7830 = vmatpush3.bf16.msra.mxu1 %v8488_v2  ;;  %v3086_v2 = vrot.slane %v8667_v43, 1 }
 0x2cd   : > { %7904 = vmatpush3.bf16.msra.mxu0 %v8489_v47  ;;  %7831 = vmatprep.subr.bf16.mxu1 %v8490_v11  ;;  %v8518_v47 = vld [vmem:[%s10734_s5 + $0x378] sm:$0xff]  }
 0x2ce   : > { %7905 = vmatprep.subr.bf16.mxu0 %v8491_v21  ;;  %v3087_v53 = vsel %vm1504_vm4, %v3084_v13, %v3086_v2  ;;  %v3089_v51 = vsel %vm1504_vm4, %v3086_v2, %v3088_v6 }
 0x2d0   : > { %7832 = vmatpush3.bf16.msra.mxu1 %v8490_v11  ;;  %v8519_v11 = vld [vmem:[%s10734_s5 + $0x430] sm:$0xff]  }
 0x2d1   : > { %7906 = vmatpush3.bf16.msra.mxu0 %v8491_v21  ;;  %7833 = vmatprep.subr.bf16.mxu1 %v8492_v7  ;;  %v3598_v21 = vsel %vm2017_vm2, %v3595_v32, %v3597_v10 }
 0x2d2   : > { %7907 = vmatprep.subr.bf16.mxu0 %v8493_v58 }
 0x2d4   : > { %7834 = vmatpush3.bf16.msra.mxu1 %v8492_v7  ;;  %v8520_v7 = vld [vmem:[%s10734_s5 + $0x370] sm:$0xff]  }
 0x2d5   : > { %7908 = vmatpush3.bf16.msra.mxu0 %v8493_v58  ;;  %7835 = vmatprep.subr.bf16.mxu1 %v8494_v9  ;;  %v8521_v58 = vld [vmem:[%s10734_s5 + $0x428] sm:$0xff]  }
 0x2d6   : > { %7941 = vmatprep.subr.bf16.mxu0 %v8496_v44 }
 0x2d8   : > { %7910 = vmatmul.mubr.bf16.vlgmr.msra.gmra.mxu0 %v3264_v36  ;;  %7836 = vmatpush3.bf16.msra.mxu1 %v8494_v9  ;;  %v8524_v9 = vld [vmem:[%s10734_s5 + $0x368] sm:$0xff]  }
 0x2d9   : > { %7913 = vmatprep.mubr.bf16.mxu0 %v3266_v4  ;;  %7942 = vmatpush3.bf16.msra.mxu0 %v8496_v44  ;;  %v8525_v44 = vld [vmem:[%s10734_s5 + $0x420] sm:$0xff]   ;;  %v8531_v4 = vld [vmem:[%s10734_s5 + $0x408] sm:$0xff]  }
 0x2da   : > { %7869 = vmatprep.subr.bf16.mxu1 %v8499_v48  ;;  %7943 = vmatprep.subr.bf16.mxu0 %v8500_v59 }
 0x2db   : > { %7838 = vmatmul.mubr.bf16.vlgmr.msra.gmra.mxu1 %v9305_v14 }
 0x2dc   : > { %7841 = vmatprep.mubr.bf16.mxu1 %v9326_v22  ;;  %7870 = vmatpush3.bf16.msra.mxu1 %v8499_v48  ;;  %v3083_v22 = vrot.slane %v10751_v28, 1 }
 0x2dd   : > { %7944 = vmatpush3.bf16.msra.mxu0 %v8500_v59  ;;  %7871 = vmatprep.subr.bf16.mxu1 %v8501_v5  ;;  %v8529_v59 = vld [vmem:[%s10734_s5 + $0x410] sm:$0xff]  }
 0x2de   : > { %7945 = vmatprep.subr.bf16.mxu0 %v8502_v56  ;;  %v3085_v14 = vsel %vm1504_vm4, %v3083_v22, %v3084_v13  ;;  %v8538_v22 = vld [vmem:[%s10734_s5 + $0x3f8] sm:$0xff]   ;;  %v8539_v13 = vld [vmem:[%s10734_s5 + $0x4b0] sm:$0xff]  }
 0x2e0   : > { %7914 = vmatmul.mubr.bf16.gmra.mxu0 %v3265_v54  ;;  %7872 = vmatpush3.bf16.msra.mxu1 %v8501_v5  ;;  %v8526_v54 = vld [vmem:[%s10734_s5 + $0x360] sm:$0xff]   ;;  %v8532_v5 = vld [vmem:[%s10734_s5 + $0x348] sm:$0xff]  }
 0x2e1   : > { %7946 = vmatpush3.bf16.msra.mxu0 %v8502_v56  ;;  %7957 = vmatprep.mubr.bf16.mxu0 %v3596_v20  ;;  %v8533_v56 = vld [vmem:[%s10734_s5 + $0x400] sm:$0xff]  }
 0x2e2   : > { %7873 = vmatprep.subr.bf16.mxu1 %v8505_v17  ;;  %7947 = vmatprep.subr.bf16.mxu0 %v8506_v16 }
 0x2e3   : > { %7842 = vmatmul.mubr.bf16.gmra.mxu1 %v6568_v45 }
 0x2e4   : > { %7874 = vmatpush3.bf16.msra.mxu1 %v8505_v17  ;;  %7885 = vmatprep.mubr.bf16.mxu1 %v3085_v14  ;;  %v8536_v17 = vld [vmem:[%s10734_s5 + $0x4b8] sm:$0xff]  }
 0x2e5   : > { %7948 = vmatpush3.bf16.msra.mxu0 %v8506_v16  ;;  %7875 = vmatprep.subr.bf16.mxu1 %v8508_v26 }
 0x2e6   : > { %7949 = vmatprep.subr.bf16.mxu0 %v8509_v18 }
 0x2e8   : > { %7876 = vmatpush3.bf16.msra.mxu1 %v8508_v26  ;;  %v8540_v26 = vld [vmem:[%s10734_s5 + $0x3f0] sm:$0xff]  }
 0x2e9   : > { %7950 = vmatpush3.bf16.msra.mxu0 %v8509_v18  ;;  %7877 = vmatprep.subr.bf16.mxu1 %v8510_v39  ;;  %v8542_v18 = vld [vmem:[%s10734_s5 + $0x4a8] sm:$0xff]  }
 0x2ea   : > { %7951 = vmatprep.subr.bf16.mxu0 %v8511_v40 }
 0x2ec   : > { %7878 = vmatpush3.bf16.msra.mxu1 %v8510_v39  ;;  %v8547_v39 = vld [vmem:[%s9302_s26 + $0x8] sm:$0xfc]  }
 0x2ed   : > { %7952 = vmatpush3.bf16.msra.mxu0 %v8511_v40  ;;  %7879 = vmatprep.subr.bf16.mxu1 %v8512_v33  ;;  %v9920_v40 = vld [vmem:[%s9302_s26 + $0x10] sm:$0xff]   ;;  %v3771_v43 = vrot.slane %v8547_v39, 2 }
 0x2ee   : > { %7953 = vmatprep.subr.bf16.mxu0 %v8513_v37  ;;  %v3772_v2 = vrot.slane %v9920_v40, 2 }
 0x2f0   : > { %7880 = vmatpush3.bf16.msra.mxu1 %v8512_v33  ;;  %v4272_v33 = vld [vmem:[%s9117_s30] sm:$0xf] }
 0x2f1   : > { %7954 = vmatpush3.bf16.msra.mxu0 %v8513_v37  ;;  %7881 = vmatprep.subr.bf16.mxu1 %v8514_v61  ;;  %v9926_v37 = vld [vmem:[%s9117_s30 + $0x4] sm:$0xf] }
 0x2f2   : > { %7955 = vmatprep.subr.bf16.mxu0 %v8515_v8 }
 0x2f4   : > { %7882 = vmatpush3.bf16.msra.mxu1 %v8514_v61 }
 0x2f5   : > { %7956 = vmatpush3.bf16.msra.mxu0 %v8515_v8  ;;  %7883 = vmatprep.subr.bf16.mxu1 %v8516_v46 }
 0x2f6   : > { %7989 = vmatprep.subr.bf16.mxu0 %v8517_v0 }
 0x2f8   : > { %7958 = vmatmul.mubr.bf16.vlgmr.msra.gmra.mxu0 %v3598_v21  ;;  %7884 = vmatpush3.bf16.msra.mxu1 %v8516_v46  ;;  %v7671_v15 = vpop.f32.mrf.mxu0  ;;  %v8546_v46 = vld [vmem:[%s10734_s5 + $0x4a0] sm:$0xff]  }
 0x2f9   : > { %7961 = vmatprep.mubr.bf16.mxu0 %v3600_v42  ;;  %7990 = vmatpush3.bf16.msra.mxu0 %v8517_v0 }
 0x2fa   : > { %7917 = vmatprep.subr.bf16.mxu1 %v8518_v47  ;;  %7991 = vmatprep.subr.bf16.mxu0 %v8519_v11  ;;  %v1598_v16 = vpop.f32.mrf.mxu0 }
 0x2fb   : > { %7886 = vmatmul.mubr.bf16.vlgmr.msra.gmra.mxu1 %v3087_v53  ;;  %v9849_v38 = vpop.f32.mrf.mxu1 }
 0x2fc   : > { %7889 = vmatprep.mubr.bf16.mxu1 %v3089_v51  ;;  %7918 = vmatpush3.bf16.msra.mxu1 %v8518_v47  ;;  %v7672_v20 = vpop.f32.mrf.mxu0  ;;  %v3773_v51 = vsel %vm2017_vm2, %v3771_v43, %v3772_v2 }
 0x2fd   : > { %7992 = vmatpush3.bf16.msra.mxu0 %v8519_v11  ;;  %7919 = vmatprep.subr.bf16.mxu1 %v8520_v7  ;;  %v9857_v24 = vpop.f32.mrf.mxu1 }
 0x2fe   : > { %7993 = vmatprep.subr.bf16.mxu0 %v8521_v58  ;;  %v1601_v14 = vpop.f32.mrf.mxu0 }
 0x2ff   : > { %v9867_v48 = vpop.f32.mrf.mxu1 }
 0x300   : > { %7962 = vmatmul.mubr.bf16.gmra.mxu0 %v3599_v41  ;;  %7920 = vmatpush3.bf16.msra.mxu1 %v8520_v7  ;;  %v9938_v41 = vcombine.low %v4272_v33, %v9926_v37  ;;  %v8550_v7 = vld [vmem:[%s10734_s5 + $0x498] sm:$0xff]   ;;  %v10010_v33 = vld [vmem:[%s9117_s30 + $0x10] sm:$0xff]  }
 0x301   : > { %7994 = vmatpush3.bf16.msra.mxu0 %v8521_v58  ;;  %8005 = vmatprep.mubr.bf16.mxu0 %v9473_v25  ;;  %v8528_v25 = vld [vmem:[%s10734_s5 + $0x358] sm:$0xff]   ;;  %v9875_v36 = vpop.f32.mrf.mxu1 }
 0x302   : > { %7921 = vmatprep.subr.bf16.mxu1 %v8524_v9  ;;  %7995 = vmatprep.subr.bf16.mxu0 %v8525_v44 }
 0x303   : > { %7890 = vmatmul.mubr.bf16.gmra.mxu1 %v3088_v6  ;;  %v9883_v19 = vpop.f32.mrf.mxu1  ;;  %v8549_v6 = vld [vmem:[%s10734_s5 + $0x3e0] sm:$0xff]  }
 0x304   : > { %7922 = vmatpush3.bf16.msra.mxu1 %v8524_v9  ;;  %7933 = vmatprep.mubr.bf16.mxu1 %v9477_v23  ;;  %v8530_v23 = vld [vmem:[%s10734_s5 + $0x350] sm:$0xff]  }
 0x305   : > { %7996 = vmatpush3.bf16.msra.mxu0 %v8525_v44  ;;  %7923 = vmatprep.subr.bf16.mxu1 %v8526_v54  ;;  %v9891_v32 = vpop.f32.mrf.mxu1 }
 0x306   : > { %7997 = vmatprep.subr.bf16.mxu0 %v8527_v52 }
 0x307   : > { %v9899_v28 = vpop.f32.mrf.mxu1 }
 0x308   : > { %7924 = vmatpush3.bf16.msra.mxu1 %v8526_v54 }
 0x309   : > { %7998 = vmatpush3.bf16.msra.mxu0 %v8527_v52  ;;  %7925 = vmatprep.subr.bf16.mxu1 %v8528_v25  ;;  %v9908_v45 = vpop.f32.mrf.mxu1 }
 0x30a   : > { %7999 = vmatprep.subr.bf16.mxu0 %v8529_v59 }
 0x30c   : > { %7926 = vmatpush3.bf16.msra.mxu1 %v8528_v25 }
 0x30d   : > { %8000 = vmatpush3.bf16.msra.mxu0 %v8529_v59  ;;  %7927 = vmatprep.subr.bf16.mxu1 %v8530_v23 }
 0x30e   : > { %8001 = vmatprep.subr.bf16.mxu0 %v8531_v4 }
 0x310   : > { %7928 = vmatpush3.bf16.msra.mxu1 %v8530_v23 }
 0x311   : > { %8002 = vmatpush3.bf16.msra.mxu0 %v8531_v4  ;;  %7929 = vmatprep.subr.bf16.mxu1 %v8532_v5  ;;  %v8553_v4 = vld [vmem:[%s10734_s5 + $0x3d0] sm:$0xff]  }
 0x312   : > { %8003 = vmatprep.subr.bf16.mxu0 %v8533_v56 }
 0x314   : > { %7930 = vmatpush3.bf16.msra.mxu1 %v8532_v5  ;;  %v8554_v5 = vld [vmem:[%s10734_s5 + $0x488] sm:$0xff]  }
 0x315   : > { %8004 = vmatpush3.bf16.msra.mxu0 %v8533_v56  ;;  %7931 = vmatprep.subr.bf16.mxu1 %v8534_v35 }
 0x316   : > { %8037 = vmatprep.subr.bf16.mxu0 %v8536_v17 }
 0x318   : > { %8006 = vmatmul.mubr.bf16.vlgmr.msra.gmra.mxu0 %v9488_v3  ;;  %7932 = vmatpush3.bf16.msra.mxu1 %v8534_v35  ;;  %v8555_v35 = vld [vmem:[%s10734_s5 + $0x3c8] sm:$0xff]  }
 0x319   : > { %8009 = vmatprep.mubr.bf16.mxu0 %v9491_v34  ;;  %8038 = vmatpush3.bf16.msra.mxu0 %v8536_v17  ;;  %v8556_v17 = vld [vmem:[%s10734_s5 + $0x480] sm:$0xff]  }
 0x31a   : > { %7965 = vmatprep.subr.bf16.mxu1 %v8538_v22  ;;  %8039 = vmatprep.subr.bf16.mxu0 %v8539_v13 }
 0x31b   : > { %v7647_v3 = vpop.f32.mrf.mxu1  ;;  %7934 = vmatmul.mubr.bf16.vlgmr.msra.gmra.mxu1 %v9501_v30  ;;  %v8545_v30 = vld [vmem:[%s10734_s5 + $0x3e8] sm:$0xff]  }
 0x31c   : > { %v1461_v34 = vadd.f32 %v7647_v3, %v9849_v38  ;;  %7937 = vmatprep.mubr.bf16.mxu1 %v9514_v50  ;;  %7966 = vmatpush3.bf16.msra.mxu1 %v8538_v22  ;;  %v7675_v50 = vpop.f32.mrf.mxu0  ;;  %v8559_v22 = vld [vmem:[%s10734_s5 + $0x538] sm:$0xff]   ;;  %v8563_v3 = vld [vmem:[%s10734_s5 + $0x530] sm:$0xff]  }
 0x31d   : > { %8040 = vmatpush3.bf16.msra.mxu0 %v8539_v13  ;;  %v1452_v61 = vpop.f32.mrf.mxu1  ;;  %7967 = vmatprep.subr.bf16.mxu1 %v8540_v26  ;;  %v8561_v13 = vld [vmem:[%s9302_s26 + $0x18] sm:$0xff]  }
 0x31e   : > { %v1453_v8 = vadd.f32 %v1452_v61, %v9857_v24  ;;  %8041 = vmatprep.subr.bf16.mxu0 %v8542_v18  ;;  %v9935_v0 = vadd.f32 %v7671_v15, %v1461_v34  ;;  %v1614_v53 = vpop.f32.mrf.mxu0  ;;  %v8551_v24 = vld [vmem:[%s10734_s5 + $0x3d8] sm:$0xff]   ;;  %v4619_v34 = vld [vmem:[%s9117_s30] sm:$0xe] }
 0x31f   : > { %v7648_v10 = vpop.f32.mrf.mxu1 }
 0x320   : > { %v1464_v47 = vadd.f32 %v7648_v10, %v9867_v48  ;;  %8010 = vmatmul.mubr.bf16.gmra.mxu0 %v9506_v62  ;;  %7968 = vmatpush3.bf16.msra.mxu1 %v8540_v26  ;;  %v9943_v11 = vadd.f32 %v1598_v16, %v1453_v8  ;;  %v7676_v48 = vpop.f32.mrf.mxu0  ;;  %v10000_v26 = vld [vmem:[%s9117_s30 + $0x8] sm:$0xff]   ;;  %v8565_v8 = vld [vmem:[%s10734_s5 + $0x470] sm:$0xff]  }
 0x321   : > { %8042 = vmatpush3.bf16.msra.mxu0 %v8542_v18  ;;  %8053 = vmatprep.mubr.bf16.mxu0 %v9938_v41  ;;  %v1455_v21 = vpop.f32.mrf.mxu1  ;;  %v3774_v18 = vrot.slane %v8561_v13, 2  ;;  %v4641_v40 = vrot.slane %v10000_v26, 1 }
 0x322   : > { %v1456_v42 = vadd.f32 %v1455_v21, %v9875_v36  ;;  %7969 = vmatprep.subr.bf16.mxu1 %v8545_v30  ;;  %8043 = vmatprep.subr.bf16.mxu0 %v8546_v46  ;;  %v9953_v62 = vadd.f32 %v7672_v20, %v1464_v47  ;;  %v1617_v15 = vpop.f32.mrf.mxu0  ;;  %v10026_v21 = vld [vmem:[%s9117_s30 + $0x18] sm:$0xf] }
 0x323   : > { %v7651_v58 = vpop.f32.mrf.mxu1  ;;  %7938 = vmatmul.mubr.bf16.gmra.mxu1 %v9503_v27  ;;  %v8552_v27 = vld [vmem:[%s10734_s5 + $0x490] sm:$0xff]  }
 0x324   : > { %v1477_v38 = vadd.f32 %v7651_v58, %v9883_v19  ;;  %7970 = vmatpush3.bf16.msra.mxu1 %v8545_v30  ;;  %7981 = vmatprep.mubr.bf16.mxu1 %v3773_v51  ;;  %v9960_v9 = vadd.f32 %v1601_v14, %v1456_v42  ;;  %v7719_v16 = vpop.f32.mrf.mxu0  ;;  %v8562_v14 = vld [vmem:[%s10734_s5 + $0x478] sm:$0xff]   ;;  %v6856_v30 = vcombine.low %v4619_v34, %v9926_v37  ;;  %v8569_v58 = vld [vmem:[%s10734_s5 + $0x468] sm:$0xff]  }
 0x325   : > { %8044 = vmatpush3.bf16.msra.mxu0 %v8546_v46  ;;  %v1468_v44 = vpop.f32.mrf.mxu1  ;;  %7971 = vmatprep.subr.bf16.mxu1 %v8549_v6  ;;  %v3775_v46 = vsel %vm2017_vm2, %v3772_v2, %v3774_v18 }
 0x326   : > { %v1469_v54 = vadd.f32 %v1468_v44, %v9891_v32  ;;  %8045 = vmatprep.subr.bf16.mxu0 %v8550_v7  ;;  %v9969_v52 = vadd.f32 %v7675_v50, %v1477_v38  ;;  %v1957_v20 = vpop.f32.mrf.mxu0  ;;  %v8568_v50 = vld [vmem:[%s10734_s5 + $0x528] sm:$0xff]  }
 0x327   : > { %v7652_v25 = vpop.f32.mrf.mxu1 }
 0x328   : > { %v1480_v59 = vadd.f32 %v7652_v25, %v9899_v28  ;;  %7972 = vmatpush3.bf16.msra.mxu1 %v8549_v6  ;;  %v9972_v36 = vadd.f32 %v1614_v53, %v1469_v54  ;;  %v8557_v28 = vld [vmem:[%s10734_s5 + $0x3c0] sm:$0xff]   ;;  %v7720_v39 = vpop.f32.mrf.mxu0  ;;  %v4279_v6 = vld [vmem:[%s9117_s30 + $0x1c] sm:$0x3]  ;;  %v4640_v53 = vrot.slane %v6856_v30, 1 }
 0x329   : > { %8046 = vmatpush3.bf16.msra.mxu0 %v8550_v7  ;;  %v1471_v23 = vpop.f32.mrf.mxu1  ;;  %7973 = vmatprep.subr.bf16.mxu1 %v8551_v24  ;;  %v6806_v7 = vcombine.low %v10026_v21, %v4279_v6  ;;  %v4772_v30 = vld [vmem:[%s9117_s30 + $0x4] sm:$0xe]  ;;  %v10106_v6 = vld [vmem:[%s9117_s30 + $0xc] sm:$0xff]  }
 0x32a   : > { %v1472_v19 = vadd.f32 %v1471_v23, %v9908_v45  ;;  %8047 = vmatprep.subr.bf16.mxu0 %v8552_v27  ;;  %v9981_v56 = vadd.f32 %v7676_v48, %v1480_v59  ;;  %v8564_v45 = vld [vmem:[%s9302_s26 + $0x20] sm:$0xff]   ;;  %v1960_v10 = vpop.f32.mrf.mxu0 }
 0x32b   : > { %v3776_v61 = vrot.slane %v8564_v45, 2  ;;  %v8572_v48 = vld [vmem:[%s10734_s5 + $0x460] sm:$0xff]   ;;  %v8577_v45 = vld [vmem:[%s10734_s5 + $0x508] sm:$0xff]  }
 0x32c   : > { %7974 = vmatpush3.bf16.msra.mxu1 %v8551_v24  ;;  %v9983_v32 = vadd.f32 %v1617_v15, %v1472_v19  ;;  %v7723_v38 = vpop.f32.mrf.mxu0  ;;  %v8574_v15 = vld [vmem:[%s10734_s5 + $0x458] sm:$0xff]  }
 0x32d   : > { %8048 = vmatpush3.bf16.msra.mxu0 %v8552_v27  ;;  %7975 = vmatprep.subr.bf16.mxu1 %v8553_v4  ;;  %v3777_v47 = vsel %vm2017_vm2, %v3774_v18, %v3776_v61 }
 0x32e   : > { %8049 = vmatprep.subr.bf16.mxu0 %v8554_v5  ;;  %v1973_v23 = vpop.f32.mrf.mxu0 }
 0x330   : > { %7976 = vmatpush3.bf16.msra.mxu1 %v8553_v4 }
 0x331   : > { %8050 = vmatpush3.bf16.msra.mxu0 %v8554_v5  ;;  %7977 = vmatprep.subr.bf16.mxu1 %v8555_v35 }
 0x332   : > { %8051 = vmatprep.subr.bf16.mxu0 %v8556_v17 }
 0x334   : > { %7978 = vmatpush3.bf16.msra.mxu1 %v8555_v35 }
 0x335   : > { %8052 = vmatpush3.bf16.msra.mxu0 %v8556_v17  ;;  %7979 = vmatprep.subr.bf16.mxu1 %v8557_v28  ;;  %v8575_v17 = vld [vmem:[%s10734_s5 + $0x510] sm:$0xff]  }
 0x336   : > { %8085 = vmatprep.subr.bf16.mxu0 %v8559_v22 }
 0x338   : > { %8054 = vmatmul.mubr.bf16.vlgmr.msra.gmra.mxu0 %v10000_v26  ;;  %7980 = vmatpush3.bf16.msra.mxu1 %v8557_v28 }
 0x339   : > { %8057 = vmatprep.mubr.bf16.mxu0 %v10010_v33  ;;  %8086 = vmatpush3.bf16.msra.mxu0 %v8559_v22 }
 0x33a   : > { %8013 = vmatprep.subr.bf16.mxu1 %v8562_v14  ;;  %8087 = vmatprep.subr.bf16.mxu0 %v8563_v3 }
 0x33b   : > { %v7695_v43 = vpop.f32.mrf.mxu1  ;;  %7982 = vmatmul.mubr.bf16.vlgmr.msra.gmra.mxu1 %v3775_v46  ;;  %v8581_v46 = vld [vmem:[%s10734_s5 + $0x5b8] sm:$0xff]  }
 0x33c   : > { %v1808_v37 = vadd.f32 %v7695_v43, %v9935_v0  ;;  %7985 = vmatprep.mubr.bf16.mxu1 %v3777_v47  ;;  %8014 = vmatpush3.bf16.msra.mxu1 %v8562_v14  ;;  %v8570_v0 = vld [vmem:[%s10734_s5 + $0x520] sm:$0xff]   ;;  %v4643_v47 = vrot.slane %v10010_v33, 1 }
 0x33d   : > { %8088 = vmatpush3.bf16.msra.mxu0 %v8563_v3  ;;  %v1775_v2 = vpop.f32.mrf.mxu1  ;;  %8015 = vmatprep.subr.bf16.mxu1 %v8565_v8  ;;  %v4442_v3 = vld [vmem:[%s9117_s30 + $0x1c] sm:$0x7] }
 0x33e   : > { %v1806_v42 = vadd.f32 %v1775_v2, %v9943_v11  ;;  %8089 = vmatprep.subr.bf16.mxu0 %v8568_v50  ;;  %v10039_v51 = vadd.f32 %v7719_v16, %v1808_v37  ;;  %v4642_v11 = vsel %vm1504_vm4, %v4640_v53, %v4641_v40  ;;  %v7724_v16 = vpop.f32.mrf.mxu0  ;;  %v4979_v37 = vshrl.u32 %v10106_v6, 16 }
 0x33f   : > { %v7696_v44 = vpop.f32.mrf.mxu1  ;;  %v4982_v2 = vshll.u32 %v10106_v6, 16 }
 0x340   : > { %v1809_v24 = vadd.f32 %v7696_v44, %v9953_v62  ;;  %8058 = vmatmul.mubr.bf16.gmra.mxu0 %v6806_v7  ;;  %8016 = vmatpush3.bf16.msra.mxu1 %v8565_v8  ;;  %v10045_v54 = vadd.f32 %v1957_v20, %v1806_v42  ;;  %v8573_v62 = vld [vmem:[%s10734_s5 + $0x518] sm:$0xff]   ;;  %v8580_v8 = vld [vmem:[%s10734_s5 + $0x440] sm:$0xff]   ;;  %v8583_v7 = vld [vmem:[%s10734_s5 + $0x5b0] sm:$0xff]  }
 0x341   : > { %8090 = vmatpush3.bf16.msra.mxu0 %v8568_v50  ;;  %8101 = vmatprep.mubr.bf16.mxu0 %v4642_v11  ;;  %v1778_v27 = vpop.f32.mrf.mxu1  ;;  %v8668_v50 = vld [vmem:[%s9117_s30 + $0x8] sm:$0xf]  ;;  %v8582_v42 = vld [vmem:[%s10734_s5 + $0x4f8] sm:$0xff]   ;;  %v4984_v11 = vrot.slane %v4982_v2, 2 }
 0x342   : > { %v1807_v25 = vadd.f32 %v1778_v27, %v9960_v9  ;;  %8017 = vmatprep.subr.bf16.mxu1 %v8569_v58  ;;  %8091 = vmatprep.subr.bf16.mxu0 %v8570_v0  ;;  %v10054_v59 = vadd.f32 %v7720_v39, %v1809_v24  ;;  %v8579_v39 = vld [vmem:[%s10734_s5 + $0x500] sm:$0xff]   ;;  %v4981_v24 = vrot.slane %v4979_v37, 1  ;;  %v4466_v27 = vshll.u32 %v9938_v41, 16 }
 0x343   : > { %v7699_v4 = vpop.f32.mrf.mxu1  ;;  %7986 = vmatmul.mubr.bf16.gmra.mxu1 %v3776_v61  ;;  %v10091_v61 = vcombine.low %v10026_v21, %v4442_v3 }
 0x344   : > { %v1812_v19 = vadd.f32 %v7699_v4, %v9969_v52  ;;  %8018 = vmatpush3.bf16.msra.mxu1 %v8569_v58  ;;  %8029 = vmatprep.mubr.bf16.mxu1 %v9536_v49  ;;  %v10058_v5 = vadd.f32 %v1960_v10, %v1807_v25  ;;  %v10101_v10 = vcombine.low %v4772_v30, %v8668_v50 }
 0x345   : > { %8092 = vmatpush3.bf16.msra.mxu0 %v8570_v0  ;;  %v1791_v9 = vpop.f32.mrf.mxu1  ;;  %8019 = vmatprep.subr.bf16.mxu1 %v8572_v48  ;;  %v4645_v21 = vrot.slane %v10091_v61, 1 }
 0x346   : > { %v1810_v35 = vadd.f32 %v1791_v9, %v9972_v36  ;;  %8093 = vmatprep.subr.bf16.mxu0 %v8573_v62  ;;  %v10067_v52 = vadd.f32 %v7723_v38, %v1812_v19  ;;  %v8576_v36 = vld [vmem:[%s10734_s5 + $0x450] sm:$0xff]   ;;  %v4971_v53 = vshrl.u32 %v10101_v10, 16  ;;  %v4974_v58 = vshll.u32 %v10101_v10, 16 }
 0x347   : > { %v7700_v49 = vpop.f32.mrf.mxu1  ;;  %v4644_v38 = vsel %vm1504_vm4, %v4641_v40, %v4643_v47  ;;  %v4646_v44 = vsel %vm1504_vm4, %v4643_v47, %v4645_v21  ;;  %v8585_v40 = vld [vmem:[%s10734_s5 + $0x5a8] sm:$0xff]   ;;  %v4471_v19 = vshll.u32 %v10000_v26, 16  ;;  %v8592_v47 = vld [vmem:[%s10734_s5 + $0x4d8] sm:$0xff]  }
 0x348   : > { %v1813_v28 = vadd.f32 %v7700_v49, %v9981_v56  ;;  %8020 = vmatpush3.bf16.msra.mxu1 %v8572_v48  ;;  %v10070_v22 = vadd.f32 %v1973_v23, %v1810_v35  ;;  %v1976_v56 = vpop.f32.mrf.mxu0  ;;  %v8584_v48 = vld [vmem:[%s10734_s5 + $0x4f0] sm:$0xff]   ;;  %v4973_v25 = vrot.slane %v4971_v53, 1 }
 0x349   : > { %8094 = vmatpush3.bf16.msra.mxu0 %v8573_v62  ;;  %v1794_v13 = vpop.f32.mrf.mxu1  ;;  %8021 = vmatprep.subr.bf16.mxu1 %v8574_v15  ;;  %v4976_v62 = vrot.slane %v4974_v58, 2 }
 0x34a   : > { %v1811_v20 = vadd.f32 %v1794_v13, %v9983_v32  ;;  %8095 = vmatprep.subr.bf16.mxu0 %v8575_v17  ;;  %v10079_v18 = vadd.f32 %v7724_v16, %v1813_v28  ;;  %v8578_v32 = vld [vmem:[%s10734_s5 + $0x448] sm:$0xff]   ;;  %v7767_v34 = vpop.f32.mrf.mxu0 }
 0x34b   : > { %v4977_v49 = vor.u32 %v4976_v62, %v4973_v25  ;;  %v8597_v25 = vld [vmem:[%s10734_s5 + $0x580] sm:$0xff]  }
 0x34c   : > { %8022 = vmatpush3.bf16.msra.mxu1 %v8574_v15  ;;  %v10081_v14 = vadd.f32 %v1976_v56, %v1811_v20  ;;  %v2288_v43 = vpop.f32.mrf.mxu0  ;;  %v10133_v15 = vor.u32 %v4984_v11, %v4981_v24  ;;  %v10145_v20 = vrot.slane %v4471_v19, 1 }
 0x34d   : > { %8096 = vmatpush3.bf16.msra.mxu0 %v8575_v17  ;;  %8023 = vmatprep.subr.bf16.mxu1 %v8576_v36  ;;  %v4468_v17 = vrot.slane %v4466_v27, 1  ;;  %v4997_v27 = vshrl.u32 %v9521_v29, 16 }
 0x34e   : > { %8097 = vmatprep.subr.bf16.mxu0 %v8577_v45  ;;  %v7768_v0 = vpop.f32.mrf.mxu0 }
 0x34f   : > { %v4999_v19 = vrot.slane %v4997_v27, 1 }
 0x350   : > { %8024 = vmatpush3.bf16.msra.mxu1 %v8576_v36  ;;  %v2291_v23 = vpop.f32.mrf.mxu0  ;;  %v4464_v36 = vshrl.u32 %v9938_v41, 16 }
 0x351   : > { %8098 = vmatpush3.bf16.msra.mxu0 %v8577_v45  ;;  %8025 = vmatprep.subr.bf16.mxu1 %v8578_v32  ;;  %v4986_v45 = vsel %vm1835_vm5, %v4977_v49, %v10133_v15 }
 0x352   : > { %8099 = vmatprep.subr.bf16.mxu0 %v8579_v39  ;;  %v7771_v28 = vpop.f32.mrf.mxu0 }
 0x354   : > { %8026 = vmatpush3.bf16.msra.mxu1 %v8578_v32  ;;  %v4469_v32 = vor.u32 %v4468_v17, %v4464_v36  ;;  %v4479_v17 = vshll.u32 %v10010_v33, 16  ;;  %v4475_v36 = vshrl.u32 %v10000_v26, 16 }
 0x355   : > { %8100 = vmatpush3.bf16.msra.mxu0 %v8579_v39  ;;  %8027 = vmatprep.subr.bf16.mxu1 %v8580_v8  ;;  %v8590_v39 = vld [vmem:[%s10734_s5 + $0x4e0] sm:$0xff]  }
 0x356   : > { %8133 = vmatprep.subr.bf16.mxu0 %v8581_v46 }
 0x358   : > { %8102 = vmatmul.mubr.bf16.vlgmr.msra.gmra.mxu0 %v4644_v38  ;;  %8028 = vmatpush3.bf16.msra.mxu1 %v8580_v8  ;;  %v2304_v8 = vpop.f32.mrf.mxu0 }
 0x359   : > { %8105 = vmatprep.mubr.bf16.mxu0 %v4646_v44  ;;  %8134 = vmatpush3.bf16.msra.mxu0 %v8581_v46  ;;  %v4474_v46 = vsel %vm1214_vm3, %v4469_v32, %v10145_v20  ;;  %v10189_v44 = vld [vmem:[%s9117_s30 + $0x14] sm:$0xff]  }
 0x35a   : > { %8061 = vmatprep.subr.bf16.mxu1 %v8582_v42  ;;  %8135 = vmatprep.subr.bf16.mxu0 %v8583_v7  ;;  %v7772_v37 = vpop.f32.mrf.mxu0  ;;  %v4988_v24 = vshrl.u32 %v10189_v44, 16  ;;  %v4991_v11 = vshll.u32 %v10189_v44, 16 }
 0x35b   : > { %v7743_v4 = vpop.f32.mrf.mxu1  ;;  %8030 = vmatmul.mubr.bf16.vlgmr.msra.gmra.mxu1 %v9517_v12  ;;  %v8588_v12 = vld [vmem:[%s10734_s5 + $0x4e8] sm:$0xff]  }
 0x35c   : > { %v2144_v9 = vadd.f32 %v7743_v4, %v10039_v51  ;;  %8033 = vmatprep.mubr.bf16.mxu1 %v9527_v63  ;;  %8062 = vmatpush3.bf16.msra.mxu1 %v8582_v42  ;;  %v8589_v51 = vld [vmem:[%s10734_s5 + $0x5a0] sm:$0xff]   ;;  %v4993_v4 = vrot.slane %v4991_v11, 2 }
 0x35d   : > { %8136 = vmatpush3.bf16.msra.mxu0 %v8583_v7  ;;  %v2111_v35 = vpop.f32.mrf.mxu1  ;;  %8063 = vmatprep.subr.bf16.mxu1 %v8584_v48 }
 0x35e   : > { %v2142_v16 = vadd.f32 %v2111_v35, %v10045_v54  ;;  %8137 = vmatprep.subr.bf16.mxu0 %v8585_v40  ;;  %v10142_v63 = vadd.f32 %v7767_v34, %v2144_v9  ;;  %v8598_v35 = vld [vmem:[%s10734_s5 + $0x4c0] sm:$0xff]  }
 0x35f   : > { %v7744_v13 = vpop.f32.mrf.mxu1 }
 0x360   : > { %v2145_v54 = vadd.f32 %v7744_v13, %v10054_v59  ;;  %8106 = vmatmul.mubr.bf16.gmra.mxu0 %v4645_v21  ;;  %8064 = vmatpush3.bf16.msra.mxu1 %v8584_v48  ;;  %v10150_v56 = vadd.f32 %v2288_v43, %v2142_v16  ;;  %v8591_v59 = vld [vmem:[%s10734_s5 + $0x598] sm:$0xff]   ;;  %v5000_v48 = vshll.u32 %v9521_v29, 16  ;;  %v4481_v13 = vrot.slane %v4479_v17, 1 }
 0x361   : > { %8138 = vmatpush3.bf16.msra.mxu0 %v8585_v40  ;;  %8149 = vmatprep.mubr.bf16.mxu0 %v4986_v45  ;;  %v2114_v3 = vpop.f32.mrf.mxu1  ;;  %v8596_v40 = vld [vmem:[%s10734_s5 + $0x4c8] sm:$0xff]   ;;  %v8600_v16 = vld [vmem:[%s10734_s5 + $0x638] sm:$0xff]   ;;  %v8603_v45 = vld [vmem:[%s10734_s5 + $0x630] sm:$0xff]  }
 0x362   : > { %v2143_v41 = vadd.f32 %v2114_v3, %v10058_v5  ;;  %8065 = vmatprep.subr.bf16.mxu1 %v8588_v12  ;;  %8139 = vmatprep.subr.bf16.mxu0 %v8589_v51  ;;  %v10159_v34 = vadd.f32 %v7768_v0, %v2145_v54  ;;  %v8595_v0 = vld [vmem:[%s10734_s5 + $0x588] sm:$0xff]   ;;  %v5002_v9 = vrot.slane %v5000_v48, 2  ;;  %v8602_v54 = vld [vmem:[%s10734_s5 + $0x578] sm:$0xff]  }
 0x363   : > { %v7747_v30 = vpop.f32.mrf.mxu1  ;;  %8034 = vmatmul.mubr.bf16.gmra.mxu1 %v9530_v57  ;;  %v8593_v57 = vld [vmem:[%s10734_s5 + $0x590] sm:$0xff]   ;;  %v8612_v17 = vld [vmem:[%s10734_s5 + $0x558] sm:$0xff]  }
 0x364   : > { %v2148_v50 = vadd.f32 %v7747_v30, %v10067_v52  ;;  %8066 = vmatpush3.bf16.msra.mxu1 %v8588_v12  ;;  %8077 = vmatprep.mubr.bf16.mxu1 %v4474_v46  ;;  %v10165_v5 = vadd.f32 %v2291_v23, %v2143_v41  ;;  %v4990_v23 = vrot.slane %v4988_v24, 1  ;;  %v8604_v46 = vld [vmem:[%s10734_s5 + $0x570] sm:$0xff]   ;;  %v4818_v24 = vrot.slane %v10106_v6, 1 }
 0x365   : > { %8140 = vmatpush3.bf16.msra.mxu0 %v8589_v51  ;;  %v2127_v43 = vpop.f32.mrf.mxu1  ;;  %8067 = vmatprep.subr.bf16.mxu1 %v8590_v39  ;;  %v4487_v51 = vshll.u32 %v10091_v61, 16 }
 0x366   : > { %v2146_v21 = vadd.f32 %v2127_v43, %v10070_v22  ;;  %8141 = vmatprep.subr.bf16.mxu0 %v8591_v59  ;;  %v10174_v52 = vadd.f32 %v7771_v28, %v2148_v50  ;;  %v8594_v22 = vld [vmem:[%s10734_s5 + $0x4d0] sm:$0xff]   ;;  %v4994_v12 = vor.u32 %v4993_v4, %v4990_v23  ;;  %v5003_v28 = vor.u32 %v5002_v9, %v4999_v19 }
 0x367   : > { %v7748_v2 = vpop.f32.mrf.mxu1  ;;  %v4489_v41 = vrot.slane %v4487_v51, 1 }
 0x368   : > { %v2149_v42 = vadd.f32 %v7748_v2, %v10079_v18  ;;  %8068 = vmatpush3.bf16.msra.mxu1 %v8590_v39  ;;  %v10177_v7 = vadd.f32 %v2304_v8, %v2146_v21  ;;  %v2307_v18 = vpop.f32.mrf.mxu0  ;;  %v4995_v32 = vsel %vm1835_vm5, %v10133_v15, %v4994_v12  ;;  %v4483_v39 = vshrl.u32 %v10010_v33, 16  ;;  %v10224_v8 = vld [vmem:[%s9117_s30 + $0x10] sm:$0xff]   ;;  %v8605_v33 = vld [vmem:[%s10734_s5 + $0x628] sm:$0xff]  }
 0x369   : > { %8142 = vmatpush3.bf16.msra.mxu0 %v8591_v59  ;;  %v2130_v53 = vpop.f32.mrf.mxu1  ;;  %8069 = vmatprep.subr.bf16.mxu1 %v8592_v47  ;;  %v4477_v59 = vor.u32 %v4475_v36, %v10145_v20  ;;  %v5004_v26 = vsel %vm1835_vm5, %v4994_v12, %v5003_v28  ;;  %v8606_v20 = vld [vmem:[%s9117_s30 + $0x8] sm:$0xfc]  }
 0x36a   : > { %v2147_v58 = vadd.f32 %v2130_v53, %v10081_v14  ;;  %8143 = vmatprep.subr.bf16.mxu0 %v8593_v57  ;;  %v10186_v38 = vadd.f32 %v7772_v37, %v2149_v42  ;;  %v7815_v62 = vpop.f32.mrf.mxu0  ;;  %v4485_v30 = vor.u32 %v4483_v39, %v4481_v13  ;;  %v5328_v42 = vrot.slane %v8606_v20, 2  ;;  %v8608_v53 = vld [vmem:[%s10734_s5 + $0x568] sm:$0xff]  }
 0x36b   : > { %v4482_v15 = vsel %vm1214_vm3, %v4477_v59, %v4481_v13  ;;  %v8616_v39 = vld [vmem:[%s10734_s5 + $0x548] sm:$0xff]   ;;  %v8619_v59 = vld [vmem:[%s9117_s30 + $0x18] sm:$0xff]  }
 0x36c   : > { %8070 = vmatpush3.bf16.msra.mxu1 %v8592_v47  ;;  %v10195_v14 = vadd.f32 %v2307_v18, %v2147_v58  ;;  %v2659_v49 = vpop.f32.mrf.mxu0  ;;  %v4490_v47 = vsel %vm1214_vm3, %v4485_v30, %v4489_v41  ;;  %v4491_v18 = vshrl.u32 %v10091_v61, 16  ;;  %v8610_v61 = vld [vmem:[%s10734_s5 + $0x560] sm:$0xff]   ;;  %v5331_v20 = vrot.slane %v8619_v59, 2 }
 0x36d   : > { %8144 = vmatpush3.bf16.msra.mxu0 %v8593_v57  ;;  %8071 = vmatprep.subr.bf16.mxu1 %v8594_v22  ;;  %v5329_v57 = vrot.slane %v10224_v8, 2  ;;  %v4779_v30 = vld [vmem:[%s9117_s30 + $0x20] sm:$0x7] }
 0x36e   : > { %8145 = vmatprep.subr.bf16.mxu0 %v8595_v0  ;;  %v7816_v3 = vpop.f32.mrf.mxu0 }
 0x36f   : > { %v5330_v11 = vsel %vm2017_vm2, %v5328_v42, %v5329_v57 }
 0x370   : > { %8072 = vmatpush3.bf16.msra.mxu1 %v8594_v22  ;;  %v2662_v50 = vpop.f32.mrf.mxu0  ;;  %v8609_v22 = vld [vmem:[%s10734_s5 + $0x620] sm:$0xff]  }
 0x371   : > { %8146 = vmatpush3.bf16.msra.mxu0 %v8595_v0  ;;  %8073 = vmatprep.subr.bf16.mxu1 %v8596_v40 }
 0x372   : > { %8147 = vmatprep.subr.bf16.mxu0 %v8597_v25  ;;  %v7819_v58 = vpop.f32.mrf.mxu0 }
 0x374   : > { %8074 = vmatpush3.bf16.msra.mxu1 %v8596_v40  ;;  %v4493_v40 = vor.u32 %v4491_v18, %v4489_v41  ;;  %v2675_v4 = vpop.f32.mrf.mxu0  ;;  %v10325_v18 = vld [vmem:[%s9117_s30 + $0x10] sm:$0xff]  }
 0x375   : > { %8148 = vmatpush3.bf16.msra.mxu0 %v8597_v25  ;;  %8075 = vmatprep.subr.bf16.mxu1 %v8598_v35  ;;  %v4817_v25 = vrot.slane %v10101_v10, 1  ;;  %v5696_v6 = vrot.slane %v10325_v18, 3 }
 0x376   : > { %8181 = vmatprep.subr.bf16.mxu0 %v8600_v16 }
 0x377   : > { %v4819_v10 = vsel %vm1504_vm4, %v4817_v25, %v4818_v24 }
 0x378   : > { %8150 = vmatmul.mubr.bf16.vlgmr.msra.gmra.mxu0 %v4995_v32  ;;  %8076 = vmatpush3.bf16.msra.mxu1 %v8598_v35 }
 0x379   : > { %8153 = vmatprep.mubr.bf16.mxu0 %v5004_v26  ;;  %8182 = vmatpush3.bf16.msra.mxu0 %v8600_v16  ;;  %v8621_v26 = vld [vmem:[%s9117_s30 + $0x20] sm:$0xff]  }
 0x37a   : > { %8109 = vmatprep.subr.bf16.mxu1 %v8602_v54  ;;  %8183 = vmatprep.subr.bf16.mxu0 %v8603_v45 }
 0x37b   : > { %v7791_v43 = vpop.f32.mrf.mxu1  ;;  %8078 = vmatmul.mubr.bf16.vlgmr.msra.gmra.mxu1 %v4482_v15  ;;  %v8620_v15 = vld [vmem:[%s10734_s5 + $0x6b8] sm:$0xff]  }
 0x37c   : > { %v2536_v21 = vadd.f32 %v7791_v43, %v10142_v63  ;;  %8081 = vmatprep.mubr.bf16.mxu1 %v4490_v47  ;;  %8110 = vmatpush3.bf16.msra.mxu1 %v8602_v54  ;;  %v5333_v47 = vrot.slane %v8621_v26, 2 }
 0x37d   : > { %8184 = vmatpush3.bf16.msra.mxu0 %v8603_v45  ;;  %v2503_v37 = vpop.f32.mrf.mxu1  ;;  %8111 = vmatprep.subr.bf16.mxu1 %v8604_v46 }
 0x37e   : > { %v2534_v2 = vadd.f32 %v2503_v37, %v10150_v56  ;;  %8185 = vmatprep.subr.bf16.mxu0 %v8605_v33  ;;  %v10244_v63 = vadd.f32 %v7815_v62, %v2536_v21  ;;  %v8611_v62 = vld [vmem:[%s10734_s5 + $0x618] sm:$0xff]   ;;  %v4820_v21 = vrot.slane %v10189_v44, 1  ;;  %v5334_v44 = vsel %vm2017_vm2, %v5331_v20, %v5333_v47 }
 0x37f   : > { %v7792_v0 = vpop.f32.mrf.mxu1  ;;  %v8622_v37 = vld [vmem:[%s10734_s5 + $0x5f8] sm:$0xff]  }
 0x380   : > { %v2537_v56 = vadd.f32 %v7792_v0, %v10159_v34  ;;  %8154 = vmatmul.mubr.bf16.gmra.mxu0 %v5003_v28  ;;  %8112 = vmatpush3.bf16.msra.mxu1 %v8604_v46  ;;  %v10252_v27 = vadd.f32 %v2659_v49, %v2534_v2  ;;  %v8613_v49 = vld [vmem:[%s10734_s5 + $0x610] sm:$0xff]   ;;  %v8618_v46 = vld [vmem:[%s10734_s5 + $0x540] sm:$0xff]   ;;  %v5674_v0 = vld [vmem:[%s9117_s30 + $0x8] sm:$0x8]  ;;  %v4821_v8 = vsel %vm1504_vm4, %v4818_v24, %v4820_v21 }
 0x381   : > { %8186 = vmatpush3.bf16.msra.mxu0 %v8605_v33  ;;  %8197 = vmatprep.mubr.bf16.mxu0 %v5330_v11  ;;  %v2506_v48 = vpop.f32.mrf.mxu1  ;;  %v8623_v2 = vld [vmem:[%s10734_s5 + $0x6b0] sm:$0xff]  }
 0x382   : > { %v2535_v34 = vadd.f32 %v2506_v48, %v10165_v5  ;;  %8113 = vmatprep.subr.bf16.mxu1 %v8608_v53  ;;  %8187 = vmatprep.subr.bf16.mxu0 %v8609_v22  ;;  %v10262_v23 = vadd.f32 %v7816_v3, %v2537_v56  ;;  %v8625_v56 = vld [vmem:[%s10734_s5 + $0x5f0] sm:$0xff]  }
 0x383   : > { %v7795_v19 = vpop.f32.mrf.mxu1  ;;  %8082 = vmatmul.mubr.bf16.gmra.mxu1 %v4493_v40 }
 0x384   : > { %v2540_v9 = vadd.f32 %v7795_v19, %v10174_v52  ;;  %8114 = vmatpush3.bf16.msra.mxu1 %v8608_v53  ;;  %8125 = vmatprep.mubr.bf16.mxu1 %v4819_v10  ;;  %v10268_v5 = vadd.f32 %v2662_v50, %v2535_v34  ;;  %v7820_v52 = vpop.f32.mrf.mxu0  ;;  %v8671_v50 = vld [vmem:[%s9117_s30 + $0x1c] sm:$0xf]  ;;  %v5332_v53 = vsel %vm2017_vm2, %v5329_v57, %v5331_v20  ;;  %v8626_v57 = vld [vmem:[%s10734_s5 + $0x6a8] sm:$0xff]   ;;  %v8631_v19 = vld [vmem:[%s10734_s5 + $0x6a0] sm:$0xff]  }
 0x385   : > { %8188 = vmatpush3.bf16.msra.mxu0 %v8609_v22  ;;  %v2519_v35 = vpop.f32.mrf.mxu1  ;;  %8115 = vmatprep.subr.bf16.mxu1 %v8610_v61  ;;  %v6884_v43 = vcombine.low %v8671_v50, %v4779_v30  ;;  %v8639_v20 = vld [vmem:[%s10734_s5 + $0x5c8] sm:$0xff]  }
 0x386   : > { %v2538_v16 = vadd.f32 %v2519_v35, %v10177_v7  ;;  %8189 = vmatprep.subr.bf16.mxu0 %v8611_v62  ;;  %v10277_v12 = vadd.f32 %v7819_v58, %v2540_v9  ;;  %v8614_v7 = vld [vmem:[%s10734_s5 + $0x550] sm:$0xff]   ;;  %v2678_v3 = vpop.f32.mrf.mxu0  ;;  %v10320_v58 = vld [vmem:[%s9117_s30 + $0xc] sm:$0xf] }
 0x387   : > { %v7796_v51 = vpop.f32.mrf.mxu1  ;;  %v4822_v22 = vrot.slane %v6884_v43, 1  ;;  %v7016_v11 = vcombine.low %v5674_v0, %v10320_v58  ;;  %v10398_v43 = vld [vmem:[%s9117_s30 + $0x18] sm:$0xff]  }
 0x388   : > { %v2541_v28 = vadd.f32 %v7796_v51, %v10186_v38  ;;  %8116 = vmatpush3.bf16.msra.mxu1 %v8610_v61  ;;  %v10280_v13 = vadd.f32 %v2675_v4, %v2538_v16  ;;  %v8615_v38 = vld [vmem:[%s10734_s5 + $0x608] sm:$0xff]   ;;  %v7863_v41 = vpop.f32.mrf.mxu0  ;;  %v8644_v0 = vld [vmem:[%s10734_s5 + $0x678] sm:$0xff]  }
 0x389   : > { %8190 = vmatpush3.bf16.msra.mxu0 %v8611_v62  ;;  %v2522_v36 = vpop.f32.mrf.mxu1  ;;  %8117 = vmatprep.subr.bf16.mxu1 %v8612_v17  ;;  %v4823_v25 = vsel %vm1504_vm4, %v4820_v21, %v4822_v22  ;;  %v5695_v62 = vrot.slane %v7016_v11, 3  ;;  %v8630_v4 = vld [vmem:[%s10734_s5 + $0x5e8] sm:$0xff]   ;;  %v8641_v21 = vld [vmem:[%s10734_s5 + $0x5c0] sm:$0xff]  }
 0x38a   : > { %v2539_v54 = vadd.f32 %v2522_v36, %v10195_v14  ;;  %8191 = vmatprep.subr.bf16.mxu0 %v8613_v49  ;;  %v10289_v45 = vadd.f32 %v7820_v52, %v2541_v28  ;;  %v8617_v14 = vld [vmem:[%s10734_s5 + $0x600] sm:$0xff]   ;;  %v3023_v33 = vpop.f32.mrf.mxu0 }
 0x38c   : > { %8118 = vmatpush3.bf16.msra.mxu1 %v8612_v17  ;;  %v10291_v32 = vadd.f32 %v2678_v3, %v2539_v54  ;;  %v7864_v42 = vpop.f32.mrf.mxu0 }
 0x38d   : > { %8192 = vmatpush3.bf16.msra.mxu0 %v8613_v49  ;;  %8119 = vmatprep.subr.bf16.mxu1 %v8614_v7  ;;  %v8633_v49 = vld [vmem:[%s10734_s5 + $0x5e0] sm:$0xff]  }
 0x38e   : > { %8193 = vmatprep.subr.bf16.mxu0 %v8615_v38  ;;  %v3026_v48 = vpop.f32.mrf.mxu0 }
 0x390   : > { %8120 = vmatpush3.bf16.msra.mxu1 %v8614_v7  ;;  %v7867_v10 = vpop.f32.mrf.mxu0 }
 0x391   : > { %8194 = vmatpush3.bf16.msra.mxu0 %v8615_v38  ;;  %8121 = vmatprep.subr.bf16.mxu1 %v8616_v39  ;;  %v8635_v38 = vld [vmem:[%s10734_s5 + $0x5d8] sm:$0xff]  }
 0x392   : > { %8195 = vmatprep.subr.bf16.mxu0 %v8617_v14  ;;  %v3039_v28 = vpop.f32.mrf.mxu0 }
 0x394   : > { %8122 = vmatpush3.bf16.msra.mxu1 %v8616_v39  ;;  %v8636_v39 = vld [vmem:[%s10734_s5 + $0x690] sm:$0xff]  }
 0x395   : > { %8196 = vmatpush3.bf16.msra.mxu0 %v8617_v14  ;;  %8123 = vmatprep.subr.bf16.mxu1 %v8618_v46  ;;  %v7868_v14 = vpop.f32.mrf.mxu0 }
 0x396   : > { %8229 = vmatprep.subr.bf16.mxu0 %v8620_v15 }
 0x398   : > { %8198 = vmatmul.mubr.bf16.vlgmr.msra.gmra.mxu0 %v5332_v53  ;;  %8124 = vmatpush3.bf16.msra.mxu1 %v8618_v46  ;;  %v8638_v46 = vld [vmem:[%s10734_s5 + $0x688] sm:$0xff]  }
 0x399   : > { %8201 = vmatprep.mubr.bf16.mxu0 %v5334_v44  ;;  %8230 = vmatpush3.bf16.msra.mxu0 %v8620_v15  ;;  %v3042_v15 = vpop.f32.mrf.mxu0 }
 0x39a   : > { %8157 = vmatprep.subr.bf16.mxu1 %v8622_v37  ;;  %8231 = vmatprep.subr.bf16.mxu0 %v8623_v2 }
 0x39b   : > { %v7839_v40 = vpop.f32.mrf.mxu1  ;;  %8126 = vmatmul.mubr.bf16.vlgmr.msra.gmra.mxu1 %v4821_v8  ;;  %v7911_v50 = vpop.f32.mrf.mxu0  ;;  %v5518_v8 = vshrl.u32 %v10325_v18, 16 }
 0x39c   : > { %v2879_v61 = vadd.f32 %v7839_v40, %v10244_v63  ;;  %8129 = vmatprep.mubr.bf16.mxu1 %v4823_v25  ;;  %8158 = vmatpush3.bf16.msra.mxu1 %v8622_v37  ;;  %v5460_v37 = vld [vmem:[%s9117_s30 + $0x8] sm:$0xc] }
 0x39d   : > { %8232 = vmatpush3.bf16.msra.mxu0 %v8623_v2  ;;  %v2846_v24 = vpop.f32.mrf.mxu1  ;;  %8159 = vmatprep.subr.bf16.mxu1 %v8625_v56  ;;  %v3353_v2 = vpop.f32.mrf.mxu0 }
 0x39e   : > { %v2877_v34 = vadd.f32 %v2846_v24, %v10252_v27  ;;  %8233 = vmatprep.subr.bf16.mxu0 %v8626_v57  ;;  %v10347_v63 = vadd.f32 %v7863_v41, %v2879_v61  ;;  %v5697_v27 = vsel %vm2563_vm7, %v5695_v62, %v5696_v6  ;;  %v5520_v24 = vrot.slane %v5518_v8, 2 }
 0x39f   : > { %v7840_v9 = vpop.f32.mrf.mxu1  ;;  %v7912_v44 = vpop.f32.mrf.mxu0 }
 0x3a0   : > { %v2880_v35 = vadd.f32 %v7840_v9, %v10262_v23  ;;  %8202 = vmatmul.mubr.bf16.gmra.mxu0 %v5333_v47  ;;  %8160 = vmatpush3.bf16.msra.mxu1 %v8625_v56  ;;  %v10353_v17 = vadd.f32 %v3023_v33, %v2877_v34  ;;  %v8634_v23 = vld [vmem:[%s10734_s5 + $0x698] sm:$0xff]   ;;  %v10401_v47 = vld [vmem:[%s9117_s30 + $0x20] sm:$0xff]  }
 0x3a1   : > { %8234 = vmatpush3.bf16.msra.mxu0 %v8626_v57  ;;  %8245 = vmatprep.mubr.bf16.mxu0 %v5697_v27  ;;  %v2849_v16 = vpop.f32.mrf.mxu1  ;;  %v5700_v53 = vrot.slane %v10401_v47, 3  ;;  %v5521_v57 = vshll.u32 %v10325_v18, 16  ;;  %v3356_v61 = vpop.f32.mrf.mxu0 }
 0x3a2   : > { %v2878_v52 = vadd.f32 %v2849_v16, %v10268_v5  ;;  %8161 = vmatprep.subr.bf16.mxu1 %v8630_v4  ;;  %8235 = vmatprep.subr.bf16.mxu0 %v8631_v19  ;;  %v10362_v51 = vadd.f32 %v7864_v42, %v2880_v35  ;;  %v5698_v42 = vrot.slane %v10398_v43, 3 }
 0x3a3   : > { %v7843_v36 = vpop.f32.mrf.mxu1  ;;  %8130 = vmatmul.mubr.bf16.gmra.mxu1 %v4822_v22  ;;  %v6987_v22 = vcombine.low %v5460_v37, %v10320_v58  ;;  %v8645_v58 = vld [vmem:[%s10734_s5 + $0x670] sm:$0xff]   ;;  %v5523_v18 = vrot.slane %v5521_v57, 3  ;;  %v7915_v27 = vpop.f32.mrf.mxu0  ;;  %v5536_v37 = vshrl.u32 %v10401_v47, 16 }
 0x3a4   : > { %v2883_v7 = vadd.f32 %v7843_v36, %v10277_v12  ;;  %8162 = vmatpush3.bf16.msra.mxu1 %v8630_v4  ;;  %8173 = vmatprep.mubr.bf16.mxu1 %v9164_v31  ;;  %v10366_v54 = vadd.f32 %v3026_v48, %v2878_v52  ;;  %v5699_v56 = vsel %vm2563_vm7, %v5696_v6, %v5698_v42  ;;  %v10423_v48 = vld [vmem:[%s9117_s30 + $0x28] ss:$0 sps:$4 sm:$0x11]  }
 0x3a5   : > { %8236 = vmatpush3.bf16.msra.mxu0 %v8631_v19  ;;  %v2862_v5 = vpop.f32.mrf.mxu1  ;;  %8163 = vmatprep.subr.bf16.mxu1 %v8633_v49  ;;  %v5701_v11 = vsel %vm2563_vm7, %v5698_v42, %v5700_v53  ;;  %v5510_v40 = vshrl.u32 %v6987_v22, 16  ;;  %v5513_v25 = vshll.u32 %v6987_v22, 16  ;;  %v5702_v4 = vrot.slane %v10423_v48, 3  ;;  %v8647_v19 = vld [vmem:[%s10734_s5 + $0x668] sm:$0xff]  }
 0x3a6   : > { %v2881_v3 = vadd.f32 %v2862_v5, %v10280_v13  ;;  %8237 = vmatprep.subr.bf16.mxu0 %v8634_v23  ;;  %v10375_v12 = vadd.f32 %v7867_v10, %v2883_v7  ;;  %v8637_v13 = vld [vmem:[%s10734_s5 + $0x5d0] sm:$0xff]   ;;  %v3369_v5 = vpop.f32.mrf.mxu0 }
 0x3a7   : > { %v7844_v31 = vpop.f32.mrf.mxu1  ;;  %v5512_v10 = vrot.slane %v5510_v40, 2  ;;  %v5515_v9 = vrot.slane %v5513_v25, 3  ;;  %v5545_v25 = vshll.u32 %v10423_v48, 16 }
 0x3a8   : > { %v2884_v41 = vadd.f32 %v7844_v31, %v10289_v45  ;;  %8164 = vmatpush3.bf16.msra.mxu1 %v8633_v49  ;;  %v10378_v59 = vadd.f32 %v3039_v28, %v2881_v3  ;;  %v8649_v31 = vld [vmem:[%s10734_s5 + $0x658] sm:$0xff]  }
 0x3a9   : > { %8238 = vmatpush3.bf16.msra.mxu0 %v8634_v23  ;;  %v2865_v26 = vpop.f32.mrf.mxu1  ;;  %8165 = vmatprep.subr.bf16.mxu1 %v8635_v38  ;;  %v5516_v28 = vor.u32 %v5515_v9, %v5512_v10 }
 0x3aa   : > { %v2882_v30 = vadd.f32 %v2865_v26, %v10291_v32  ;;  %8239 = vmatprep.subr.bf16.mxu0 %v8636_v39  ;;  %v10387_v45 = vadd.f32 %v7868_v14, %v2884_v41  ;;  %v8640_v32 = vld [vmem:[%s10734_s5 + $0x680] sm:$0xff]   ;;  %v7916_v26 = vpop.f32.mrf.mxu0 }
 0x3ac   : > { %8166 = vmatpush3.bf16.msra.mxu1 %v8635_v38  ;;  %v10389_v33 = vadd.f32 %v3042_v15, %v2882_v30 }
 0x3ad   : > { %8240 = vmatpush3.bf16.msra.mxu0 %v8636_v39  ;;  %8167 = vmatprep.subr.bf16.mxu1 %v8637_v13 }
 0x3ae   : > { %8241 = vmatprep.subr.bf16.mxu0 %v8638_v46 }
 0x3b0   : > { %8168 = vmatpush3.bf16.msra.mxu1 %v8637_v13 }
 0x3b1   : > { %8242 = vmatpush3.bf16.msra.mxu0 %v8638_v46  ;;  %8169 = vmatprep.subr.bf16.mxu1 %v8639_v20 }
 0x3b2   : > { %8243 = vmatprep.subr.bf16.mxu0 %v8640_v32 }
 0x3b4   : > { %8170 = vmatpush3.bf16.msra.mxu1 %v8639_v20  ;;  %v3372_v20 = vpop.f32.mrf.mxu0 }
 0x3b5   : > { %8244 = vmatpush3.bf16.msra.mxu0 %v8640_v32  ;;  %8171 = vmatprep.subr.bf16.mxu1 %v8641_v21 }
 0x3b8   : > { %8246 = vmatmul.mubr.bf16.vlgmr.msra.gmra.mxu0 %v5699_v56  ;;  %8172 = vmatpush3.bf16.msra.mxu1 %v8641_v21  ;;  %v7959_v21 = vpop.f32.mrf.mxu0 }
 0x3b9   : > { %8249 = vmatprep.mubr.bf16.mxu0 %v5701_v11  ;;  %8205 = vmatprep.subr.bf16.mxu1 %v8644_v0 }
 0x3ba   : > { %v3687_v22 = vpop.f32.mrf.mxu0 }
 0x3bb   : > { %v7887_v6 = vpop.f32.mrf.mxu1  ;;  %8174 = vmatmul.mubr.bf16.vlgmr.msra.gmra.mxu1 %v9174_v55 }
 0x3bc   : > { %v3209_v34 = vadd.f32 %v7887_v6, %v10347_v63  ;;  %8177 = vmatprep.mubr.bf16.mxu1 %v9548_v60  ;;  %8206 = vmatpush3.bf16.msra.mxu1 %v8644_v0  ;;  %v5703_v63 = vsel %vm2563_vm7, %v5700_v53, %v5702_v4  ;;  %v5524_v60 = vor.u32 %v5523_v18, %v5520_v24  ;;  %v5538_v0 = vrot.slane %v5536_v37, 2 }
 0x3bd   : > { %v3176_v62 = vpop.f32.mrf.mxu1  ;;  %8207 = vmatprep.subr.bf16.mxu1 %v8645_v58  ;;  %v5547_v4 = vrot.slane %v5545_v25, 3  ;;  %v8657_v25 = vld [vmem:[%s10737_s8 + $0x18] sm:$0xff]  }
 0x3be   : > { %v3207_v35 = vadd.f32 %v3176_v62, %v10353_v17  ;;  %v10433_v55 = vadd.f32 %v7911_v50, %v3209_v34  ;;  %v8648_v17 = vld [vmem:[%s10734_s5 + $0x660] sm:$0xff]   ;;  %v5530_v50 = vshll.u32 %v10398_v43, 16 }
 0x3bf   : > { %v7888_v16 = vpop.f32.mrf.mxu1 }
 0x3c0   : > { %v3210_v49 = vadd.f32 %v7888_v16, %v10362_v51  ;;  %8250 = vmatmul.mubr.bf16.gmra.mxu0 %v5703_v63  ;;  %8208 = vmatpush3.bf16.msra.mxu1 %v8645_v58  ;;  %v10437_v52 = vadd.f32 %v3353_v2, %v3207_v35  ;;  %v5525_v51 = vsel %vm2376_vm6, %v5516_v28, %v5524_v60  ;;  %v5539_v2 = vshll.u32 %v10401_v47, 16 }
 0x3c1   : > { %v3179_v23 = vpop.f32.mrf.mxu1  ;;  %8209 = vmatprep.subr.bf16.mxu1 %v8647_v19  ;;  %v5532_v53 = vrot.slane %v5530_v50, 3 }
 0x3c2   : > { %v3208_v36 = vadd.f32 %v3179_v23, %v10366_v54  ;;  %v3387_v7 = vadd.f32 %v7912_v44, %v3210_v49  ;;  %v5541_v44 = vrot.slane %v5539_v2, 3  ;;  %v8653_v2 = vld [vmem:[%s10737_s8 + $0x38] sm:$0xff]  }
 0x3c3   : > { %v7891_v38 = vpop.f32.mrf.mxu1  ;;  %8178 = vmatmul.mubr.bf16.gmra.mxu1 %v5156_v1 }
 0x3c4   : > { %v3213_v3 = vadd.f32 %v7891_v38, %v10375_v12  ;;  %8210 = vmatpush3.bf16.msra.mxu1 %v8647_v19  ;;  %8221 = vmatprep.mubr.bf16.mxu1 %v5525_v51  ;;  %v3385_v39 = vadd.f32 %v3356_v61, %v3208_v36  ;;  %v8650_v12 = vld [vmem:[%s10734_s5 + $0x650] sm:$0xff]   ;;  %v5542_v8 = vor.u32 %v5541_v44, %v5538_v0 }
 0x3c5   : > { %v3192_v14 = vpop.f32.mrf.mxu1  ;;  %8211 = vmatprep.subr.bf16.mxu1 %v8648_v17 }
 0x3c6   : > { %v3211_v54 = vadd.f32 %v3192_v14, %v10378_v59  ;;  %v3390_v41 = vadd.f32 %v7915_v27, %v3213_v3  ;;  %v8651_v59 = vld [vmem:[%s10734_s5 + $0x648] sm:$0xff]   ;;  %v5548_v35 = vsel %vm2376_vm6, %v5542_v8, %v5547_v4  ;;  %v8660_v4 = vld [vmem:[%s10737_s8] sm:$0xff]  }
 0x3c7   : > { %v7892_v13 = vpop.f32.mrf.mxu1 }
 0x3c8   : > { %v3214_v29 = vadd.f32 %v7892_v13, %v10387_v45  ;;  %8212 = vmatpush3.bf16.msra.mxu1 %v8648_v17  ;;  %v3388_v1 = vadd.f32 %v3369_v5, %v3211_v54  ;;  %v5527_v45 = vshrl.u32 %v10398_v43, 16  ;;  %v7960_v43 = vpop.f32.mrf.mxu0 }
 0x3c9   : > { %v3195_v30 = vpop.f32.mrf.mxu1  ;;  %8213 = vmatprep.subr.bf16.mxu1 %v8649_v31 }
 0x3ca   : > { %v3212_v46 = vadd.f32 %v3195_v30, %v10389_v33  ;;  %v3391_v15 = vadd.f32 %v7916_v26, %v3214_v29  ;;  %v8652_v33 = vld [vmem:[%s10734_s5 + $0x640] sm:$0xff]   ;;  %v5529_v42 = vrot.slane %v5527_v45, 2  ;;  %v3690_v47 = vpop.f32.mrf.mxu0 }
 0x3cc   : > { %8214 = vmatpush3.bf16.msra.mxu1 %v8649_v31  ;;  %v3389_v32 = vadd.f32 %v3372_v20, %v3212_v46  ;;  %v5533_v56 = vor.u32 %v5532_v53, %v5529_v42  ;;  %v7963_v18 = vpop.f32.mrf.mxu0  ;;  %v8655_v42 = vld [vmem:[%s10737_s8 + $0x28] sm:$0xff]  }
 0x3cd   : > { %8215 = vmatprep.subr.bf16.mxu1 %v8650_v12 }
 0x3ce   : > { %v5534_v57 = vsel %vm2376_vm6, %v5524_v60, %v5533_v56  ;;  %v5543_v58 = vsel %vm2376_vm6, %v5533_v56, %v5542_v8  ;;  %v3703_v16 = vpop.f32.mrf.mxu0 }
 0x3d0   : > { %8216 = vmatpush3.bf16.msra.mxu1 %v8650_v12  ;;  %v7964_v23 = vpop.f32.mrf.mxu0 }
 0x3d1   : > { %8217 = vmatprep.subr.bf16.mxu1 %v8651_v59 }
 0x3d2   : > { %v3706_v51 = vpop.f32.mrf.mxu0 }
 0x3d4   : > { %8218 = vmatpush3.bf16.msra.mxu1 %v8651_v59 }
 0x3d5   : > { %8219 = vmatprep.subr.bf16.mxu1 %v8652_v33 }
 0x3d8   : > { %8220 = vmatpush3.bf16.msra.mxu1 %v8652_v33  ;;  %v8654_v33 = vld [vmem:[%s10737_s8 + $0x30] sm:$0xff]  }
 0x3d9   : > { %8253 = vmatprep.subr.bf16.mxu1 %v8653_v2 }
 0x3db   : > { %v7935_v11 = vpop.f32.mrf.mxu1  ;;  %8222 = vmatmul.mubr.bf16.vlgmr.msra.gmra.mxu1 %v5534_v57 }
 0x3dc   : > { %v3567_v40 = vadd.f32 %v7935_v11, %v10433_v55  ;;  %8225 = vmatprep.mubr.bf16.mxu1 %v5543_v58  ;;  %8254 = vmatpush3.bf16.msra.mxu1 %v8653_v2  ;;  %v8656_v11 = vld [vmem:[%s10737_s8 + $0x20] sm:$0xff]  }
 0x3dd   : > { %v3534_v61 = vpop.f32.mrf.mxu1  ;;  %8255 = vmatprep.subr.bf16.mxu1 %v8654_v33 }
 0x3de   : > { %v3565_v6 = vadd.f32 %v3534_v61, %v10437_v52  ;;  %v3720_v24 = vadd.f32 %v7959_v21, %v3567_v40 }
 0x3df   : > { %v7936_v34 = vpop.f32.mrf.mxu1 }
 0x3e0   : > { %v3568_v62 = vadd.f32 %v7936_v34, %v3387_v7  ;;  %v3718_v19 = vadd.f32 %v3687_v22, %v3565_v6  ;;  %8256 = vmatpush3.bf16.msra.mxu1 %v8654_v33 }
 0x3e1   : > { %v3537_v10 = vpop.f32.mrf.mxu1  ;;  %8257 = vmatprep.subr.bf16.mxu1 %v8655_v42 }
 0x3e2   : > { %v3566_v9 = vadd.f32 %v3537_v10, %v3385_v39  ;;  %v10472_v27 = vadd.f32 %v7960_v43, %v3568_v62  ;;  %v8007_v39 = vpop.f32.mrf.mxu0  ;;  %v8659_v62 = vld [vmem:[%s10737_s8 + $0x8] sm:$0xff]  }
 0x3e3   : > { %v7939_v55 = vpop.f32.mrf.mxu1  ;;  %8226 = vmatmul.mubr.bf16.gmra.mxu1 %v5548_v35 }
 0x3e4   : > { %v3571_v63 = vadd.f32 %v7939_v55, %v3390_v41  ;;  %v10474_v48 = vadd.f32 %v3690_v47, %v3566_v9  ;;  %v4078_v14 = vpop.f32.mrf.mxu0  ;;  %8258 = vmatpush3.bf16.msra.mxu1 %v8655_v42 }
 0x3e5   : > { %v3550_v60 = vpop.f32.mrf.mxu1  ;;  %8259 = vmatprep.subr.bf16.mxu1 %v8656_v11 }
 0x3e6   : > { %v3569_v49 = vadd.f32 %v3550_v60, %v3388_v1  ;;  %v3724_v52 = vadd.f32 %v7963_v18, %v3571_v63  ;;  %v10480_v31 = vpop.f32.mrf.mxu0 }
 0x3e7   : > { %v7940_v28 = vpop.f32.mrf.mxu1 }
 0x3e8   : > { %v3572_v17 = vadd.f32 %v7940_v28, %v3391_v15  ;;  %v3722_v36 = vadd.f32 %v3703_v16, %v3569_v49  ;;  %v10484_v1 = vpop.f32.mrf.mxu0  ;;  %8260 = vmatpush3.bf16.msra.mxu1 %v8656_v11 }
 0x3e9   : > { %v3553_v7 = vpop.f32.mrf.mxu1  ;;  %8261 = vmatprep.subr.bf16.mxu1 %v8657_v25 }
 0x3ea   : > { %v3570_v5 = vadd.f32 %v3553_v7, %v3389_v32  ;;  %v10476_v38 = vadd.f32 %v7964_v23, %v3572_v17  ;;  %v8011_v15 = vpop.f32.mrf.mxu0 }
 0x3ec   : > { %v10478_v3 = vadd.f32 %v3706_v51, %v3570_v5  ;;  %v4094_v21 = vpop.f32.mrf.mxu0  ;;  %8262 = vmatpush3.bf16.msra.mxu1 %v8657_v25 }
 0x3ee   : > { %v10505_v53 = vpop.f32.mrf.mxu0 }
 0x3f0   : > { %v10507_v22 = vpop.f32.mrf.mxu0 }
 0x3f8   : > { %v10509_v0 = vpop.f32.mrf.mxu0 }
 0x3fa   : > { %v10511_v44 = vpop.f32.mrf.mxu0 }
 0x3fb   : > { %v7983_v54 = vpop.f32.mrf.mxu1 }
 0x3fc   : > { %v3897_v41 = vadd.f32 %v7983_v54, %v3720_v24  ;;  %v10515_v43 = vpop.f32.mrf.mxu0  ;;  %v8658_v24 = vld [vmem:[%s10737_s8 + $0x10] sm:$0xff]  }
 0x3fd   : > { %v3864_v26 = vpop.f32.mrf.mxu1  ;;  %8263 = vmatprep.subr.bf16.mxu1 %v8658_v24 }
 0x3fe   : > { %v3895_v13 = vadd.f32 %v3864_v26, %v3718_v19  ;;  %v10482_v29 = vadd.f32 %v8007_v39, %v3897_v41  ;;  %v10521_v47 = vpop.f32.mrf.mxu0  ;;  %8264 = vmatpush3.bf16.msra.mxu1 %v8658_v24 }
 0x3ff   : > { %v10486_v30 = vpop.f32.mrf.mxu1  ;;  %8265 = vmatprep.subr.bf16.mxu1 %v8659_v62 }
 0x400   : > { %v10488_v12 = vadd.f32 %v4078_v14, %v3895_v13  ;;  %v10528_v40 = vpop.f32.mrf.mxu0 }
 0x401   : > { %v10490_v46 = vpop.f32.mrf.mxu1 }
 0x402   : > { %v10535_v6 = vpop.f32.mrf.mxu0  ;;  %8266 = vmatpush3.bf16.msra.mxu1 %v8659_v62 }
 0x403   : > { %v7987_v20 = vpop.f32.mrf.mxu1  ;;  %8267 = vmatprep.subr.bf16.mxu1 %v8660_v4 }
 0x404   : > { %v3901_v32 = vadd.f32 %v7987_v20, %v3724_v52  ;;  %v10542_v34 = vpop.f32.mrf.mxu0 }
 0x405   : > { %v3880_v59 = vpop.f32.mrf.mxu1 }
 0x406   : > { %v3899_v45 = vadd.f32 %v3880_v59, %v3722_v36  ;;  %v10492_v50 = vadd.f32 %v8011_v15, %v3901_v32  ;;  %v10552_v10 = vpop.f32.mrf.mxu0  ;;  %8268 = vmatpush3.bf16.msra.mxu1 %v8660_v4 }
 0x407   : > { %v10513_v56 = vpop.f32.mrf.mxu1 }
 0x408   : > { %v10494_v37 = vadd.f32 %v4094_v21, %v3899_v45 }
 0x409   : > { %v10517_v8 = vpop.f32.mrf.mxu1 }
 0x418   : > { %v10554_v9 = vpop.f32.mrf.mxu0 }
 0x41a   : > { %v10556_v16 = vpop.f32.mrf.mxu0 }
 0x41b   : > { %v10519_v57 = vpop.f32.mrf.mxu1 }
 0x41c   : > { %v10560_v63 = vpop.f32.mrf.mxu0 }
 0x41d   : > { %v10526_v58 = vpop.f32.mrf.mxu1 }
 0x41e   : > { %v10564_v52 = vpop.f32.mrf.mxu0 }
 0x41f   : > { %v10533_v61 = vpop.f32.mrf.mxu1 }
 0x420   : > { %v10566_v28 = vpop.f32.mrf.mxu0 }
 0x421   : > { %v10540_v18 = vpop.f32.mrf.mxu1 }
 0x422   : > { %v10568_v36 = vpop.f32.mrf.mxu0 }
 0x423   : > { %v10550_v19 = vpop.f32.mrf.mxu1 }
 0x424   : > { %v10570_v5 = vpop.f32.mrf.mxu0 }
 0x425   : > { %v4249_v35 = vpop.f32.mrf.mxu1  ;;  %10752 = vst [vmem:[#allocation5_spill] sm:$0xff] %v10570_v5 }
 0x426   : > { %v10574_v39 = vpop.f32.mrf.mxu0 }
 0x427   : > { %v10558_v55 = vpop.f32.mrf.mxu1  ;;  %10753 = vst [vmem:[#allocation6_spill] sm:$0xff] %v10574_v39 }
 0x429   : > { %v10562_v60 = vpop.f32.mrf.mxu1 }
 0x438   : > { %v10576_v14 = vpop.f32.mrf.mxu0 }
 0x43a   : > { %v10580_v41 = vpop.f32.mrf.mxu0 }
 0x43b   : > { %v8079_v49 = vpop.f32.mrf.mxu1 }
 0x43c   : > { %v10584_v13 = vpop.f32.mrf.mxu0 }
 0x43d   : > { %v4580_v23 = vpop.f32.mrf.mxu1 }
 0x43e   : > { %v10588_v32 = vpop.f32.mrf.mxu0 }
 0x43f   : > { %v8080_v17 = vpop.f32.mrf.mxu1  ;;  %10755 = vst [vmem:[#allocation8_spill] sm:$0xff] %v10588_v32 }
 0x440   : > { %v10590_v45 = vpop.f32.mrf.mxu0 }
 0x441   : > { %v4583_v7 = vpop.f32.mrf.mxu1  ;;  %10756 = vst [vmem:[#allocation9_spill] sm:$0xff] %v10590_v45 }
 0x442   : > { %v10592_v2 = vpop.f32.mrf.mxu0 }
 0x443   : > { %v10572_v51 = vpop.f32.mrf.mxu1  ;;  %10757 = vst [vmem:[#allocation10_spill] sm:$0xff] %v10592_v2 }
 0x444   : > { %v10594_v42 = vpop.f32.mrf.mxu0 }
 0x445   : > { %v10578_v54 = vpop.f32.mrf.mxu1  ;;  %10758 = vst [vmem:[#allocation11_spill] sm:$0xff] %v10594_v42 }
 0x446   : > { %v10598_v25 = vpop.f32.mrf.mxu0 }
 0x447   : > { %v10582_v26 = vpop.f32.mrf.mxu1  ;;  %10759 = vst [vmem:[#allocation12_spill] sm:$0xff] %v10598_v25 }
 0x449   : > { %v10586_v15 = vpop.f32.mrf.mxu1 }
 0x44a   : > { %10754 = vst [vmem:[#allocation7_spill] sm:$0xff] %v10586_v15  ;;  %v3898_v15 = vadd.f32 %v10486_v30, %v10472_v27 }
 0x458   : > { %v10600_v24 = vpop.f32.mrf.mxu0 }
 0x459   : > { %10760 = vst [vmem:[#allocation13_spill] sm:$0xff] %v10600_v24  ;;  %v3896_v24 = vadd.f32 %v10490_v46, %v10474_v48  ;;  %v3902_v48 = vadd.f32 %v10513_v56, %v10476_v38 }
 0x45a   : > { %v10604_v4 = vpop.f32.mrf.mxu0 }
 0x45b   : > { %v8127_v20 = vpop.f32.mrf.mxu1  ;;  %10762 = vst [vmem:[#allocation15_spill] sm:$0xff] %v10604_v4  ;;  %v4266_v4 = vadd.f32 %v10519_v57, %v10482_v29  ;;  %v4116_v38 = vadd.f32 %v10505_v53, %v3902_v48 }
 0x45c   : > { %v10608_v32 = vpop.f32.mrf.mxu0 }
 0x45d   : > { %v4910_v59 = vpop.f32.mrf.mxu1  ;;  %10764 = vst [vmem:[#allocation17_spill] sm:$0xff] %v10608_v32  ;;  %v4264_v32 = vadd.f32 %v10526_v58, %v10488_v12  ;;  %v4436_v30 = vadd.f32 %v10509_v0, %v4266_v4  ;;  %v3900_v0 = vadd.f32 %v10517_v8, %v10478_v3  ;;  %v10770_v4 = vld [vmem:[#allocation5_spill] sm:$0xff] }
 0x45e   : > { %v10612_v5 = vpop.f32.mrf.mxu0 }
 0x45f   : > { %v8128_v21 = vpop.f32.mrf.mxu1  ;;  %10766 = vst [vmem:[#allocation19_spill] sm:$0xff] %v10612_v5  ;;  %v4110_v5 = vadd.f32 %v10484_v1, %v3896_v24  ;;  %v4613_v57 = vadd.f32 %v8079_v49, %v4436_v30 }
 0x460   : > { %v10616_v25 = vpop.f32.mrf.mxu0  ;;  %v10772_v48 = vld [vmem:[#allocation13_spill] sm:$0xff] }
 0x461   : > { %v4913_v33 = vpop.f32.mrf.mxu1  ;;  %10767 = vst [vmem:[#allocation20_spill] sm:$0xff] %v10616_v25  ;;  %v4265_v46 = vadd.f32 %v10540_v18, %v4110_v5  ;;  %v4434_v25 = vadd.f32 %v10511_v44, %v4264_v32  ;;  %v4766_v44 = vadd.f32 %v10554_v9, %v4613_v57 }
 0x463   : > { %v10596_v11 = vpop.f32.mrf.mxu1  ;;  %v4611_v58 = vadd.f32 %v4580_v23, %v4434_v25  ;;  %v4435_v56 = vadd.f32 %v10521_v47, %v4265_v46  ;;  %v4943_v23 = vadd.f32 %v8127_v20, %v4766_v44 }
 0x465   : > { %v10602_v62 = vpop.f32.mrf.mxu1  ;;  %v4764_v3 = vadd.f32 %v10556_v16, %v4611_v58 }
 0x466   : > { %10761 = vst [vmem:[#allocation14_spill] sm:$0xff] %v10602_v62  ;;  %v10625_v62 = vpop.f32.mrf.mxu0 }
 0x467   : > { %v10606_v39 = vpop.f32.mrf.mxu1 }
 0x468   : > { %10763 = vst [vmem:[#allocation16_spill] sm:$0xff] %v10606_v39  ;;  %v10634_v12 = vpop.f32.mrf.mxu0 }
 0x469   : > { %v10610_v45 = vpop.f32.mrf.mxu1 }
 0x46a   : > { %10765 = vst [vmem:[#allocation18_spill] sm:$0xff] %v10610_v45  ;;  %v4112_v45 = vadd.f32 %v10480_v31, %v3898_v15  ;;  %v4270_v31 = vadd.f32 %v10550_v19, %v10492_v50  ;;  %v10645_v5 = vpop.f32.mrf.mxu0  ;;  %v4271_v50 = vadd.f32 %v10558_v55, %v4116_v38  ;;  %v4612_v19 = vadd.f32 %v4583_v7, %v4435_v56  ;;  %v10777_v56 = vld [vmem:[#allocation10_spill] sm:$0xff] }
 0x46c   : > { %v4267_v27 = vadd.f32 %v10533_v61, %v4112_v45  ;;  %v4268_v61 = vadd.f32 %v4249_v35, %v10494_v37  ;;  %v4114_v37 = vadd.f32 %v10507_v22, %v3900_v0  ;;  %v4765_v7 = vadd.f32 %v10564_v52, %v4612_v19 }
 0x46d   : > { %v5124_v22 = vadd.f32 %v10576_v14, %v4943_v23  ;;  %v10768_v14 = vld [vmem:[#allocation7_spill] sm:$0xff] }
 0x46e   : > { %v4437_v1 = vadd.f32 %v10515_v43, %v4267_v27  ;;  %v4440_v43 = vadd.f32 %v10528_v40, %v4270_v31  ;;  %v4438_v53 = vadd.f32 %v10535_v6, %v4268_v61  ;;  %v4269_v15 = vadd.f32 %v10562_v60, %v4114_v37  ;;  %v10776_v61 = vld [vmem:[#allocation6_spill] sm:$0xff] }
 0x46f   : > { %v4441_v40 = vadd.f32 %v10542_v34, %v4271_v50  ;;  %v4942_v32 = vadd.f32 %v4913_v33, %v4765_v7  ;;  %v10773_v46 = vld [vmem:[#allocation16_spill] sm:$0xff] }
 0x470   : > { %v4614_v49 = vadd.f32 %v8080_v17, %v4437_v1  ;;  %v4617_v35 = vadd.f32 %v10572_v51, %v4440_v43  ;;  %v4941_v17 = vadd.f32 %v4910_v59, %v4764_v3  ;;  %v4615_v55 = vadd.f32 %v10578_v54, %v4438_v53  ;;  %v10775_v1 = vld [vmem:[#allocation15_spill] sm:$0xff] }
 0x471   : > { %v4618_v6 = vadd.f32 %v10582_v26, %v4441_v40  ;;  %v4439_v60 = vadd.f32 %v10552_v10, %v4269_v15  ;;  %v10769_v26 = vld [vmem:[#allocation14_spill] sm:$0xff]  ;;  %v10780_v53 = vld [vmem:[#allocation11_spill] sm:$0xff] }
 0x472   : > { %v4767_v9 = vadd.f32 %v10560_v63, %v4614_v49  ;;  %v4770_v51 = vadd.f32 %v10566_v28, %v4617_v35  ;;  %v5122_v63 = vadd.f32 %v10580_v41, %v4941_v17  ;;  %v4768_v54 = vadd.f32 %v10568_v36, %v4615_v55  ;;  %v10771_v28 = vld [vmem:[#allocation8_spill] sm:$0xff]  ;;  %v10779_v3 = vld [vmem:[#allocation18_spill] sm:$0xff] }
 0x473   : > { %v4616_v24 = vadd.f32 %v10768_v14, %v4439_v60  ;;  %v4771_v27 = vadd.f32 %v10770_v4, %v4618_v6  ;;  %v10783_v60 = vld [vmem:[#allocation12_spill] sm:$0xff] }
 0x474   : > { %v4944_v16 = vadd.f32 %v8128_v21, %v4767_v9  ;;  %v4947_v34 = vadd.f32 %v10596_v11, %v4770_v51  ;;  %v4945_v33 = vadd.f32 %v10769_v26, %v4768_v54  ;;  %v10781_v9 = vld [vmem:[#allocation19_spill] sm:$0xff] }
 0x475   : > { %v4948_v36 = vadd.f32 %v10773_v46, %v4771_v27  ;;  %v4769_v38 = vadd.f32 %v10776_v61, %v4616_v24 }
 0x476   : > { %v5125_v25 = vadd.f32 %v10584_v13, %v4944_v16  ;;  %v5126_v49 = vadd.f32 %v10777_v56, %v4945_v33  ;;  %v7026_v16 = vld [vmem:[%s10736_s7] ss:$0 sm:$0xff] }
 0x477   : > { %v4946_v37 = vadd.f32 %v10779_v3, %v4769_v38  ;;  %v5129_v35 = vadd.f32 %v10780_v53, %v4948_v36 }
 0x478   : > { %v8247_v8 = vpop.f32.mrf.mxu0 }
 0x479   : > { %v5127_v54 = vadd.f32 %v10783_v60, %v4946_v37 }
 0x47a   : > { %v5790_v20 = vpop.f32.mrf.mxu0 }
 0x47b   : > { %v8175_v2 = vpop.f32.mrf.mxu1 }
 0x47c   : > { %v5277_v59 = vadd.f32 %v8175_v2, %v5124_v22  ;;  %v8248_v52 = vpop.f32.mrf.mxu0  ;;  %v5123_v2 = vadd.f32 %v10771_v28, %v4942_v32 }
 0x47d   : > { %v5244_v42 = vpop.f32.mrf.mxu1 }
 0x47e   : > { %v5275_v21 = vadd.f32 %v5244_v42, %v5122_v63  ;;  %v5454_v10 = vadd.f32 %v10772_v48, %v5277_v59  ;;  %v5793_v31 = vpop.f32.mrf.mxu0  ;;  %v10774_v42 = vld [vmem:[#allocation9_spill] sm:$0xff]  ;;  %v10782_v59 = vld [vmem:[#allocation20_spill] sm:$0xff] }
 0x47f   : > { %v8176_v39 = vpop.f32.mrf.mxu1  ;;  %v5128_v58 = vadd.f32 %v10774_v42, %v4947_v34 }
 0x480   : > { %v5278_v41 = vadd.f32 %v8176_v39, %v5125_v25  ;;  %v5452_v0 = vadd.f32 %v10775_v1, %v5275_v21  ;;  %v7025_v39 = vld [vmem:[%s10735_s6] ss:$0 sm:$0xff]  ;;  %v8251_v55 = vpop.f32.mrf.mxu0 }
 0x481   : > { %v5247_v29 = vpop.f32.mrf.mxu1 }
 0x482   : > { %v5276_v57 = vadd.f32 %v5247_v29, %v5123_v2  ;;  %v10778_v29 = vld [vmem:[#allocation17_spill] sm:$0xff]  ;;  %v5806_v14 = vpop.f32.mrf.mxu0 }
 0x483   : > { %v8179_v18 = vpop.f32.mrf.mxu1  ;;  %v5455_v23 = vadd.f32 %v10778_v29, %v5278_v41 }
 0x484   : > { %v5281_v50 = vadd.f32 %v8179_v18, %v5128_v58  ;;  %v5453_v15 = vadd.f32 %v10781_v9, %v5276_v57  ;;  %v8252_v46 = vpop.f32.mrf.mxu0  ;;  %v7166_v9 = vld [vmem:[%s8996_s18 + $0x30] sm:$0xff]  }
 0x485   : > { %v5260_v47 = vpop.f32.mrf.mxu1 }
 0x486   : > { %v5279_v40 = vadd.f32 %v5260_v47, %v5126_v49  ;;  %v5458_v63 = vadd.f32 %v10782_v59, %v5281_v50  ;;  %v5809_v38 = vpop.f32.mrf.mxu0 }
 0x487   : > { %v8180_v45 = vpop.f32.mrf.mxu1 }
 0x488   : > { %v5456_v33 = vadd.f32 %v10625_v62, %v5279_v40  ;;  %v7134_v40 = vunpack.c.h.bf16 %v7166_v9 }
 0x489   : > { %v5263_v30 = vpop.f32.mrf.mxu1 }
 0x48a   : > { %v5280_v4 = vadd.f32 %v5263_v30, %v5127_v54 }
 0x49b   : > { %v8223_v11 = vpop.f32.mrf.mxu1 }
 0x49c   : > { %v5668_v13 = vadd.f32 %v8223_v11, %v5454_v10 }
 0x49d   : > { %v5635_v44 = vpop.f32.mrf.mxu1 }
 0x49e   : > { %v5823_v19 = vadd.f32 %v8247_v8, %v5668_v13  ;;  %v5666_v43 = vadd.f32 %v5635_v44, %v5452_v0  ;;  %v5282_v8 = vadd.f32 %v8180_v45, %v5129_v35 }
 0x49f   : > { %v8224_v17 = vpop.f32.mrf.mxu1 }
 0x4a0   : > { %v5838_v7 = vmul.f32 %v7025_v39, %v5823_v19  ;;  %v5821_v22 = vadd.f32 %v5790_v20, %v5666_v43  ;;  %v5669_v18 = vadd.f32 %v8224_v17, %v5455_v23  ;;  %v5459_v45 = vadd.f32 %v10634_v12, %v5282_v8 }
 0x4a1   : > { %v5638_v6 = vpop.f32.mrf.mxu1  ;;  %v6061_v8 = vrot.slane %v7134_v40, 3 }
 0x4a2   : > { %v5824_v32 = vadd.f32 %v8248_v52, %v5669_v18  ;;  %v5667_v51 = vadd.f32 %v5638_v6, %v5453_v15  ;;  %v5853_v34 = vadd.f32 %v7026_v16, %v5838_v7  ;;  %v5836_v21 = vmul.f32 %v7025_v39, %v5821_v22  ;;  %v7167_v15 = vld [vmem:[%s8996_s18 + $0x38] sm:$0xff]  }
 0x4a3   : > { %v8227_v25 = vpop.f32.mrf.mxu1  ;;  %v7137_v7 = vunpack.c.l.bf16 %v7167_v15  ;;  %v7138_v18 = vunpack.c.h.bf16 %v7167_v15 }
 0x4a4   : > { %v5839_v47 = vmul.f32 %v7025_v39, %v5824_v32  ;;  %v5822_v24 = vadd.f32 %v5793_v31, %v5667_v51  ;;  %v5672_v26 = vadd.f32 %v8227_v25, %v5458_v63  ;;  %v5861_v41 = vmax.f32 %v5853_v34, 0.0  ;;  %v7168_v32 = vld [vmem:[%s8996_s18 + $0x40] sm:$0xff]   ;;  %v7044_v51 = vld [vmem:[%s8996_s18 + $0x48] sm:$0xf] }
 0x4a5   : > { %v5651_v20 = vpop.f32.mrf.mxu1  ;;  %v5851_v10 = vadd.f32 %v7026_v16, %v5836_v21  ;;  %v5457_v31 = vadd.f32 %v10645_v5, %v5280_v4  ;;  %v6063_v6 = vrot.slane %v7137_v7, 3  ;;  %v7036_v63 = vld [vmem:[%s10739_s10] ss:$0 sm:$0xff]  ;;  %v6065_v21 = vrot.slane %v7138_v18, 3 }
 0x4a6   : > { %v5854_v27 = vadd.f32 %v7026_v16, %v5839_v47  ;;  %v5837_v52 = vmul.f32 %v7025_v39, %v5822_v24  ;;  %v5827_v28 = vadd.f32 %v8251_v55, %v5672_v26  ;;  %v5670_v2 = vadd.f32 %v5651_v20, %v5456_v33  ;;  %v7037_v55 = vld [vmem:[%s8996_s18 + $0x2c] sm:$0xe] }
 0x4a7   : > { %v8228_v48 = vpop.f32.mrf.mxu1  ;;  %v5859_v0 = vmax.f32 %v5851_v10, 0.0  ;;  %v6041_v22 = vunpack.c.l.bf16 %v7037_v55  ;;  %v6048_v47 = vunpack.c.l.bf16 %v7044_v51  ;;  %v6064_v26 = vsel %vm2563_vm7, %v6061_v8, %v6063_v6 }
 0x4a8   : > { %v5862_v36 = vmax.f32 %v5854_v27, 0.0  ;;  %v5842_v57 = vmul.f32 %v7025_v39, %v5827_v28  ;;  %v5825_v11 = vadd.f32 %v5806_v14, %v5670_v2  ;;  %v5673_v42 = vadd.f32 %v8228_v48, %v5459_v45 }
 0x4a9   : > { %v5654_v58 = vpop.f32.mrf.mxu1  ;;  %v5852_v62 = vadd.f32 %v7026_v16, %v5837_v52  ;;  %v6058_v54 = vrot.slane %v6041_v22, 3  ;;  %v7142_v14 = vunpack.c.h.bf16 %v7168_v32  ;;  %v6066_v52 = vsel %vm2563_vm7, %v6063_v6, %v6065_v21 }
 0x4aa   : > { %v5868_v30 = vpack.c.bf16 %v5862_v36, %v5861_v41  ;;  %v5828_v13 = vadd.f32 %v8252_v46, %v5673_v42  ;;  %v5840_v1 = vmul.f32 %v7025_v39, %v5825_v11  ;;  %v5671_v12 = vadd.f32 %v5654_v58, %v5457_v31 }
 0x4ab   : > { %v5860_v61 = vmax.f32 %v5852_v62, 0.0  ;;  %v5857_v56 = vadd.f32 %v7026_v16, %v5842_v57  ;;  %v6069_v41 = vrot.slane %v7142_v14, 3  ;;  %v6071_v48 = vrot.slane %v6048_v47, 3 }
 0x4ac   : > { %v5843_v49 = vmul.f32 %v7025_v39, %v5828_v13  ;;  %v5826_v44 = vadd.f32 %v5809_v38, %v5671_v12  ;;  %v5855_v5 = vadd.f32 %v7026_v16, %v5840_v1  ;;  %v7141_v10 = vunpack.c.l.bf16 %v7168_v32 }
 0x4ad   : > { %v5867_v50 = vpack.c.bf16 %v5860_v61, %v5859_v0  ;;  %v5865_v29 = vmax.f32 %v5857_v56, 0.0  ;;  %v6072_v13 = vsel %vm2563_vm7, %v6069_v41, %v6071_v48 }
 0x4ae   : > { %v5858_v19 = vadd.f32 %v7026_v16, %v5843_v49  ;;  %v5841_v43 = vmul.f32 %v7025_v39, %v5826_v44  ;;  %v5863_v53 = vmax.f32 %v5855_v5, 0.0  ;;  %v7133_v39 = vunpack.c.l.bf16 %v7166_v9 }
 0x4af   : > { %8269 = vmatprep.mubr.bf16.mxu1 %v5867_v50  ;;  %v6067_v12 = vrot.slane %v7141_v10, 3 }
 0x4b0   : > { %v5866_v23 = vmax.f32 %v5858_v19, 0.0  ;;  %8270 = vmatmul.mubr.bf16.vlgmr.msra.gmra.mxu1 %v5868_v30  ;;  %v5856_v3 = vadd.f32 %v7026_v16, %v5841_v43  ;;  %v7035_v16 = vld [vmem:[%s10738_s9] ss:$0 sm:$0xff]  ;;  %v6059_v34 = vrot.slane %v7133_v39, 3 }
 0x4b1   : > { %v6070_v9 = vsel %vm2563_vm7, %v6067_v12, %v6069_v41 }
 0x4b2   : > { %v5870_v37 = vpack.c.bf16 %v5866_v23, %v5865_v29  ;;  %v5864_v35 = vmax.f32 %v5856_v3, 0.0  ;;  %v6060_v45 = vsel %vm2563_vm7, %v6058_v54, %v6059_v34  ;;  %v6062_v11 = vsel %vm2563_vm7, %v6059_v34, %v6061_v8 }
 0x4b3   : > { %v6068_v29 = vsel %vm2563_vm7, %v6065_v21, %v6067_v12 }
 0x4b4   : > { %v5869_v17 = vpack.c.bf16 %v5864_v35, %v5863_v53 }
 0x4b6   : > { %8273 = vmatprep.mubr.bf16.mxu1 %v5869_v17 }
 0x4b8   : > { %8274 = vmatmul.mubr.bf16.gmra.mxu1 %v5870_v37 }
 0x570   : > { %v8271_v59 = vpop.f32.mrf.mxu1 }
 0x571   : > { %v6009_v60 = vmul.f32 %v8271_v59, %v7035_v16 }
 0x572   : > { %v5969_v25 = vpop.f32.mrf.mxu1 }
 0x573   : > { %v6024_v24 = vadd.f32 %v7036_v63, %v6009_v60  ;;  %v6007_v33 = vmul.f32 %v7035_v16, %v5969_v25 }
 0x574   : > { %v8272_v4 = vpop.f32.mrf.mxu1 }
 0x575   : > { %v6022_v20 = vadd.f32 %v7036_v63, %v6007_v33  ;;  %v6010_v27 = vmul.f32 %v8272_v4, %v7035_v16  ;;  %v6083_v28 = vadd.f32 %v6064_v26, %v6024_v24 }
 0x576   : > { %v5972_v2 = vpop.f32.mrf.mxu1 }
 0x577   : > { %v6025_v46 = vadd.f32 %v7036_v63, %v6010_v27  ;;  %v6008_v36 = vmul.f32 %v7035_v16, %v5972_v2  ;;  %v6081_v57 = vadd.f32 %v6060_v45, %v6022_v20  ;;  %v6091_v30 = vmax.f32 %v6083_v28, 0.0 }
 0x578   : > { %v8275_v42 = vpop.f32.mrf.mxu1 }
 0x579   : > { %v6084_v31 = vadd.f32 %v6066_v52, %v6025_v46  ;;  %v6023_v58 = vadd.f32 %v7036_v63, %v6008_v36  ;;  %v6013_v62 = vmul.f32 %v8275_v42, %v7035_v16  ;;  %v6089_v49 = vmax.f32 %v6081_v57, 0.0 }
 0x57a   : > { %v5985_v1 = vpop.f32.mrf.mxu1 }
 0x57b   : > { %v6092_v0 = vmax.f32 %v6084_v31, 0.0  ;;  %v6082_v61 = vadd.f32 %v6062_v11, %v6023_v58  ;;  %v6028_v38 = vadd.f32 %v7036_v63, %v6013_v62  ;;  %v6011_v56 = vmul.f32 %v7035_v16, %v5985_v1 }
 0x57c   : > { %v8276_v44 = vpop.f32.mrf.mxu1 }
 0x57d   : > { %v7151_v50 = vpack.c.bf16 %v6092_v0, %v6091_v30  ;;  %v6090_v19 = vmax.f32 %v6082_v61, 0.0  ;;  %v6087_v43 = vadd.f32 %v6072_v13, %v6028_v38  ;;  %v6026_v5 = vadd.f32 %v7036_v63, %v6011_v56 }
 0x57e   : > { %v6014_v23 = vmul.f32 %v8276_v44, %v7035_v16  ;;  %v5988_v3 = vpop.f32.mrf.mxu1 }
 0x57f   : > { %7169 = vst [vmem:[%s8870_s29 + $0x8] sm:$0xff] %v7151_v50   ;;  %v7146_v37 = vpack.c.bf16 %v6090_v19, %v6089_v49  ;;  %v6095_v53 = vmax.f32 %v6087_v43, 0.0  ;;  %v6012_v35 = vmul.f32 %v7035_v16, %v5988_v3  ;;  %v6085_v55 = vadd.f32 %v6068_v29, %v6026_v5 }
 0x580   : > { %v6029_v17 = vadd.f32 %v7036_v63, %v6014_v23 }
 0x581   : > { %7147 = vst [vmem:[%s8870_s29] sm:$0xff] %v7146_v37   ;;  %v7084_v15 = vpack.c.bf16 %v6095_v53, %v6095_v53  ;;  %v6027_v40 = vadd.f32 %v7036_v63, %v6012_v35  ;;  %v6093_v18 = vmax.f32 %v6085_v55, 0.0 }
 0x582   : > { %v6088_v7 = vadd.f32 %v6071_v48, %v6029_v17 }
 0x583   : > { %6135 = vst [vmem:[%s8870_s29 + $0x18] sm:$0xf] %v7084_v15  ;;  %v6086_v39 = vadd.f32 %v6070_v9, %v6027_v40 }
 0x584   : > { %v6096_v22 = vmax.f32 %v6088_v7, 0.0 }
 0x585   : > { %v6094_v8 = vmax.f32 %v6086_v39, 0.0 }
 0x586   : > { %v7085_v6 = vpack.c.bf16 %v6096_v22, %v6096_v22 }
 0x587   : > { %v7156_v32 = vpack.c.bf16 %v6094_v8, %v6093_v18 }
 0x588   : > { %6136 = vst [vmem:[%s8870_s29 + $0x1c] sm:$0x3] %v7085_v6 }
 0x589   : > { %7170 = vst [vmem:[%s8870_s29 + $0x10] sm:$0xff] %v7156_v32  }
 0x58a PF: > { %s21_s21 = sadd.s32 1, %s8710_s21   ;;  %s10784_s0 = sld [smem:[#allocation3_spill]] }
 0x58b   : > { %p18_p1 = scmp.ge.s32.totalorder %s21_s21, 10   ;;  %s10785_s28 = sld [smem:[#allocation4_spill]] }
 0x58c   : > { %s10786_s17 = smov %s8702_s19  ;;  %s10787_s18 = smov %s8706_s20 }
 0x58d   :  { %20 = sbr.rel (!%p18_p1) target bundleno = 3 (0x3), region = 132 }
 0x590   : > { %s10788_s19 = smov %s10784_s0 }
 0x591   : > { %s10789_s20 = smov %s10785_s28 }

</bundles_post_ra>
